<compile_context>
chip_gen: v7x
topology: tpu7x:2x2x1
jax: 0.10.0
libtpu: 0.0.40
codegen_flags: <defaults>
</compile_context>

<pallas_src>
import math

import jax
import jax.numpy as jnp
from jax import lax
from jax.experimental import pallas as pl
from jax.experimental.pallas import tpu as pltpu


def _make_attn_kernel(n_head, with_att, compute_dtype):
    """Builds the kernel body for one batch element (grid = (B,))."""

    def kernel(x_ref, wqkv_ref, bqkv_ref, wp_ref, bp_ref, *out_refs):
        if with_att:
            y_ref, att_ref = out_refs
        else:
            (y_ref,) = out_refs
            att_ref = None

        x = x_ref[0]                                   # (T, C) compute dtype
        T, C = x.shape
        hd = C // n_head
        scale = 1.0 / math.sqrt(hd)
        cdt = compute_dtype

        # One full-width fused QKV projection per batch element:
        # (T, C) x (C, 3C) on the MXU, f32 accumulation.  Columns are ordered
        # [q_all_heads | k_all_heads | v_all_heads] so every per-head slice
        # below is a static lane slice.
        qkv = jnp.dot(x, wqkv_ref[...], preferred_element_type=jnp.float32)
        qkv = qkv + bqkv_ref[...]                      # (T, 3C) f32

        # Causal mask from a (T,1) >= (1,T) iota compare, hoisted out of the
        # head loop (no (T,T) int32 temporaries, one compare per batch step).
        row = lax.broadcasted_iota(jnp.int32, (T, 1), 0)
        col = lax.broadcasted_iota(jnp.int32, (1, T), 1)
        causal = row >= col                            # (T, T) bool

        yh_parts = []
        for h in range(n_head):                        # static unroll over heads
            # Fold 1/sqrt(hd) into q: T*hd multiplies instead of T*T.
            q = (qkv[:, h * hd:(h + 1) * hd] * scale).astype(cdt)
            k = qkv[:, C + h * hd:C + (h + 1) * hd].astype(cdt)
            v = qkv[:, 2 * C + h * hd:2 * C + (h + 1) * hd].astype(cdt)

            # Scores q @ k^T (dot_general, no explicit transpose), f32 accum.
            s = lax.dot_general(q, k, (((1,), (1,)), ((), ())),
                                preferred_element_type=jnp.float32)   # (T, T)
            # Finite large negative (NaN-safe); scores stay in f32.
            s = jnp.where(causal, s, -1e30)

            # Softmax over keys; reciprocal on the EUP + one Newton step.
            m = jnp.max(s, axis=-1, keepdims=True)
            p = jnp.exp(s - m)
            l = jnp.sum(p, axis=-1, keepdims=True)
            inv = pl.reciprocal(l, approx=True)
            inv = inv * (2.0 - l * inv)

            # TODO(synk): attn_drop / resid_drop are identity (inference mode).
            if with_att:
                p = p * inv                            # normalized probs needed for att
                att_ref[0, h] = p.astype(att_ref.dtype)
                yh = jnp.dot(p.astype(cdt), v, preferred_element_type=jnp.float32)
            else:
                # att not materialized -> defer normalization to the (T, hd) result.
                yh = jnp.dot(p.astype(cdt), v, preferred_element_type=jnp.float32)
                yh = yh * inv
            yh_parts.append(yh)                        # (T, hd) f32

        # Lane-axis concat == transpose(1,2).reshape(B,T,C) head merge.
        yh_all = jnp.concatenate(yh_parts, axis=-1)    # (T, C) f32

        # Single full-K output projection per batch element: (T,C)x(C,C).
        y = jnp.dot(yh_all.astype(cdt), wp_ref[...],
                    preferred_element_type=jnp.float32) + bp_ref[...]
        y_ref[0] = y.astype(y_ref.dtype)

    return kernel


def causal_self_attention(x, params, n_head, *, compute_dtype=jnp.float32,
                          return_att=True, att_dtype=jnp.float32):
    """x: (B, T, C) f32. Returns (y: (B,T,C) f32, att: (B,n_head,T,T) or None).

    compute_dtype controls the MXU operand dtype (jnp.bfloat16 is the fast path
    on v5e/v6e/v7x); accumulation and softmax math stay f32.  return_att=False
    drops the (B,H,T,T) HBM write entirely (minGPT forward only consumes y);
    att_dtype=jnp.bfloat16 halves the write bandwidth when att is kept.
    """
    B, T, C = x.shape
    assert C % n_head == 0
    wq, wk, wv, wp, bq, bk, bv, bp = params

    # One-time weight prep: fused [q|k|v] weight (C, 3C) and bias (1, 3C).
    wqkv = jnp.concatenate([wq, wk, wv], axis=-1)
    bqkv = jnp.concatenate([bq, bk, bv]).reshape(1, 3 * C)
    bp2 = bp.reshape(1, C)

    cdt = compute_dtype
    x_c = x.astype(cdt)
    wqkv_c = wqkv.astype(cdt)
    wp_c = wp.astype(cdt)
    bqkv_f = bqkv.astype(jnp.float32)   # added to f32 accumulators
    bp_f = bp2.astype(jnp.float32)

    in_specs = [
        pl.BlockSpec((1, T, C), lambda b: (b, 0, 0)),      # x
        pl.BlockSpec((C, 3 * C), lambda b: (0, 0)),        # fused qkv weight (grid-invariant)
        pl.BlockSpec((1, 3 * C), lambda b: (0, 0)),        # fused qkv bias   (grid-invariant)
        pl.BlockSpec((C, C), lambda b: (0, 0)),            # proj weight      (grid-invariant)
        pl.BlockSpec((1, C), lambda b: (0, 0)),            # proj bias        (grid-invariant)
    ]
    y_shape = jax.ShapeDtypeStruct((B, T, C), jnp.float32)
    y_spec = pl.BlockSpec((1, T, C), lambda b: (b, 0, 0))

    if return_att:
        out_shape = (y_shape,
                     jax.ShapeDtypeStruct((B, n_head, T, T), att_dtype))
        out_specs = (y_spec,
                     pl.BlockSpec((1, n_head, T, T), lambda b: (b, 0, 0, 0)))
    else:
        out_shape = y_shape
        out_specs = y_spec

    # VMEM budget derived from the actual block shapes + in-kernel temporaries.
    cs = jnp.dtype(cdt).itemsize
    est = (2 * T * C * cs                       # x block (double-buffered)
           + C * 3 * C * cs + 3 * C * 4         # fused qkv weight/bias (resident)
           + C * C * cs + C * 4                 # proj weight/bias (resident)
           + 2 * T * C * 4                      # y block (double-buffered)
           + T * 3 * C * 4                      # qkv activations (f32)
           + 3 * T * T * 4                      # score/prob temporaries
           + T * C * 4)                         # concatenated head outputs
    if return_att:
        est += 2 * n_head * T * T * jnp.dtype(att_dtype).itemsize
    vmem_limit = max(16 << 20, min(int(1.5 * est), 48 << 20))

    kernel = _make_attn_kernel(n_head, return_att, cdt)
    outs = pl.pallas_call(
        kernel,
        out_shape=out_shape,
        grid_spec=pltpu.PrefetchScalarGridSpec(
            num_scalar_prefetch=0,
            grid=(B,),
            in_specs=in_specs,
            out_specs=out_specs,
        ),
        compiler_params=pltpu.CompilerParams(
            # Batch axis is fully parallel (shardable across v7x's 2 TCs).
            dimension_semantics=("parallel",),
            vmem_limit_bytes=vmem_limit,
        ),
    )(x_c, wqkv_c, bqkv_f, wp_c, bp_f)

    if return_att:
        y, att = outs
        return y, att
    return outs, None


def _reference(x, params, n_head):
    B, T, C = x.shape
    wq, wk, wv, wp, bq, bk, bv, bp = params
    hd = C // n_head
    hp = lax.Precision.HIGHEST
    q = (jnp.dot(x, wq, precision=hp) + bq).reshape(B, T, n_head, hd).transpose(0, 2, 1, 3)
    k = (jnp.dot(x, wk, precision=hp) + bk).reshape(B, T, n_head, hd).transpose(0, 2, 1, 3)
    v = (jnp.dot(x, wv, precision=hp) + bv).reshape(B, T, n_head, hd).transpose(0, 2, 1, 3)
    att = jnp.einsum('bhtd,bhsd->bhts', q, k, precision=hp) / math.sqrt(hd)
    mask = jnp.tril(jnp.ones((T, T)))
    att = jnp.where(mask == 0, -jnp.inf, att)
    att = jax.nn.softmax(att, axis=-1)
    y = jnp.einsum('bhts,bhsd->bhtd', att, v, precision=hp)
    y = y.transpose(0, 2, 1, 3).reshape(B, T, C)
    y = jnp.dot(y, wp, precision=hp) + bp
    return y, att


if __name__ == "__main__":
    # Small minGPT-style config with lane-dense (multiple-of-128) T and C:
    # block_size = T = 128, n_embd = C = 128, n_head = 4 (head_dim = 32).
    B, T, C, n_head = 2, 128, 128, 4

    key = jax.random.PRNGKey(0)
    ks = jax.random.split(key, 9)
    init = lambda k, shape, s=0.02: (s * jax.random.normal(k, shape)).astype(jnp.float32)
    # Weights stored as (C_in, C_out) == W.T of PyTorch nn.Linear.
    wq = init(ks[0], (C, C)); wk = init(ks[1], (C, C))
    wv = init(ks[2], (C, C)); wp = init(ks[3], (C, C))
    bq = init(ks[4], (C,)); bk = init(ks[5], (C,))
    bv = init(ks[6], (C,)); bp = init(ks[7], (C,))
    params = (wq, wk, wv, wp, bq, bk, bv, bp)

    x = jax.random.normal(ks[8], (B, T, C), dtype=jnp.float32)

    y_ref, att_ref = _reference(x, params, n_head)

    # f32 MXU operands, att returned: tight check.
    y, att = causal_self_attention(x, params, n_head, compute_dtype=jnp.float32)
    jax.block_until_ready((y, att))
    assert jnp.allclose(y, y_ref, atol=2e-4, rtol=2e-3), float(jnp.max(jnp.abs(y - y_ref)))
    assert jnp.allclose(att, att_ref, atol=2e-4, rtol=2e-3), float(jnp.max(jnp.abs(att - att_ref)))

    # y-only fast path: att HBM write dropped, deferred softmax normalization.
    y2, _ = causal_self_attention(x, params, n_head, compute_dtype=jnp.float32,
                                  return_att=False)
    y2 = jax.block_until_ready(y2)
    assert jnp.allclose(y2, y_ref, atol=2e-4, rtol=2e-3), float(jnp.max(jnp.abs(y2 - y_ref)))

    # bf16 MXU operands (fast path on v5e/v6e/v7x), f32 accumulation: loose check.
    y16, att16 = causal_self_attention(x, params, n_head, compute_dtype=jnp.bfloat16)
    jax.block_until_ready((y16, att16))
    assert jnp.allclose(y16, y_ref, atol=2e-2, rtol=2e-2)
    assert jnp.allclose(att16, att_ref, atol=2e-2, rtol=2e-2)

    print("KERNEL_OK")
</pallas_src>

<mosaic_0001>
module attributes {stable_mosaic.version = 11 : i64} {
  func.func @kernel(%arg0: i32, %arg1: memref<1x128x128xf32, #tpu.memory_space<vmem>>, %arg2: memref<128x384xf32, #tpu.memory_space<vmem>>, %arg3: memref<1x384xf32, #tpu.memory_space<vmem>>, %arg4: memref<128x128xf32, #tpu.memory_space<vmem>>, %arg5: memref<1x128xf32, #tpu.memory_space<vmem>>, %arg6: memref<1x128x128xf32, #tpu.memory_space<vmem>>, %arg7: memref<1x4x128x128xf32, #tpu.memory_space<vmem>>) attributes {dimension_semantics = [#tpu.dimension_semantics<parallel>], iteration_bounds = array<i64: 2>, scalar_prefetch = 0 : i64, scratch_operands = 0 : i64, tpu.core_type = #tpu.core_type<tc>, window_params = [{transform_indices = @transform_0, window_bounds = array<i64: 1, 128, 128>}, {pipeline_mode = #tpu.pipeline_mode<synchronous>, transform_indices = @transform_1, window_bounds = array<i64: 128, 384>}, {pipeline_mode = #tpu.pipeline_mode<synchronous>, transform_indices = @transform_2, window_bounds = array<i64: 1, 384>}, {pipeline_mode = #tpu.pipeline_mode<synchronous>, transform_indices = @transform_3, window_bounds = array<i64: 128, 128>}, {pipeline_mode = #tpu.pipeline_mode<synchronous>, transform_indices = @transform_4, window_bounds = array<i64: 1, 128>}, {transform_indices = @transform_5, window_bounds = array<i64: 1, 128, 128>}, {transform_indices = @transform_6, window_bounds = array<i64: 1, 4, 128, 128>}]} {
    %c0 = arith.constant 0 : index
    %c0_0 = arith.constant 0 : index
    %c0_1 = arith.constant 0 : index
    %0 = vector.load %arg1[%c0, %c0_0, %c0_1] : memref<1x128x128xf32, #tpu.memory_space<vmem>>, vector<1x128x128xf32>
    %1 = vector.shape_cast %0 : vector<1x128x128xf32> to vector<128x128xf32>
    %c0_2 = arith.constant 0 : index
    %c0_3 = arith.constant 0 : index
    %2 = vector.load %arg2[%c0_2, %c0_3] : memref<128x384xf32, #tpu.memory_space<vmem>>, vector<128x384xf32>
    %cst = arith.constant dense<0.000000e+00> : vector<128x384xf32>
    %3 = tpu.matmul %1, %2, %cst {dimension_numbers = #tpu.dot_dimension_numbers<[1], [0], [0], [1], [0, 0, 1, 1], [], []>} : vector<128x128xf32>, vector<128x384xf32>, vector<128x384xf32> -> vector<128x384xf32>
    %c0_4 = arith.constant 0 : index
    %c0_5 = arith.constant 0 : index
    %4 = vector.load %arg3[%c0_4, %c0_5] : memref<1x384xf32, #tpu.memory_space<vmem>>, vector<1x384xf32>
    %5 = vector.broadcast %4 : vector<1x384xf32> to vector<128x384xf32>
    %6 = arith.addf %3, %5 : vector<128x384xf32>
    %7 = tpu.iota {dimensions = array<i32: 0>} : vector<128x1xi32>
    %8 = tpu.iota {dimensions = array<i32: 1>} : vector<1x128xi32>
    %9 = vector.broadcast %7 : vector<128x1xi32> to vector<128x128xi32>
    %10 = vector.broadcast %8 : vector<1x128xi32> to vector<128x128xi32>
    %11 = arith.cmpi sge, %9, %10 : vector<128x128xi32>
    %12 = vector.extract_strided_slice %6 {offsets = [0, 0], sizes = [128, 32], strides = [1, 1]} : vector<128x384xf32> to vector<128x32xf32>
    %cst_6 = arith.constant 0.176776692 : f32
    %13 = vector.broadcast %cst_6 : f32 to vector<128x32xf32>
    %14 = arith.mulf %12, %13 : vector<128x32xf32>
    %15 = vector.extract_strided_slice %6 {offsets = [0, 128], sizes = [128, 32], strides = [1, 1]} : vector<128x384xf32> to vector<128x32xf32>
    %16 = vector.extract_strided_slice %6 {offsets = [0, 256], sizes = [128, 32], strides = [1, 1]} : vector<128x384xf32> to vector<128x32xf32>
    %cst_7 = arith.constant dense<0.000000e+00> : vector<128x128xf32>
    %17 = tpu.matmul %14, %15, %cst_7 {dimension_numbers = #tpu.dot_dimension_numbers<[1], [1], [0], [0], [0, 0, 1, 0], [], []>} : vector<128x32xf32>, vector<128x32xf32>, vector<128x128xf32> -> vector<128x128xf32>
    %cst_8 = arith.constant -1.000000e+30 : f32
    %18 = vector.broadcast %cst_8 : f32 to vector<128x128xf32>
    %19 = arith.select %11, %17, %18 : vector<128x128xi1>, vector<128x128xf32>
    %cst_9 = arith.constant dense<0xFF800000> : vector<128xf32>
    %20 = vector.multi_reduction <maximumf>, %19, %cst_9 [1] : vector<128x128xf32> to vector<128xf32>
    %21 = vector.shape_cast %20 : vector<128xf32> to vector<128x1xf32>
    %22 = vector.broadcast %21 : vector<128x1xf32> to vector<128x128xf32>
    %23 = arith.subf %19, %22 : vector<128x128xf32>
    %24 = math.exp %23 : vector<128x128xf32>
    %cst_10 = arith.constant dense<0.000000e+00> : vector<128xf32>
    %25 = vector.multi_reduction <add>, %24, %cst_10 [1] : vector<128x128xf32> to vector<128xf32>
    %26 = vector.shape_cast %25 : vector<128xf32> to vector<128x1xf32>
    %27 = tpu.reciprocal %26 {approx = true} : vector<128x1xf32> -> vector<128x1xf32>
    %28 = arith.mulf %26, %27 : vector<128x1xf32>
    %cst_11 = arith.constant 2.000000e+00 : f32
    %29 = vector.broadcast %cst_11 : f32 to vector<128x1xf32>
    %30 = arith.subf %29, %28 : vector<128x1xf32>
    %31 = arith.mulf %27, %30 : vector<128x1xf32>
    %32 = vector.broadcast %31 : vector<128x1xf32> to vector<128x128xf32>
    %33 = arith.mulf %24, %32 : vector<128x128xf32>
    %c0_12 = arith.constant 0 : index
    %c0_13 = arith.constant 0 : index
    %c0_14 = arith.constant 0 : index
    %c0_15 = arith.constant 0 : index
    %34 = vector.load %arg7[%c0_12, %c0_13, %c0_14, %c0_15] : memref<1x4x128x128xf32, #tpu.memory_space<vmem>>, vector<1x1x128x128xf32>
    %35 = vector.shape_cast %34 : vector<1x1x128x128xf32> to vector<128x128xf32>
    %36 = vector.shape_cast %33 : vector<128x128xf32> to vector<1x1x128x128xf32>
    tpu.vector_store %arg7[%c0_12, %c0_13, %c0_14, %c0_15], %36 {strides = array<i32>} : memref<1x4x128x128xf32, #tpu.memory_space<vmem>>, vector<1x1x128x128xf32>,
    %cst_16 = arith.constant dense<0.000000e+00> : vector<128x32xf32>
    %37 = tpu.matmul %33, %16, %cst_16 {dimension_numbers = #tpu.dot_dimension_numbers<[1], [0], [0], [1], [0, 0, 1, 1], [], []>} : vector<128x128xf32>, vector<128x32xf32>, vector<128x32xf32> -> vector<128x32xf32>
    %38 = vector.extract_strided_slice %6 {offsets = [0, 32], sizes = [128, 32], strides = [1, 1]} : vector<128x384xf32> to vector<128x32xf32>
    %cst_17 = arith.constant 0.176776692 : f32
    %39 = vector.broadcast %cst_17 : f32 to vector<128x32xf32>
    %40 = arith.mulf %38, %39 : vector<128x32xf32>
    %41 = vector.extract_strided_slice %6 {offsets = [0, 160], sizes = [128, 32], strides = [1, 1]} : vector<128x384xf32> to vector<128x32xf32>
    %42 = vector.extract_strided_slice %6 {offsets = [0, 288], sizes = [128, 32], strides = [1, 1]} : vector<128x384xf32> to vector<128x32xf32>
    %cst_18 = arith.constant dense<0.000000e+00> : vector<128x128xf32>
    %43 = tpu.matmul %40, %41, %cst_18 {dimension_numbers = #tpu.dot_dimension_numbers<[1], [1], [0], [0], [0, 0, 1, 0], [], []>} : vector<128x32xf32>, vector<128x32xf32>, vector<128x128xf32> -> vector<128x128xf32>
    %cst_19 = arith.constant -1.000000e+30 : f32
    %44 = vector.broadcast %cst_19 : f32 to vector<128x128xf32>
    %45 = arith.select %11, %43, %44 : vector<128x128xi1>, vector<128x128xf32>
    %cst_20 = arith.constant dense<0xFF800000> : vector<128xf32>
    %46 = vector.multi_reduction <maximumf>, %45, %cst_20 [1] : vector<128x128xf32> to vector<128xf32>
    %47 = vector.shape_cast %46 : vector<128xf32> to vector<128x1xf32>
    %48 = vector.broadcast %47 : vector<128x1xf32> to vector<128x128xf32>
    %49 = arith.subf %45, %48 : vector<128x128xf32>
    %50 = math.exp %49 : vector<128x128xf32>
    %cst_21 = arith.constant dense<0.000000e+00> : vector<128xf32>
    %51 = vector.multi_reduction <add>, %50, %cst_21 [1] : vector<128x128xf32> to vector<128xf32>
    %52 = vector.shape_cast %51 : vector<128xf32> to vector<128x1xf32>
    %53 = tpu.reciprocal %52 {approx = true} : vector<128x1xf32> -> vector<128x1xf32>
    %54 = arith.mulf %52, %53 : vector<128x1xf32>
    %cst_22 = arith.constant 2.000000e+00 : f32
    %55 = vector.broadcast %cst_22 : f32 to vector<128x1xf32>
    %56 = arith.subf %55, %54 : vector<128x1xf32>
    %57 = arith.mulf %53, %56 : vector<128x1xf32>
    %58 = vector.broadcast %57 : vector<128x1xf32> to vector<128x128xf32>
    %59 = arith.mulf %50, %58 : vector<128x128xf32>
    %c0_23 = arith.constant 0 : index
    %c1 = arith.constant 1 : index
    %c0_24 = arith.constant 0 : index
    %c0_25 = arith.constant 0 : index
    %60 = vector.load %arg7[%c0_23, %c1, %c0_24, %c0_25] : memref<1x4x128x128xf32, #tpu.memory_space<vmem>>, vector<1x1x128x128xf32>
    %61 = vector.shape_cast %60 : vector<1x1x128x128xf32> to vector<128x128xf32>
    %62 = vector.shape_cast %59 : vector<128x128xf32> to vector<1x1x128x128xf32>
    tpu.vector_store %arg7[%c0_23, %c1, %c0_24, %c0_25], %62 {strides = array<i32>} : memref<1x4x128x128xf32, #tpu.memory_space<vmem>>, vector<1x1x128x128xf32>,
    %cst_26 = arith.constant dense<0.000000e+00> : vector<128x32xf32>
    %63 = tpu.matmul %59, %42, %cst_26 {dimension_numbers = #tpu.dot_dimension_numbers<[1], [0], [0], [1], [0, 0, 1, 1], [], []>} : vector<128x128xf32>, vector<128x32xf32>, vector<128x32xf32> -> vector<128x32xf32>
    %64 = vector.extract_strided_slice %6 {offsets = [0, 64], sizes = [128, 32], strides = [1, 1]} : vector<128x384xf32> to vector<128x32xf32>
    %cst_27 = arith.constant 0.176776692 : f32
    %65 = vector.broadcast %cst_27 : f32 to vector<128x32xf32>
    %66 = arith.mulf %64, %65 : vector<128x32xf32>
    %67 = vector.extract_strided_slice %6 {offsets = [0, 192], sizes = [128, 32], strides = [1, 1]} : vector<128x384xf32> to vector<128x32xf32>
    %68 = vector.extract_strided_slice %6 {offsets = [0, 320], sizes = [128, 32], strides = [1, 1]} : vector<128x384xf32> to vector<128x32xf32>
    %cst_28 = arith.constant dense<0.000000e+00> : vector<128x128xf32>
    %69 = tpu.matmul %66, %67, %cst_28 {dimension_numbers = #tpu.dot_dimension_numbers<[1], [1], [0], [0], [0, 0, 1, 0], [], []>} : vector<128x32xf32>, vector<128x32xf32>, vector<128x128xf32> -> vector<128x128xf32>
    %cst_29 = arith.constant -1.000000e+30 : f32
    %70 = vector.broadcast %cst_29 : f32 to vector<128x128xf32>
    %71 = arith.select %11, %69, %70 : vector<128x128xi1>, vector<128x128xf32>
    %cst_30 = arith.constant dense<0xFF800000> : vector<128xf32>
    %72 = vector.multi_reduction <maximumf>, %71, %cst_30 [1] : vector<128x128xf32> to vector<128xf32>
    %73 = vector.shape_cast %72 : vector<128xf32> to vector<128x1xf32>
    %74 = vector.broadcast %73 : vector<128x1xf32> to vector<128x128xf32>
    %75 = arith.subf %71, %74 : vector<128x128xf32>
    %76 = math.exp %75 : vector<128x128xf32>
    %cst_31 = arith.constant dense<0.000000e+00> : vector<128xf32>
    %77 = vector.multi_reduction <add>, %76, %cst_31 [1] : vector<128x128xf32> to vector<128xf32>
    %78 = vector.shape_cast %77 : vector<128xf32> to vector<128x1xf32>
    %79 = tpu.reciprocal %78 {approx = true} : vector<128x1xf32> -> vector<128x1xf32>
    %80 = arith.mulf %78, %79 : vector<128x1xf32>
    %cst_32 = arith.constant 2.000000e+00 : f32
    %81 = vector.broadcast %cst_32 : f32 to vector<128x1xf32>
    %82 = arith.subf %81, %80 : vector<128x1xf32>
    %83 = arith.mulf %79, %82 : vector<128x1xf32>
    %84 = vector.broadcast %83 : vector<128x1xf32> to vector<128x128xf32>
    %85 = arith.mulf %76, %84 : vector<128x128xf32>
    %c0_33 = arith.constant 0 : index
    %c2 = arith.constant 2 : index
    %c0_34 = arith.constant 0 : index
    %c0_35 = arith.constant 0 : index
    %86 = vector.load %arg7[%c0_33, %c2, %c0_34, %c0_35] : memref<1x4x128x128xf32, #tpu.memory_space<vmem>>, vector<1x1x128x128xf32>
    %87 = vector.shape_cast %86 : vector<1x1x128x128xf32> to vector<128x128xf32>
    %88 = vector.shape_cast %85 : vector<128x128xf32> to vector<1x1x128x128xf32>
    tpu.vector_store %arg7[%c0_33, %c2, %c0_34, %c0_35], %88 {strides = array<i32>} : memref<1x4x128x128xf32, #tpu.memory_space<vmem>>, vector<1x1x128x128xf32>,
    %cst_36 = arith.constant dense<0.000000e+00> : vector<128x32xf32>
    %89 = tpu.matmul %85, %68, %cst_36 {dimension_numbers = #tpu.dot_dimension_numbers<[1], [0], [0], [1], [0, 0, 1, 1], [], []>} : vector<128x128xf32>, vector<128x32xf32>, vector<128x32xf32> -> vector<128x32xf32>
    %90 = vector.extract_strided_slice %6 {offsets = [0, 96], sizes = [128, 32], strides = [1, 1]} : vector<128x384xf32> to vector<128x32xf32>
    %cst_37 = arith.constant 0.176776692 : f32
    %91 = vector.broadcast %cst_37 : f32 to vector<128x32xf32>
    %92 = arith.mulf %90, %91 : vector<128x32xf32>
    %93 = vector.extract_strided_slice %6 {offsets = [0, 224], sizes = [128, 32], strides = [1, 1]} : vector<128x384xf32> to vector<128x32xf32>
    %94 = vector.extract_strided_slice %6 {offsets = [0, 352], sizes = [128, 32], strides = [1, 1]} : vector<128x384xf32> to vector<128x32xf32>
    %cst_38 = arith.constant dense<0.000000e+00> : vector<128x128xf32>
    %95 = tpu.matmul %92, %93, %cst_38 {dimension_numbers = #tpu.dot_dimension_numbers<[1], [1], [0], [0], [0, 0, 1, 0], [], []>} : vector<128x32xf32>, vector<128x32xf32>, vector<128x128xf32> -> vector<128x128xf32>
    %cst_39 = arith.constant -1.000000e+30 : f32
    %96 = vector.broadcast %cst_39 : f32 to vector<128x128xf32>
    %97 = arith.select %11, %95, %96 : vector<128x128xi1>, vector<128x128xf32>
    %cst_40 = arith.constant dense<0xFF800000> : vector<128xf32>
    %98 = vector.multi_reduction <maximumf>, %97, %cst_40 [1] : vector<128x128xf32> to vector<128xf32>
    %99 = vector.shape_cast %98 : vector<128xf32> to vector<128x1xf32>
    %100 = vector.broadcast %99 : vector<128x1xf32> to vector<128x128xf32>
    %101 = arith.subf %97, %100 : vector<128x128xf32>
    %102 = math.exp %101 : vector<128x128xf32>
    %cst_41 = arith.constant dense<0.000000e+00> : vector<128xf32>
    %103 = vector.multi_reduction <add>, %102, %cst_41 [1] : vector<128x128xf32> to vector<128xf32>
    %104 = vector.shape_cast %103 : vector<128xf32> to vector<128x1xf32>
    %105 = tpu.reciprocal %104 {approx = true} : vector<128x1xf32> -> vector<128x1xf32>
    %106 = arith.mulf %104, %105 : vector<128x1xf32>
    %cst_42 = arith.constant 2.000000e+00 : f32
    %107 = vector.broadcast %cst_42 : f32 to vector<128x1xf32>
    %108 = arith.subf %107, %106 : vector<128x1xf32>
    %109 = arith.mulf %105, %108 : vector<128x1xf32>
    %110 = vector.broadcast %109 : vector<128x1xf32> to vector<128x128xf32>
    %111 = arith.mulf %102, %110 : vector<128x128xf32>
    %c0_43 = arith.constant 0 : index
    %c3 = arith.constant 3 : index
    %c0_44 = arith.constant 0 : index
    %c0_45 = arith.constant 0 : index
    %112 = vector.load %arg7[%c0_43, %c3, %c0_44, %c0_45] : memref<1x4x128x128xf32, #tpu.memory_space<vmem>>, vector<1x1x128x128xf32>
    %113 = vector.shape_cast %112 : vector<1x1x128x128xf32> to vector<128x128xf32>
    %114 = vector.shape_cast %111 : vector<128x128xf32> to vector<1x1x128x128xf32>
    tpu.vector_store %arg7[%c0_43, %c3, %c0_44, %c0_45], %114 {strides = array<i32>} : memref<1x4x128x128xf32, #tpu.memory_space<vmem>>, vector<1x1x128x128xf32>,
    %cst_46 = arith.constant dense<0.000000e+00> : vector<128x32xf32>
    %115 = tpu.matmul %111, %94, %cst_46 {dimension_numbers = #tpu.dot_dimension_numbers<[1], [0], [0], [1], [0, 0, 1, 1], [], []>} : vector<128x128xf32>, vector<128x32xf32>, vector<128x32xf32> -> vector<128x32xf32>
    %116 = tpu.concatenate %37, %63, %89, %115 in 1 : vector<128x32xf32>, vector<128x32xf32>, vector<128x32xf32>, vector<128x32xf32> -> vector<128x128xf32>
    %c0_47 = arith.constant 0 : index
    %c0_48 = arith.constant 0 : index
    %117 = vector.load %arg4[%c0_47, %c0_48] : memref<128x128xf32, #tpu.memory_space<vmem>>, vector<128x128xf32>
    %cst_49 = arith.constant dense<0.000000e+00> : vector<128x128xf32>
    %118 = tpu.matmul %116, %117, %cst_49 {dimension_numbers = #tpu.dot_dimension_numbers<[1], [0], [0], [1], [0, 0, 1, 1], [], []>} : vector<128x128xf32>, vector<128x128xf32>, vector<128x128xf32> -> vector<128x128xf32>
    %c0_50 = arith.constant 0 : index
    %c0_51 = arith.constant 0 : index
    %119 = vector.load %arg5[%c0_50, %c0_51] : memref<1x128xf32, #tpu.memory_space<vmem>>, vector<1x128xf32>
    %120 = vector.broadcast %119 : vector<1x128xf32> to vector<128x128xf32>
    %121 = arith.addf %118, %120 : vector<128x128xf32>
    %c0_52 = arith.constant 0 : index
    %c0_53 = arith.constant 0 : index
    %c0_54 = arith.constant 0 : index
    %122 = vector.load %arg6[%c0_52, %c0_53, %c0_54] : memref<1x128x128xf32, #tpu.memory_space<vmem>>, vector<1x128x128xf32>
    %123 = vector.shape_cast %122 : vector<1x128x128xf32> to vector<128x128xf32>
    %124 = vector.shape_cast %121 : vector<128x128xf32> to vector<1x128x128xf32>
    tpu.vector_store %arg6[%c0_52, %c0_53, %c0_54], %124 {strides = array<i32>} : memref<1x128x128xf32, #tpu.memory_space<vmem>>, vector<1x128x128xf32>,
    return
  }
  func.func @transform_0(%arg0: i32) -> (i32, i32, i32) {
    %c0_i32 = arith.constant 0 : i32
    %c0_i32_0 = arith.constant 0 : i32
    %c0_i32_1 = arith.constant 0 : i32
    return %arg0, %c0_i32, %c0_i32_0 : i32, i32, i32
  }
  func.func @transform_1(%arg0: i32) -> (i32, i32) {
    %c0_i32 = arith.constant 0 : i32
    %c0_i32_0 = arith.constant 0 : i32
    %c0_i32_1 = arith.constant 0 : i32
    return %c0_i32, %c0_i32_0 : i32, i32
  }
  func.func @transform_2(%arg0: i32) -> (i32, i32) {
    %c0_i32 = arith.constant 0 : i32
    %c0_i32_0 = arith.constant 0 : i32
    %c0_i32_1 = arith.constant 0 : i32
    return %c0_i32, %c0_i32_0 : i32, i32
  }
  func.func @transform_3(%arg0: i32) -> (i32, i32) {
    %c0_i32 = arith.constant 0 : i32
    %c0_i32_0 = arith.constant 0 : i32
    %c0_i32_1 = arith.constant 0 : i32
    return %c0_i32, %c0_i32_0 : i32, i32
  }
  func.func @transform_4(%arg0: i32) -> (i32, i32) {
    %c0_i32 = arith.constant 0 : i32
    %c0_i32_0 = arith.constant 0 : i32
    %c0_i32_1 = arith.constant 0 : i32
    return %c0_i32, %c0_i32_0 : i32, i32
  }
  func.func @transform_5(%arg0: i32) -> (i32, i32, i32) {
    %c0_i32 = arith.constant 0 : i32
    %c0_i32_0 = arith.constant 0 : i32
    %c0_i32_1 = arith.constant 0 : i32
    return %arg0, %c0_i32, %c0_i32_0 : i32, i32, i32
  }
  func.func @transform_6(%arg0: i32) -> (i32, i32, i32, i32) {
    %c0_i32 = arith.constant 0 : i32
    %c0_i32_0 = arith.constant 0 : i32
    %c0_i32_1 = arith.constant 0 : i32
    %c0_i32_2 = arith.constant 0 : i32
    return %arg0, %c0_i32, %c0_i32_0, %c0_i32_1 : i32, i32, i32, i32
  }
}

</mosaic_0001>

<bundles_post_ra>
// kernel: tpu_custom_call.1
= control target key start
LH: loop header
LB: loop body
LE: loop exit
PB: predicated region body
PF: predicated region fallthrough
CT: control target
= control target key end

     0   :  { %12 = vsyncpa [#allocation3], 0  ;;  %s8628_s0 = inlined_call_operand.hbm [shape: f32[2,128,128], index: 0, kind: input, shape index: {}]   ;;  %s8629_s1 = inlined_call_operand.hbm [shape: f32[128,384], index: 1, kind: input, shape index: {}]   ;;  %s8630_s2 = inlined_call_operand.vmem [shape: f32[1,384], index: 2, kind: input, shape index: {}]   ;;  %s8631_s3 = inlined_call_operand.hbm [shape: f32[128,128], index: 3, kind: input, shape index: {}]   ;;  %s8632_s4 = inlined_call_operand.vmem [shape: f32[1,128], index: 4, kind: input, shape index: {}]   ;;  %s8633_s5 = inlined_call_operand.hbm [shape: f32[2,128,128], index: 5, kind: output, shape index: {0}]   ;;  %s8634_s6 = inlined_call_operand.hbm [shape: f32[2,4,128,128], index: 6, kind: output, shape index: {1}]  }
   0x1   :  { %14 = vsyncpa [#allocation3 + $0x1], 0 }
   0x2   :  { %15 = vsyncpa [#allocation6], 0 }
   0x3   :  { %16 = vsyncpa [#allocation4], 0 }
   0x4   :  { %18 = vsyncpa [#allocation4 + $0x1], 0 }
   0x5   :  { %19 = vsyncpa [#allocation10], 0 }
   0x6   :  { %21 = vsyncpa [#allocation10 + $0x1], 0  ;;  %s6485_s21 = smov 0   ;;  %s6487_s22 = smov 0  }
   0x7   :  { %s6489_s23 = smov 0   ;;  %s6491_s24 = smov 0  }
   0x8 LB: > { %s6506_s25 = sadd.s32 4294967295, %s6433_s24   ;;  %s4033_s26 = sadd.s32 4294967294, %s6433_s24   ;;  %s6433_s24 = sphi %s6491_s24, %s8911_s24   ;;  %s6429_s23 = sphi %s6489_s23, %s8910_s23   ;;  %s6425_s22 = sphi %s6487_s22, %s8909_s22   ;;  %s6421_s21 = sphi %s6485_s21, %s8908_s21  }
   0x9   : > { %p47_p0 = scmp.ne.s32.totalorder %s6425_s22, %s6421_s21  ;;  %p8635_p1 = scmp.eq.s32.totalorder %s6506_s25, 0 }
   0xa   : > { %p161_p3 = scmp.eq.s32.totalorder %s4033_s26, 1  ;;  %p4034_p5 = scmp.ge.s32.totalorder %s6433_s24, 1 }
   0xb   : > { %p6515_p4 = por %p8635_p1, %p47_p0  ;;  %p194_p7 = scmp.lt.s32.totalorder %s6433_s24, 3 }
   0xc   : > { %p6520_p6 = por %p161_p3, %p47_p0  ;;  %s6435_s30 = smov [#allocation5]  }
   0xd   : > { %s8715_s27 = scalar_select %p6515_p4, 1, 0 }
   0xe   : > { %s8716_s28 = scalar_select %p6520_p6, 1, 0 }
   0xf   : > { %p6525_p8 = pnand %p4034_p5, %p194_p7  ;;  %s206_s7 = sshll.u32 %s6435_s30, 4  ;;  %s6529_s7 = int_to_ptr.vmem [resolvable:$true] %s206_s7 }
  0x10   : > { %s6436_s9 = smov [#allocation7]   ;;  %s6245_s13 = scalar_lea.hbm %s8629_s1, 6144 }
  0x11   : > { %p5561_p9 = pneg %p6525_p8  ;;  %s222_s10 = sshll.u32 %s6436_s9, 4  ;;  %s6540_s10 = int_to_ptr.vmem [resolvable:$true] %s222_s10 }
  0x12   : > { %p6246_p12 = scmp.ne.s32.totalorder %s8629_s1, %s6245_s13  ;;  %p6252_p5 = scmp.lt.u32.totalorder %s6245_s13, %s8629_s1 }
  0x13   : > { %p6536_p11 = pnand %p5561_p9, %p8635_p1 }
  0x15   : > { %p6247_p13 = pneg %p6536_p11 }
  0x17   : > { %p6248_p0 = pnand %p6247_p13, %p6246_p12 }
  0x19   : > { %p6249_p3 = pneg %p6248_p0 }
  0x1b   : > { %p6254_p7 = pnand %p6252_p5, %p6249_p3 }
  0x1d   : > { %6257 = shalt.err (!%p6254_p7)
}
  0x1e   : > { %s6258_s18 = scalar_lea.vmem %s6529_s7, 6144  ;;  %p6266_p2 = scmp.lt.s32.totalorder %s6529_s7, %s6529_s7 }
  0x1f   : > { %p6259_p9 = scmp.ne.s32.totalorder %s6529_s7, %s6258_s18  ;;  %p6267_p12 = scmp.lt.s32.totalorder %s6258_s18, %s6258_s18 }
  0x21   : > { %p6261_p10 = pnand %p6259_p9, %p6247_p13  ;;  %p6268_p0 = por %p6267_p12, %p6266_p2 }
  0x23   : > { %p6262_p1 = pneg %p6261_p10 }
  0x25   : > { %p6269_p6 = pnand %p6268_p0, %p6262_p1 }
  0x27   : > { %6272 = shalt.err (!%p6269_p6)
}
  0x28   : > { %s6437_s19 = smov 384   ;;  %s6438_s20 = smov 24  }
  0x29   : > { %5564 = dma.hbm_to_vmem [thread:$0]  (!%p6536_p11), %s8629_s1, 6144, %s6529_s7, [#allocation6], %s6437_s19, %s6437_s19, %s6438_s20  }
  0x2a   : > { %s6273_s12 = scalar_lea.hbm %s8631_s3, 2048 }
  0x2b   : > { %p6274_p2 = scmp.ne.s32.totalorder %s8631_s3, %s6273_s12  ;;  %p6280_p10 = scmp.lt.u32.totalorder %s6273_s12, %s8631_s3 }
  0x2d   : > { %p6276_p1 = pnand %p6274_p2, %p6247_p13 }
  0x2f   : > { %p6277_p6 = pneg %p6276_p1 }
  0x31   : > { %p6282_p3 = pnand %p6280_p10, %p6277_p6 }
  0x33   : > { %6285 = shalt.err (!%p6282_p3)
}
  0x34   : > { %s6286_s7 = scalar_lea.vmem %s6540_s10, 2048  ;;  %p6294_p12 = scmp.lt.s32.totalorder %s6540_s10, %s6540_s10 }
  0x35   : > { %p6287_p5 = scmp.ne.s32.totalorder %s6540_s10, %s6286_s7  ;;  %p6295_p0 = scmp.lt.s32.totalorder %s6286_s7, %s6286_s7 }
  0x37   : > { %p6289_p7 = pnand %p6287_p5, %p6247_p13  ;;  %p6296_p2 = por %p6295_p0, %p6294_p12 }
  0x39   : > { %p6290_p9 = pneg %p6289_p7 }
  0x3b   : > { %p6297_p1 = pnand %p6296_p2, %p6290_p9 }
  0x3d   : > { %6300 = shalt.err (!%p6297_p1)
}
  0x3e   : > { %s6439_s17 = smov 128   ;;  %s6440_s18 = smov 8  }
  0x3f   : > { %5567 = dma.hbm_to_vmem [thread:$0]  (!%p6536_p11), %s8631_s3, 2048, %s6540_s10, [#allocation6], %s6439_s17, %s6439_s17, %s6440_s18  }
  0x40   : > { %s6598_s26 = sadd.s32 1, %s6433_s24   ;;  %s34_s9 = sadd.s32 1, %s6429_s23 }
  0x41   : > { %s31_s30 = ssub.s32 %s6433_s24, %s6598_s26  ;;  %p41_p6 = scmp.ne.s32.totalorder %s6429_s23, %s6425_s22 }
  0x42   : > { %p32_p13 = scmp.eq.s32.totalorder %s31_s30, 0  ;;  %p42_p10 = scmp.eq.s32.totalorder %s6433_s24, 0 }
  0x43   : > { %p8719_p5 = scmp.eq.s32.totalorder %s6506_s25, 1  ;;  %p5581_p9 = scmp.lt.s32.totalorder %s6433_s24, 2 }
  0x44   : > { %s6607_s11 = scalar_select %p32_p13, %s6429_s23, %s34_s9  }
  0x45   : > { %p43_p3 = por %p42_p10, %p41_p6  ;;  %p6611_p7 = por %p8719_p5, %p41_p6 }
  0x46   : > { %s239_s12 = sand.u32 1, %s6429_s23   ;;  %s4232_s10 = sshll.u32 %s6433_s24, 11 }
  0x47   : > { %s8720_s8 = scalar_select %p6611_p7, 1, 0 }
  0x48   : > { %s4038_s13 = sshll.u32 %s239_s12, 7  ;;  %s6621_s16 = scalar_lea.hbm %s8628_s0, %s4232_s10 }
  0x49   : > { %s243_s7 = scalar_lea.vmem [#allocation2], %s4038_s13  ;;  %p6625_p11 = pnand %p5581_p9, %p43_p3 }
  0x4a   : > { %s250_s19 = sshll.u32 %s243_s7, 4  ;;  %s6629_s30 = scalar_lea.sflag [#allocation3], %s239_s12  ;;  %s6623_s19 = int_to_ptr.vmem [resolvable:$true] %s250_s19 }
  0x4b   : > { %s6301_s9 = scalar_lea.hbm %s6621_s16, 2048  ;;  %p6303_p0 = pneg %p6625_p11 }
  0x4c   : > { %p6302_p12 = scmp.ne.s32.totalorder %s6621_s16, %s6301_s9  ;;  %s6306_s14 = scalar_lea.hbm %s8628_s0, 4096 }
  0x4d   : > { %p6307_p13 = scmp.lt.u32.totalorder %s6621_s16, %s8628_s0  ;;  %p6308_p6 = scmp.lt.u32.totalorder %s6306_s14, %s6301_s9 }
  0x4e   : > { %p6304_p2 = pnand %p6303_p0, %p6302_p12  ;;  %p6310_p3 = scmp.lt.u32.totalorder %s6301_s9, %s6621_s16 }
  0x4f   : > { %p6309_p10 = por %p6308_p6, %p6307_p13 }
  0x50   : > { %p6305_p1 = pneg %p6304_p2 }
  0x51   : > { %p6311_p5 = por %p6310_p3, %p6309_p10 }
  0x53   : > { %p6312_p9 = pnand %p6311_p5, %p6305_p1 }
  0x55   : > { %6315 = shalt.err (!%p6312_p9)
}
  0x56   : > { %s6316_s12 = scalar_lea.vmem %s6623_s19, 2048  ;;  %s6441_s13 = smov [#allocation2]  }
  0x57   : > { %p6317_p12 = scmp.ne.s32.totalorder %s6623_s19, %s6316_s12  ;;  %s6321_s10 = sshll.u32 %s6441_s13, 4  ;;  %s6322_s10 = int_to_ptr.vmem [resolvable:$false] %s6321_s10 }
  0x58   : > { %s6323_s15 = scalar_lea.vmem %s6322_s10, 4096  ;;  %p6324_p4 = scmp.lt.s32.totalorder %s6623_s19, %s6322_s10 }
  0x59   : > { %p6319_p2 = pnand %p6317_p12, %p6303_p0  ;;  %p6325_p13 = scmp.lt.s32.totalorder %s6323_s15, %s6316_s12 }
  0x5b   : > { %p6320_p7 = pneg %p6319_p2  ;;  %p6326_p6 = por %p6325_p13, %p6324_p4 }
  0x5d   : > { %p6327_p10 = pnand %p6326_p6, %p6320_p7 }
  0x5f   : > { %6330 = shalt.err (!%p6327_p10)
}
  0x60   : > { %5571 = dma.hbm_to_vmem [thread:$0]  (!%p6625_p11), %s6621_s16, 2048, %s6623_s19, %s6629_s30, %s6439_s17, %s6439_s17, %s6440_s18  }
  0x61   : > { %262 = sbr.rel (%p6525_p8) target bundleno = 3519 (0xdbf), region = 40 }
  0x68   : > { %s6663_s9 = sand.u32 1, %s6425_s22   ;;  %p8722_p4 = scmp.ne.s32.totalorder %s8715_s27, 0 }
  0x69   : > { %s4042_s14 = sshll.u32 %s6663_s9, 7  ;;  %s265_s7 = scalar_lea.sflag [#allocation3], %s6663_s9 }
  0x6a   : > { %s6669_s20 = scalar_lea.vmem [#allocation2], %s4042_s14 }
  0x6b   : > { %6404 = dma.done.wait (%p8722_p4), %s265_s7, 2048  }
  0x6c   : > { %6406 = vsyncadd (%p8722_p4), %s265_s7, 4294965248  ;;  %p8723_p7 = scmp.eq.s32.totalorder %s6506_s25, 0 }
  0x6e   : > { %6408 = dma.done.wait (%p8723_p7), [#allocation6], 8192   ;;  %p8724_p8 = pmov %p8723_p7 }
  0x6f   : > { %v6442_v0 = vmov 0.0   ;;  %v327_v1 = vld [vmem:[#allocation5 + $0x8] sm:$0xff]  ;;  %v330_v2 = vld [vmem:[#allocation5 + $0x20] sm:$0xff]  ;;  %v329_v5 = vld [vmem:[#allocation5 + $0x18] sm:$0xff]  ;;  %vm748_vm0 = vcmask 261120   ;;  %s6443_s17 = smov 96  }
  0x70   : > { %6410 = vsyncadd (%p8724_p8), [#allocation6], 4294959104  ;;  %455 = vmatprep.mubr.f32.mxu0 %v6442_v0  ;;  %v326_v3 = vld [vmem:[#allocation5] sm:$0xff]  ;;  %v5115_v4 = vpack.c.bf16 %v330_v2, %v327_v1  ;;  %v333_v6 = vld [vmem:[#allocation5 + $0x38] sm:$0xff]  ;;  %s6444_s18 = smov 64   ;;  %s4046_s16 = sshll.u32 %s6663_s9, 9 }
  0x71   : > { %v336_v7 = vld [vmem:[#allocation5 + $0x50] sm:$0xff]  ;;  %v5117_v8 = vpack.c.bf16 %v329_v5, %v326_v3  ;;  %v335_v11 = vld [vmem:[#allocation5 + $0x48] sm:$0xff]  ;;  %v342_v13 = vld [vmem:[#allocation5 + $0x80] sm:$0xff]  ;;  %s7325_s19 = scalar_lea.vmem [#allocation9], %s4046_s16  ;;  %s6445_s30 = smov 32  }
  0x72   : > { %v5119_v9 = vpack.c.bf16 %v336_v7, %v333_v6  ;;  %v332_v10 = vld [vmem:[#allocation5 + $0x30] sm:$0xff]  ;;  %v339_v12 = vld [vmem:[#allocation5 + $0x68] sm:$0xff]  ;;  %5116 = vmatprep.subr.bf16.mxu0 %v5115_v4  ;;  %v338_v16 = vld [vmem:[#allocation5 + $0x60] sm:$0xff]  ;;  %s4234_s12 = sshll.u32 %s6506_s25, 13  ;;  %s3909_s13 = sshll.u32 %s7325_s19, 4  ;;  %s8522_s13 = int_to_ptr.vmem [resolvable:$true] %s3909_s13 }
  0x73   : > { %5118 = vmatpush1.bf16.msra.mxu0 %v5117_v8  ;;  %v5121_v14 = vpack.c.bf16 %v335_v11, %v332_v10  ;;  %v5123_v15 = vpack.c.bf16 %v342_v13, %v339_v12  ;;  %v341_v17 = vld [vmem:[#allocation5 + $0x78] sm:$0xff]  ;;  %v348_v19 = vld [vmem:[#allocation5 + $0xb0] sm:$0xff]  ;;  %v347_v23 = vld [vmem:[#allocation5 + $0xa8] sm:$0xff]  ;;  %s8520_s7 = scalar_lea.hbm %s8634_s6, %s4234_s12  ;;  %s6331_s27 = scalar_lea.vmem %s8522_s13, 8192 }
  0x74   : > { %5120 = vmatprep.subr.bf16.mxu0 %v5119_v9  ;;  %v345_v18 = vld [vmem:[#allocation5 + $0x98] sm:$0xff]  ;;  %v5125_v20 = vpack.c.bf16 %v341_v17, %v338_v16  ;;  %v344_v22 = vld [vmem:[#allocation5 + $0x90] sm:$0xff]  ;;  %v351_v24 = vld [vmem:[#allocation5 + $0xc8] sm:$0xff]  ;;  %p6332_p11 = scmp.ne.s32.totalorder %s8522_s13, %s6331_s27  ;;  %p8905_p0 = scmp.ne.s32.totalorder %s8720_s8, 0 }
  0x75   : > { %v5127_v21 = vpack.c.bf16 %v348_v19, %v345_v18  ;;  %v354_v25 = vld [vmem:[#allocation5 + $0xe0] sm:$0xff]  ;;  %v5129_v27 = vpack.c.bf16 %v347_v23, %v344_v22  ;;  %v353_v30 = vld [vmem:[#allocation5 + $0xd8] sm:$0xff]  ;;  %v360_v32 = vld [vmem:[#allocation5 + $0x110] sm:$0xff]  ;;  %s6446_s29 = smov [#allocation9]  }
  0x76   : > { %v6681_v26 = vld [vmem:[%s6669_s20] sm:$0xff]  ;;  %v5131_v28 = vpack.c.bf16 %v354_v25, %v351_v24  ;;  %v357_v31 = vld [vmem:[#allocation5 + $0xf8] sm:$0xff]  ;;  %v356_v33 = vld [vmem:[#allocation5 + $0xf0] sm:$0xff]  ;;  %p6333_p1 = pnand %p6332_p11, %p8905_p0 }
  0x77   : > { %5122 = vmatpush1.bf16.msra.mxu0 %v5121_v14  ;;  %4587 = vmatprep.mubr.f32.mxu1 %v6681_v26  ;;  %v350_v29 = vld [vmem:[#allocation5 + $0xc0] sm:$0xff]  ;;  %v328_v35 = vld [vmem:[#allocation5 + $0x10] sm:$0xff]  ;;  %v331_v36 = vld [vmem:[#allocation5 + $0x28] sm:$0xff]  ;;  %v5135_v38 = vpack.c.bf16 %v360_v32, %v357_v31 }
  0x78   : > { %5124 = vmatprep.subr.bf16.mxu0 %v5123_v15  ;;  %v5133_v34 = vpack.c.bf16 %v353_v30, %v350_v29  ;;  %v334_v37 = vld [vmem:[#allocation5 + $0x40] sm:$0xff]  ;;  %v359_v39 = vld [vmem:[#allocation5 + $0x108] sm:$0xff]  ;;  %v5147_v41 = vpack.c.bf16 %v331_v36, %v328_v35  ;;  %v337_v42 = vld [vmem:[#allocation5 + $0x58] sm:$0xff]  ;;  %p6334_p3 = pneg %p6333_p1 }
  0x79   : > { %v363_v40 = vld [vmem:[#allocation5 + $0x128] sm:$0xff]  ;;  %v366_v43 = vld [vmem:[#allocation5 + $0x140] sm:$0xff]  ;;  %v5151_v44 = vpack.c.bf16 %v337_v42, %v334_v37  ;;  %v340_v45 = vld [vmem:[#allocation5 + $0x70] sm:$0xff]  ;;  %v5137_v47 = vpack.c.bf16 %v359_v39, %v356_v33 }
  0x7a   : > { %v343_v46 = vld [vmem:[#allocation5 + $0x88] sm:$0xff]  ;;  %5148 = vmatprep.subr.bf16.mxu1 %v5147_v41  ;;  %v5139_v48 = vpack.c.bf16 %v366_v43, %v363_v40  ;;  %v362_v49 = vld [vmem:[#allocation5 + $0x120] sm:$0xff]  ;;  %v365_v50 = vld [vmem:[#allocation5 + $0x138] sm:$0xff] }
  0x7b   : > { %5126 = vmatpush1.bf16.msra.mxu0 %v5125_v20  ;;  %5150 = vmatpush3.bf16.msra.mxu1 %v5147_v41  ;;  %v369_v51 = vld [vmem:[#allocation5 + $0x158] sm:$0xff]  ;;  %v5155_v52 = vpack.c.bf16 %v343_v46, %v340_v45  ;;  %v372_v53 = vld [vmem:[#allocation5 + $0x170] sm:$0xff]  ;;  %v346_v54 = vld [vmem:[#allocation5 + $0xa0] sm:$0xff]  ;;  %v5141_v56 = vpack.c.bf16 %v365_v50, %v362_v49  ;;  %v8726_v41 = vmov 0 }
  0x7c   : > { %5128 = vmatprep.subr.bf16.mxu0 %v5127_v21  ;;  %5152 = vmatprep.subr.bf16.mxu1 %v5151_v44  ;;  %v349_v55 = vld [vmem:[#allocation5 + $0xb8] sm:$0xff]  ;;  %v5143_v57 = vpack.c.bf16 %v372_v53, %v369_v51  ;;  %v368_v58 = vld [vmem:[#allocation5 + $0x150] sm:$0xff]  ;;  %v371_v59 = vld [vmem:[#allocation5 + $0x168] sm:$0xff] }
  0x7d   : > { %v5159_v60 = vpack.c.bf16 %v349_v55, %v346_v54  ;;  %v352_v61 = vld [vmem:[#allocation5 + $0xd0] sm:$0xff]  ;;  %v355_v62 = vld [vmem:[#allocation5 + $0xe8] sm:$0xff]  ;;  %v5145_v63 = vpack.c.bf16 %v371_v59, %v368_v58  ;;  %v358_v2 = vld [vmem:[#allocation5 + $0x100] sm:$0xff] }
  0x7e   : > { %v5163_v1 = vpack.c.bf16 %v355_v62, %v352_v61  ;;  %v361_v3 = vld [vmem:[#allocation5 + $0x118] sm:$0xff]  ;;  %v364_v5 = vld [vmem:[#allocation5 + $0x130] sm:$0xff]  ;;  %v367_v6 = vld [vmem:[#allocation5 + $0x148] sm:$0xff] }
  0x7f   : > { %5130 = vmatpush1.bf16.msra.mxu0 %v5129_v27  ;;  %5154 = vmatpush3.bf16.msra.mxu1 %v5151_v44  ;;  %v5167_v4 = vpack.c.bf16 %v361_v3, %v358_v2  ;;  %v311_v7 = vld [vmem:[%s6669_s20 + $0x8] sm:$0xff]  ;;  %v5171_v8 = vpack.c.bf16 %v367_v6, %v364_v5  ;;  %v370_v9 = vld [vmem:[#allocation5 + $0x160] sm:$0xff]  ;;  %v373_v10 = vld [vmem:[#allocation5 + $0x178] sm:$0xff] }
  0x80   : > { %5132 = vmatprep.subr.bf16.mxu0 %v5131_v28  ;;  %5156 = vmatprep.subr.bf16.mxu1 %v5155_v52  ;;  %v312_v11 = vld [vmem:[%s6669_s20 + $0x10] sm:$0xff]  ;;  %v5175_v12 = vpack.c.bf16 %v373_v10, %v370_v9  ;;  %v313_v13 = vld [vmem:[%s6669_s20 + $0x18] sm:$0xff]  ;;  %v314_v14 = vld [vmem:[%s6669_s20 + $0x20] sm:$0xff] }
  0x81   : > { %v315_v15 = vld [vmem:[%s6669_s20 + $0x28] sm:$0xff]  ;;  %v316_v16 = vld [vmem:[%s6669_s20 + $0x30] sm:$0xff]  ;;  %v317_v17 = vld [vmem:[%s6669_s20 + $0x38] sm:$0xff] }
  0x82   : > { %v318_v18 = vld [vmem:[%s6669_s20 + $0x40] sm:$0xff]  ;;  %v319_v19 = vld [vmem:[%s6669_s20 + $0x48] sm:$0xff]  ;;  %v320_v20 = vld [vmem:[%s6669_s20 + $0x50] sm:$0xff] }
  0x83   : > { %5134 = vmatpush1.bf16.msra.mxu0 %v5133_v34  ;;  %5158 = vmatpush3.bf16.msra.mxu1 %v5155_v52  ;;  %v321_v21 = vld [vmem:[%s6669_s20 + $0x58] sm:$0xff]  ;;  %v322_v22 = vld [vmem:[%s6669_s20 + $0x60] sm:$0xff]  ;;  %v323_v23 = vld [vmem:[%s6669_s20 + $0x68] sm:$0xff] }
  0x84   : > { %5136 = vmatprep.subr.bf16.mxu0 %v5135_v38  ;;  %5160 = vmatprep.subr.bf16.mxu1 %v5159_v60  ;;  %v324_v24 = vld [vmem:[%s6669_s20 + $0x70] sm:$0xff]  ;;  %v325_v25 = vld [vmem:[%s6669_s20 + $0x78] sm:$0xff]  ;;  %v374_v29 = vld [vmem:[%s8630_s2] sm:$0x7]  ;;  %s3880_s20 = scalar_lea.sflag [#allocation10], %s6663_s9 }
  0x85   : > { %vm6739_vm1 = vmpackc.low %vm748_vm0, %vm748_vm0 }
  0x86   : > { %v8727_v41 = vsel %vm6739_vm1, 4294967295, %v8726_v41 }
  0x87   : > { %5138 = vmatpush1.bf16.msra.mxu0 %v5137_v47  ;;  %5162 = vmatpush3.bf16.msra.mxu1 %v5159_v60  ;;  %8728 = vst [vmem:[#allocation16_spill] sm:$0xff] %v8727_v41 }
  0x88   : > { %5140 = vmatprep.subr.bf16.mxu0 %v5139_v48  ;;  %5164 = vmatprep.subr.bf16.mxu1 %v5163_v1 }
  0x8b   : > { %5142 = vmatpush1.bf16.msra.mxu0 %v5141_v56  ;;  %5166 = vmatpush3.bf16.msra.mxu1 %v5163_v1 }
  0x8c   : > { %5144 = vmatprep.subr.bf16.mxu0 %v5143_v57  ;;  %5168 = vmatprep.subr.bf16.mxu1 %v5167_v4 }
  0x8f   : > { %5146 = vmatpush1.bf16.msra.mxu0 %v5145_v63  ;;  %5170 = vmatpush3.bf16.msra.mxu1 %v5167_v4 }
  0x90   : > { %5172 = vmatprep.subr.bf16.mxu1 %v5171_v8 }
  0x92   : > { %456 = vmatmul.mubr.f32.vlgmr.msra.gmra.mrb[0].mxu0 %v6681_v26  ;;  %v376_v26 = vlaneseq }
  0x93   : > { %461 = vmatprep.mubr.f32.mxu0 %v6442_v0  ;;  %5174 = vmatpush3.bf16.msra.mxu1 %v5171_v8 }
  0x94   : > { %5176 = vmatprep.subr.bf16.mxu1 %v5175_v12  ;;  %v6716_v27 = vshrl.u32 %v376_v26, 7 }
  0x96   : > { %462 = vmatmul.mubr.f32.gmra.mrb[2].mxu0 %v311_v7  ;;  %8725 = vst [vmem:[#allocation15_spill] sm:$0xff] %v6716_v27  ;;  %v378_v28 = vsub.s32 0, %v6716_v27  ;;  %v382_v31 = vsub.s32 1, %v6716_v27  ;;  %v386_v47 = vsub.s32 2, %v6716_v27 }
  0x97   : > { %467 = vmatprep.mubr.f32.mxu0 %v6442_v0  ;;  %5178 = vmatpush3.bf16.msra.mxu1 %v5175_v12 }
  0x98   : > { %v6722_v30 = vrot.slane %v374_v29, %v378_v28  ;;  %v6758_v51 = vrot.slane %v374_v29, %v386_v47 }
  0x9a   : > { %468 = vmatmul.mubr.f32.gmra.mrb[4].mxu0 %v312_v11  ;;  %4588 = vmatmul.mubr.f32.vlgmr.msra.gmra.mrb[0].mxu1 %v311_v7 }
  0x9b   : > { %473 = vmatprep.mubr.f32.mxu0 %v6442_v0  ;;  %4590 = vmatprep.mubr.f32.mxu1 %v312_v11 }
  0x9e   : > { %474 = vmatmul.mubr.f32.gmra.mrb[6].mxu0 %v313_v13  ;;  %4591 = vmatmul.mubr.f32.gmra.mrb[2].mxu1 %v313_v13 }
  0x9f   : > { %479 = vmatprep.mubr.f32.mxu0 %v6442_v0  ;;  %4593 = vmatprep.mubr.f32.mxu1 %v314_v14 }
  0xa2   : > { %480 = vmatmul.mubr.f32.gmra.mrb[8].mxu0 %v314_v14  ;;  %4594 = vmatmul.mubr.f32.gmra.mrb[4].mxu1 %v315_v15 }
  0xa3   : > { %485 = vmatprep.mubr.f32.mxu0 %v6442_v0  ;;  %4596 = vmatprep.mubr.f32.mxu1 %v316_v16 }
  0xa6   : > { %486 = vmatmul.mubr.f32.gmra.mrb[10].mxu0 %v315_v15  ;;  %4597 = vmatmul.mubr.f32.gmra.mrb[6].mxu1 %v317_v17 }
  0xa7   : > { %491 = vmatprep.mubr.f32.mxu0 %v6442_v0  ;;  %4599 = vmatprep.mubr.f32.mxu1 %v318_v18 }
  0xaa   : > { %492 = vmatmul.mubr.f32.gmra.mrb[12].mxu0 %v316_v16  ;;  %4600 = vmatmul.mubr.f32.gmra.mrb[8].mxu1 %v319_v19 }
  0xab   : > { %497 = vmatprep.mubr.f32.mxu0 %v6442_v0  ;;  %4602 = vmatprep.mubr.f32.mxu1 %v320_v20 }
  0xae   : > { %498 = vmatmul.mubr.f32.gmra.mrb[14].mxu0 %v317_v17  ;;  %4603 = vmatmul.mubr.f32.gmra.mrb[10].mxu1 %v321_v21 }
  0xaf   : > { %503 = vmatprep.mubr.f32.mxu0 %v6442_v0  ;;  %4605 = vmatprep.mubr.f32.mxu1 %v322_v22 }
  0xb2   : > { %504 = vmatmul.mubr.f32.gmra.mrb[16].mxu0 %v318_v18  ;;  %4606 = vmatmul.mubr.f32.gmra.mrb[12].mxu1 %v323_v23 }
  0xb3   : > { %509 = vmatprep.mubr.f32.mxu0 %v6442_v0  ;;  %4608 = vmatprep.mubr.f32.mxu1 %v324_v24 }
  0xb6   : > { %510 = vmatmul.mubr.f32.gmra.mrb[18].mxu0 %v319_v19  ;;  %4609 = vmatmul.mubr.f32.gmra.mrb[14].mxu1 %v325_v25 }
  0xb7   : > { %515 = vmatprep.mubr.f32.mxu0 %v6442_v0 }
  0xba   : > { %516 = vmatmul.mubr.f32.gmra.mrb[20].mxu0 %v320_v20 }
  0xbb   : > { %521 = vmatprep.mubr.f32.mxu0 %v6442_v0 }
  0xbe   : > { %522 = vmatmul.mubr.f32.gmra.mrb[22].mxu0 %v321_v21 }
  0xbf   : > { %527 = vmatprep.mubr.f32.mxu0 %v6442_v0 }
  0xc2   : > { %528 = vmatmul.mubr.f32.gmra.mrb[24].mxu0 %v322_v22 }
  0xc3   : > { %533 = vmatprep.mubr.f32.mxu0 %v6442_v0 }
  0xc6   : > { %534 = vmatmul.mubr.f32.gmra.mrb[26].mxu0 %v323_v23 }
  0xc7   : > { %539 = vmatprep.mubr.f32.mxu0 %v6442_v0 }
  0xca   : > { %540 = vmatmul.mubr.f32.gmra.mrb[28].mxu0 %v324_v24 }
  0xcb   : > { %545 = vmatprep.mubr.f32.mxu0 %v6442_v0  ;;  %v6726_v0 = vrot.slane %v374_v29, %v382_v31 }
  0xce   : > { %546 = vmatmul.mubr.f32.gmra.mrb[30].mxu0 %v325_v25 }
 0x165   : > { %v457_v32 = vpop.f32.mrb[0].mxu0 }
 0x166   : > { %v458_v33 = vadd.f32 %v457_v32, %v6722_v30  ;;  %v459_v34 = vpop.f32.mrb[1].mxu0 }
 0x167   : > { %v460_v39 = vadd.f32 %v459_v34, %v6726_v0 }
 0x168   : > { %v6728_v35 = vmul.f32 0.17677669, %v458_v33 }
 0x169   : > { %v463_v36 = vpop.f32.mrb[2].mxu0 }
 0x16a   : > { %v6731_v37 = vadd.f32 %v463_v36, %v6722_v30  ;;  %v465_v38 = vpop.f32.mrb[3].mxu0  ;;  %4643 = vmatprep.mubr.msk.f32.mxu0 %vm748_vm0, %v6728_v35 }
 0x16b   : > { %v466_v40 = vadd.f32 %v465_v38, %v6726_v0 }
 0x16d   : > { %v469_v42 = vpop.f32.mrb[4].mxu0  ;;  %v6743_v43 = vpack.i.bf16 %v466_v40, %v460_v39  ;;  %v5179_v44 = vpack.c.bf16 %v466_v40, %v460_v39  ;;  %v4589_v57 = vpop.f32.mrb[0].mxu1 }
 0x16e   : > { %v6746_v45 = vadd.f32 %v469_v42, %v6722_v30  ;;  %v471_v46 = vpop.f32.mrb[5].mxu0  ;;  %v6768_v60 = vadd.f32 %v4589_v57, %v6758_v51  ;;  %v618_v61 = vpop.f32.mrb[1].mxu1 }
 0x16f   : > { %8729 = vst [vmem:[#allocation17_spill] sm:$0xff] %v6743_v43  ;;  %5630 = vrot.lane.b32.xlu0 %v6743_v43, %s6443_s17  ;;  %5181 = vmatprep.subr.msk.bf16.mxu0 %vm6739_vm1, %v5179_v44  ;;  %v472_v52 = vadd.f32 %v471_v46, %v6726_v0  ;;  %v6775_v62 = vadd.f32 %v618_v61, %v6758_v51 }
 0x170   : > { %5184 = vmatpush3.bf16.xpose.msk.msra.mxu0 %vm6739_vm1, %v5179_v44 }
 0x171   : > { %v475_v48 = vpop.f32.mrb[6].mxu0  ;;  %v4592_v1 = vpop.f32.mrb[2].mxu1  ;;  %v5227_v2 = vpack.c.bf16 %v6768_v60, %v6775_v62 }
 0x172   : > { %v6756_v49 = vadd.f32 %v475_v48, %v6722_v30  ;;  %v477_v50 = vpop.f32.mrb[7].mxu0  ;;  %v6785_v5 = vadd.f32 %v4592_v1, %v6758_v51  ;;  %v628_v6 = vpop.f32.mrb[3].mxu1 }
 0x173   : > { %v478_v53 = vadd.f32 %v477_v50, %v6726_v0  ;;  %v6790_v9 = vadd.f32 %v628_v6, %v6758_v51  ;;  %5228 = vmatprep.subr.bf16.mxu1 %v5227_v2 }
 0x174   : > { %5230 = vmatpush3.bf16.msra.mxu1 %v5227_v2 }
 0x175   : > { %v481_v54 = vpop.f32.mrb[8].mxu0  ;;  %v6762_v55 = vpack.i.bf16 %v478_v53, %v472_v52  ;;  %v5185_v56 = vpack.c.bf16 %v478_v53, %v472_v52  ;;  %v4595_v12 = vpop.f32.mrb[4].mxu1  ;;  %v5231_v13 = vpack.c.bf16 %v6785_v5, %v6790_v9 }
 0x176   : > { %v6765_v58 = vadd.f32 %v481_v54, %v6722_v30  ;;  %v483_v59 = vpop.f32.mrb[9].mxu0  ;;  %v6800_v17 = vadd.f32 %v4595_v12, %v6758_v51  ;;  %v638_v18 = vpop.f32.mrb[5].mxu1 }
 0x177   : > { %8730 = vst [vmem:[#allocation18_spill] sm:$0xff] %v6762_v55  ;;  %5635 = vrot.lane.b32.xlu1 %v6762_v55, %s6443_s17  ;;  %5187 = vmatprep.subr.msk.bf16.mxu0 %vm6739_vm1, %v5185_v56  ;;  %v484_v7 = vadd.f32 %v483_v59, %v6726_v0  ;;  %v6805_v19 = vadd.f32 %v638_v18, %v6758_v51 }
 0x178   : > { %5190 = vmatpush3.bf16.xpose.msk.msra.mxu0 %vm6739_vm1, %v5185_v56  ;;  %5232 = vmatprep.subr.bf16.mxu1 %v5231_v13 }
 0x179   : > { %v487_v63 = vpop.f32.mrb[10].mxu0  ;;  %5234 = vmatpush3.bf16.msra.mxu1 %v5231_v13  ;;  %v4598_v21 = vpop.f32.mrb[6].mxu1  ;;  %v5235_v22 = vpack.c.bf16 %v6800_v17, %v6805_v19 }
 0x17a   : > { %v6782_v3 = vadd.f32 %v487_v63, %v6722_v30  ;;  %v489_v4 = vpop.f32.mrb[11].mxu0  ;;  %v6815_v25 = vadd.f32 %v4598_v21, %v6758_v51  ;;  %v648_v28 = vpop.f32.mrb[7].mxu1 }
 0x17b   : > { %v490_v8 = vadd.f32 %v489_v4, %v6726_v0  ;;  %v6820_v32 = vadd.f32 %v648_v28, %v6758_v51  ;;  %5236 = vmatprep.subr.bf16.mxu1 %v5235_v22 }
 0x17d   : > { %v493_v10 = vpop.f32.mrb[12].mxu0  ;;  %v5191_v11 = vpack.c.bf16 %v490_v8, %v484_v7  ;;  %v6794_v14 = vpack.i.bf16 %v490_v8, %v484_v7  ;;  %5238 = vmatpush3.bf16.msra.mxu1 %v5235_v22  ;;  %v4601_v36 = vpop.f32.mrb[8].mxu1  ;;  %v5239_v38 = vpack.c.bf16 %v6815_v25, %v6820_v32 }
 0x17e   : > { %v6797_v15 = vadd.f32 %v493_v10, %v6722_v30  ;;  %v495_v16 = vpop.f32.mrb[13].mxu0  ;;  %v6830_v44 = vadd.f32 %v4601_v36, %v6758_v51  ;;  %v658_v46 = vpop.f32.mrb[9].mxu1 }
 0x17f   : > { %8731 = vst [vmem:[#allocation19_spill] sm:$0xff] %v6794_v14  ;;  %5193 = vmatprep.subr.msk.bf16.mxu0 %vm6739_vm1, %v5191_v11  ;;  %v496_v29 = vadd.f32 %v495_v16, %v6726_v0  ;;  %v6835_v47 = vadd.f32 %v658_v46, %v6758_v51  ;;  %5240 = vmatprep.subr.bf16.mxu1 %v5239_v38 }
 0x180   : > { %5196 = vmatpush3.bf16.xpose.msk.msra.mxu0 %vm6739_vm1, %v5191_v11 }
 0x181   : > { %v499_v20 = vpop.f32.mrb[14].mxu0  ;;  %5242 = vmatpush3.bf16.msra.mxu1 %v5239_v38  ;;  %v4604_v50 = vpop.f32.mrb[10].mxu1  ;;  %v5243_v52 = vpack.c.bf16 %v6830_v44, %v6835_v47 }
 0x182   : > { %v6812_v23 = vadd.f32 %v499_v20, %v6722_v30  ;;  %v501_v24 = vpop.f32.mrb[15].mxu0  ;;  %v6845_v56 = vadd.f32 %v4604_v50, %v6758_v51  ;;  %v668_v57 = vpop.f32.mrb[11].mxu1 }
 0x183   : > { %v502_v31 = vadd.f32 %v501_v24, %v6726_v0  ;;  %v6850_v63 = vadd.f32 %v668_v57, %v6758_v51  ;;  %5244 = vmatprep.subr.bf16.mxu1 %v5243_v52 }
 0x185   : > { %v505_v33 = vpop.f32.mrb[16].mxu0  ;;  %v5197_v34 = vpack.c.bf16 %v502_v31, %v496_v29  ;;  %v6824_v39 = vpack.i.bf16 %v502_v31, %v496_v29  ;;  %5246 = vmatpush3.bf16.msra.mxu1 %v5243_v52  ;;  %v4607_v4 = vpop.f32.mrb[12].mxu1  ;;  %v5247_v6 = vpack.c.bf16 %v6845_v56, %v6850_v63 }
 0x186   : > { %v6827_v40 = vadd.f32 %v505_v33, %v6722_v30  ;;  %v507_v42 = vpop.f32.mrb[17].mxu0  ;;  %v6860_v11 = vadd.f32 %v4607_v4, %v6758_v51  ;;  %v678_v12 = vpop.f32.mrb[13].mxu1 }
 0x187   : > { %8732 = vst [vmem:[#allocation20_spill] sm:$0xff] %v6824_v39  ;;  %5199 = vmatprep.subr.msk.bf16.mxu0 %vm6739_vm1, %v5197_v34  ;;  %v508_v59 = vadd.f32 %v507_v42, %v6726_v0  ;;  %v6865_v13 = vadd.f32 %v678_v12, %v6758_v51  ;;  %5248 = vmatprep.subr.bf16.mxu1 %v5247_v6 }
 0x188   : > { %5202 = vmatpush3.bf16.xpose.msk.msra.mxu0 %vm6739_vm1, %v5197_v34  ;;  %8733 = vst [vmem:[#allocation21_spill] sm:$0xff] %v6860_v11 }
 0x189   : > { %v511_v48 = vpop.f32.mrb[18].mxu0  ;;  %8734 = vst [vmem:[#allocation22_spill] sm:$0xff] %v6865_v13  ;;  %5250 = vmatpush3.bf16.msra.mxu1 %v5247_v6  ;;  %v4610_v18 = vpop.f32.mrb[14].mxu1  ;;  %v5251_v20 = vpack.c.bf16 %v6860_v11, %v6865_v13 }
 0x18a   : > { %v6842_v53 = vadd.f32 %v511_v48, %v6722_v30  ;;  %v513_v54 = vpop.f32.mrb[19].mxu0  ;;  %v6873_v24 = vadd.f32 %v4610_v18, %v6758_v51  ;;  %v688_v28 = vpop.f32.mrb[15].mxu1 }
 0x18b   : > { %v514_v61 = vadd.f32 %v513_v54, %v6726_v0  ;;  %v6878_v33 = vadd.f32 %v688_v28, %v6758_v51  ;;  %5252 = vmatprep.subr.bf16.mxu1 %v5251_v20  ;;  %v6909_v28 = vmul.f32 0.17677669, %v6731_v37  ;;  %v6929_v37 = vmul.f32 0.17677669, %v6782_v3 }
 0x18c   : > { %v6949_v3 = vmul.f32 0.17677669, %v6842_v53 }
 0x18d   : > { %v517_v1 = vpop.f32.mrb[20].mxu0  ;;  %v5203_v2 = vpack.c.bf16 %v514_v61, %v508_v59  ;;  %v6854_v7 = vpack.i.bf16 %v514_v61, %v508_v59  ;;  %5254 = vmatpush3.bf16.msra.mxu1 %v5251_v20  ;;  %v5255_v38 = vpack.c.bf16 %v6873_v24, %v6878_v33 }
 0x18e   : > { %v6857_v8 = vadd.f32 %v517_v1, %v6722_v30  ;;  %v519_v10 = vpop.f32.mrb[21].mxu0 }
 0x18f   : > { %5205 = vmatprep.subr.msk.bf16.mxu0 %vm6739_vm1, %v5203_v2  ;;  %v520_v29 = vadd.f32 %v519_v10, %v6726_v0  ;;  %5256 = vmatprep.subr.bf16.mxu1 %v5255_v38 }
 0x190   : > { %5208 = vmatpush3.bf16.xpose.msk.msra.mxu0 %vm6739_vm1, %v5203_v2 }
 0x191   : > { %v523_v16 = vpop.f32.mrb[22].mxu0  ;;  %5258 = vmatpush3.bf16.msra.mxu1 %v5255_v38 }
 0x192   : > { %v524_v21 = vadd.f32 %v523_v16, %v6722_v30  ;;  %v525_v22 = vpop.f32.mrb[23].mxu0 }
 0x193   : > { %v526_v31 = vadd.f32 %v525_v22, %v6726_v0 }
 0x195   : > { %v529_v34 = vpop.f32.mrb[24].mxu0  ;;  %v5209_v36 = vpack.c.bf16 %v526_v31, %v520_v29  ;;  %v6882_v42 = vpack.i.bf16 %v526_v31, %v520_v29  ;;  %v6912_v29 = vmul.f32 0.17677669, %v6746_v45  ;;  %v6932_v45 = vmul.f32 0.17677669, %v6797_v15 }
 0x196   : > { %v530_v46 = vadd.f32 %v529_v34, %v6722_v30  ;;  %v531_v48 = vpop.f32.mrb[25].mxu0  ;;  %v6952_v15 = vmul.f32 0.17677669, %v6857_v8 }
 0x197   : > { %5211 = vmatprep.subr.msk.bf16.mxu0 %vm6739_vm1, %v5209_v36  ;;  %v532_v54 = vadd.f32 %v531_v48, %v6726_v0  ;;  %v6987_v48 = vand.u32 127, %v376_v26  ;;  %v7005_v26 = vadd.s32 16, %v6716_v27 }
 0x198   : > { %5214 = vmatpush3.bf16.xpose.msk.msra.mxu0 %vm6739_vm1, %v5209_v36 }
 0x199   : > { %v535_v51 = vpop.f32.mrb[26].mxu0  ;;  %8737 = vst [vmem:[#allocation25_spill] sm:$0xff] %v6987_v48  ;;  %vm716_vm3 = vcmp.ge.s32.totalorder %v6716_v27, %v6987_v48  ;;  %8739 = vst [vmem:[#allocation27_spill] sm:$0xff] %v7005_v26  ;;  %vm718_vm5 = vcmp.ge.s32.totalorder %v7005_v26, %v6987_v48  ;;  %v7090_v26 = vadd.s32 88, %v6716_v27 }
 0x19a   : > { %v536_v50 = vadd.f32 %v535_v51, %v6722_v30  ;;  %v537_v52 = vpop.f32.mrb[27].mxu0  ;;  %v6992_v51 = vadd.s32 24, %v6716_v27 }
 0x19b   : > { %v538_v57 = vadd.f32 %v537_v52, %v6726_v0  ;;  %8747 = vst [vmem:[#allocation35_spill] sm:$0xff] %v7090_v26  ;;  %vm727_vm13 = vcmp.ge.s32.totalorder %v7090_v26, %v6987_v48 }
 0x19c   : > { %v6966_v53 = vmul.f32 0.17677669, %v536_v50  ;;  %8738 = vst [vmem:[#allocation26_spill] sm:$0xff] %v6992_v51  ;;  %vm8694_vm4 = vcmp.ge.s32.totalorder %v6992_v51, %v6987_v48 }
 0x19d   : > { %v541_v59 = vpop.f32.mrb[28].mxu0  ;;  %v5215_v61 = vpack.c.bf16 %v538_v57, %v532_v54  ;;  %v6892_v1 = vpack.i.bf16 %v538_v57, %v532_v54  ;;  %v7008_v57 = vadd.s32 32, %v6716_v27 }
 0x19e   : > { %v542_v2 = vadd.f32 %v541_v59, %v6722_v30  ;;  %v543_v4 = vpop.f32.mrb[29].mxu0 }
 0x19f   : > { %5217 = vmatprep.subr.msk.bf16.mxu0 %vm6739_vm1, %v5215_v61  ;;  %v544_v16 = vadd.f32 %v543_v4, %v6726_v0  ;;  %8740 = vst [vmem:[#allocation28_spill] sm:$0xff] %v7008_v57  ;;  %vm8695_vm6 = vcmp.ge.s32.totalorder %v7008_v57, %v6987_v48 }
 0x1a0   : > { %5220 = vmatpush3.bf16.xpose.msk.msra.mxu0 %vm6739_vm1, %v5215_v61  ;;  %v6968_v8 = vmul.f32 0.17677669, %v542_v2 }
 0x1a1   : > { %v547_v6 = vpop.f32.mrb[30].mxu0 }
 0x1a2   : > { %v548_v10 = vadd.f32 %v547_v6, %v6722_v30  ;;  %v549_v12 = vpop.f32.mrb[31].mxu0  ;;  %v6919_v30 = vmul.f32 0.17677669, %v6756_v49  ;;  %v6939_v49 = vmul.f32 0.17677669, %v6812_v23  ;;  %v7025_v6 = vadd.s32 40, %v6716_v27 }
 0x1a3   : > { %v550_v18 = vadd.f32 %v549_v12, %v6726_v0  ;;  %v6922_v0 = vmul.f32 0.17677669, %v6765_v58  ;;  %v6942_v58 = vmul.f32 0.17677669, %v6827_v40  ;;  %v6958_v23 = vmul.f32 0.17677669, %v524_v21 }
 0x1a4   : > { %v6960_v40 = vmul.f32 0.17677669, %v530_v46  ;;  %v6974_v21 = vmul.f32 0.17677669, %v548_v10  ;;  %v6984_v46 = vadd.s32 8, %v6716_v27  ;;  %8741 = vst [vmem:[#allocation29_spill] sm:$0xff] %v7025_v6  ;;  %vm721_vm7 = vcmp.ge.s32.totalorder %v7025_v6, %v6987_v48 }
 0x1a5   : > { %v5221_v20 = vpack.c.bf16 %v550_v18, %v544_v16  ;;  %v6902_v22 = vpack.i.bf16 %v550_v18, %v544_v16  ;;  %v7030_v10 = vadd.s32 48, %v6716_v27 }
 0x1a6   : > { %8736 = vst [vmem:[#allocation24_spill] sm:$0xff] %v6984_v46  ;;  %vm717_vm2 = vcmp.ge.s32.totalorder %v6984_v46, %v6987_v48  ;;  %v7134_v46 = vadd.s32 120, %v6716_v27 }
 0x1a7   : > { %5223 = vmatprep.subr.msk.bf16.mxu0 %vm6739_vm1, %v5221_v20  ;;  %8742 = vst [vmem:[#allocation30_spill] sm:$0xff] %v7030_v10  ;;  %vm722_vm8 = vcmp.ge.s32.totalorder %v7030_v10, %v6987_v48 }
 0x1a8   : > { %5226 = vmatpush3.bf16.xpose.msk.msra.mxu0 %vm6739_vm1, %v5221_v20  ;;  %8751 = vst [vmem:[#allocation39_spill] sm:$0xff] %v7134_v46 }
 0x1af   : > { %4644 = vmatmul.mubr.msk.f32.vlgmr.msra.gmra.mrb[32].mxu0 %vm748_vm0, %v6909_v28 }
 0x1b0   : > { %4646 = vmatprep.mubr.msk.f32.mxu0 %vm748_vm0, %v6912_v29 }
 0x1b3   : > { %4647 = vmatmul.mubr.msk.f32.gmra.mrb[34].mxu0 %vm748_vm0, %v6919_v30 }
 0x1b4   : > { %4649 = vmatprep.mubr.msk.f32.mxu0 %vm748_vm0, %v6922_v0 }
 0x1b7   : > { %4650 = vmatmul.mubr.msk.f32.gmra.mrb[36].mxu0 %vm748_vm0, %v6929_v37 }
 0x1b8   : > { %4652 = vmatprep.mubr.msk.f32.mxu0 %vm748_vm0, %v6932_v45 }
 0x1bb   : > { %4653 = vmatmul.mubr.msk.f32.gmra.mrb[38].mxu0 %vm748_vm0, %v6939_v49 }
 0x1bc   : > { %4655 = vmatprep.mubr.msk.f32.mxu0 %vm748_vm0, %v6942_v58 }
 0x1bf   : > { %4656 = vmatmul.mubr.msk.f32.gmra.mrb[40].mxu0 %vm748_vm0, %v6949_v3 }
 0x1c0   : > { %4658 = vmatprep.mubr.msk.f32.mxu0 %vm748_vm0, %v6952_v15 }
 0x1c3   : > { %4659 = vmatmul.mubr.msk.f32.gmra.mrb[42].mxu0 %vm748_vm0, %v6958_v23 }
 0x1c4   : > { %4661 = vmatprep.mubr.msk.f32.mxu0 %vm748_vm0, %v6960_v40 }
 0x1c7   : > { %4662 = vmatmul.mubr.msk.f32.gmra.mrb[44].mxu0 %vm748_vm0, %v6966_v53 }
 0x1c8   : > { %4664 = vmatprep.mubr.msk.f32.mxu0 %vm748_vm0, %v6968_v8 }
 0x1cb   : > { %4665 = vmatmul.mubr.msk.f32.gmra.mrb[46].mxu0 %vm748_vm0, %v6974_v21 }
 0x1e1   : > { %v5631_v31 = vpop.permute.xlu0 %5630 }
 0x1e2   : > { %v5633_v34 = vunpack.i.h.bf16 %v5631_v31  ;;  %v5632_v36 = vunpack.i.l.bf16 %v5631_v31  ;;  %v7046_v31 = vadd.s32 56, %v6716_v27 }
 0x1e4   : > { %v6978_v38 = vpack.c.bf16 %v5633_v34, %v5632_v36  ;;  %8743 = vst [vmem:[#allocation31_spill] sm:$0xff] %v7046_v31  ;;  %v7052_v34 = vadd.s32 64, %v6716_v27  ;;  %vm723_vm9 = vcmp.ge.s32.totalorder %v7046_v31, %v6987_v48  ;;  %v7112_v31 = vadd.s32 104, %v6716_v27 }
 0x1e6   : > { %8735 = vst [vmem:[#allocation23_spill] sm:$0xff] %v6978_v38  ;;  %5261 = vmatprep.subr.msk.bf16.mxu1 %vm6739_vm1, %v6978_v38  ;;  %8744 = vst [vmem:[#allocation32_spill] sm:$0xff] %v7052_v34  ;;  %vm724_vm10 = vcmp.ge.s32.totalorder %v7052_v34, %v6987_v48  ;;  %vm729_vm15 = vcmp.ge.s32.totalorder %v7112_v31, %v6987_v48 }
 0x1e7   : > { %8749 = vst [vmem:[#allocation37_spill] sm:$0xff] %v7112_v31 }
 0x282   : > { %v4645_v50 = vpop.f32.mrb[32].mxu0 }
 0x283   : > { %v911_v52 = vpop.f32.mrb[33].mxu0  ;;  %v6997_v54 = vsel %vm717_vm2, %v4645_v50, -1e+30 }
 0x284   : > { %1008 = vmax.xlane.f32.xlu0 %v6997_v54  ;;  %v7013_v2 = vsel %vm716_vm3, %v911_v52, -1e+30 }
 0x286   : > { %v4648_v59 = vpop.f32.mrb[34].mxu0 }
 0x287   : > { %v921_v61 = vpop.f32.mrb[35].mxu0  ;;  %v7018_v4 = vsel %vm8694_vm4, %v4648_v59, -1e+30 }
 0x288   : > { %1006 = vmax.xlane.f32.xlu0 %v7013_v2  ;;  %1012 = vmax.xlane.f32.xlu1 %v7018_v4  ;;  %v7035_v18 = vsel %vm718_vm5, %v921_v61, -1e+30  ;;  %v7068_v61 = vadd.s32 72, %v6716_v27 }
 0x28a   : > { %v4651_v12 = vpop.f32.mrb[36].mxu0  ;;  %8745 = vst [vmem:[#allocation33_spill] sm:$0xff] %v7068_v61  ;;  %vm725_vm11 = vcmp.ge.s32.totalorder %v7068_v61, %v6987_v48 }
 0x28b   : > { %v931_v16 = vpop.f32.mrb[37].mxu0  ;;  %v7057_v52 = vsel %vm721_vm7, %v4651_v12, -1e+30  ;;  %v7074_v12 = vadd.s32 80, %v6716_v27 }
 0x28c   : > { %1010 = vmax.xlane.f32.xlu1 %v7035_v18  ;;  %v7041_v20 = vsel %vm8695_vm6, %v931_v16, -1e+30 }
 0x28d   : > { %1014 = vmax.xlane.f32.xlu0 %v7041_v20  ;;  %8746 = vst [vmem:[#allocation34_spill] sm:$0xff] %v7074_v12  ;;  %vm8660_vm12 = vcmp.ge.s32.totalorder %v7074_v12, %v6987_v48 }
 0x28e   : > { %v4654_v36 = vpop.f32.mrb[38].mxu0 }
 0x28f   : > { %v941_v50 = vpop.f32.mrb[39].mxu0 }
 0x290   : > { %1016 = vmax.xlane.f32.xlu1 %v7057_v52  ;;  %v7063_v59 = vsel %vm722_vm8, %v941_v50, -1e+30  ;;  %v7079_v50 = vsel %vm723_vm9, %v4654_v36, -1e+30  ;;  %v7096_v36 = vadd.s32 96, %v6716_v27 }
 0x291   : > { %1018 = vmax.xlane.f32.xlu0 %v7063_v59 }
 0x292   : > { %v4657_v16 = vpop.f32.mrb[40].mxu0  ;;  %8748 = vst [vmem:[#allocation36_spill] sm:$0xff] %v7096_v36  ;;  %vm8665_vm14 = vcmp.ge.s32.totalorder %v7096_v36, %v6987_v48 }
 0x293   : > { %v951_v57 = vpop.f32.mrb[41].mxu0 }
 0x294   : > { %1020 = vmax.xlane.f32.xlu1 %v7079_v50  ;;  %v7085_v10 = vsel %vm724_vm10, %v951_v57, -1e+30  ;;  %v7101_v57 = vsel %vm725_vm11, %v4657_v16, -1e+30  ;;  %v7118_v16 = vadd.s32 112, %v6716_v27 }
 0x295   : > { %1022 = vmax.xlane.f32.xlu0 %v7085_v10 }
 0x296   : > { %v4660_v51 = vpop.f32.mrb[42].mxu0  ;;  %8750 = vst [vmem:[#allocation38_spill] sm:$0xff] %v7118_v16 }
 0x297   : > { %v961_v55 = vpop.f32.mrb[43].mxu0 }
 0x298   : > { %1024 = vmax.xlane.f32.xlu1 %v7101_v57  ;;  %v7107_v34 = vsel %vm8660_vm12, %v961_v55, -1e+30  ;;  %v7123_v55 = vsel %vm727_vm13, %v4660_v51, -1e+30  ;;  %vm730_vm12 = vcmp.ge.s32.totalorder %v7118_v16, %v6987_v48 }
 0x299   : > { %1026 = vmax.xlane.f32.xlu0 %v7107_v34 }
 0x29a   : > { %v4663_v61 = vpop.f32.mrb[44].mxu0 }
 0x29b   : > { %v971_v6 = vpop.f32.mrb[45].mxu0  ;;  %v7142_v41 = vsel %vm729_vm15, %v4663_v61, -1e+30 }
 0x29c   : > { %1028 = vmax.xlane.f32.xlu1 %v7123_v55  ;;  %v7129_v12 = vsel %vm8665_vm14, %v971_v6, -1e+30  ;;  %vm731_vm14 = vcmp.ge.s32.totalorder %v7134_v46, %v6987_v48 }
 0x29d   : > { %1030 = vmax.xlane.f32.xlu0 %v7129_v12 }
 0x29e   : > { %v4666_v51 = vpop.f32.mrb[46].mxu0 }
 0x29f   : > { %v981_v26 = vpop.f32.mrb[47].mxu0  ;;  %v7156_v36 = vsel %vm731_vm14, %v4666_v51, -1e+30 }
 0x2a0   : > { %1032 = vmax.xlane.f32.xlu1 %v7142_v41  ;;  %v7148_v6 = vsel %vm730_vm12, %v981_v26, -1e+30  ;;  %v7163_v26 = vpop.permute.xlu1 %5635 }
 0x2a1   : > { %1034 = vmax.xlane.f32.xlu0 %v7148_v6  ;;  %8752 = vst [vmem:[#allocation40_spill] sm:$0xff] %v7163_v26 }
 0x2a4   : > { %1036 = vmax.xlane.f32.xlu1 %v7156_v36 }
 0x2b5   : > { %5645 = vrot.lane.b32.xlu1 %v6824_v39, %s6443_s17 }
 0x2b7   : > { %5640 = vrot.lane.b32.xlu0 %v6794_v14, %s6443_s17 }
 0x311   : > { %v1009_v61 = vpop.xlane.xlu0 %1008 }
 0x312   : > { %v1039_v16 = vsub.f32 %v6997_v54, %v1009_v61 }
 0x314   : > { %v1056_v31 = vmul.f32 1.442695, %v1039_v16 }
 0x315   : > { %v1007_v27 = vpop.xlane.xlu0 %1006  ;;  %v1013_v38 = vpop.xlane.xlu1 %1012 }
 0x316   : > { %5989 = vpow2.f32 %v1056_v31  ;;  %v1038_v51 = vsub.f32 %v7013_v2, %v1007_v27  ;;  %v1041_v46 = vsub.f32 %v7018_v4, %v1013_v38 }
 0x318   : > { %v1054_v48 = vmul.f32 1.442695, %v1038_v51  ;;  %v1060_v43 = vmul.f32 1.442695, %v1041_v46 }
 0x319   : > { %v1011_v11 = vpop.xlane.xlu1 %1010 }
 0x31a   : > { %5991 = vpow2.f32 %v1054_v48  ;;  %v1040_v39 = vsub.f32 %v7035_v18, %v1011_v11  ;;  %v1015_v14 = vpop.xlane.xlu0 %1014 }
 0x31b   : > { %5993 = vpow2.f32 %v1060_v43  ;;  %v1042_v26 = vsub.f32 %v7041_v20, %v1015_v14 }
 0x31c   : > { %v1058_v13 = vmul.f32 1.442695, %v1040_v39 }
 0x31d   : > { %v1017_v54 = vpop.xlane.xlu1 %1016  ;;  %v1062_v61 = vmul.f32 1.442695, %v1042_v26 }
 0x31e   : > { %5995 = vpow2.f32 %v1058_v13  ;;  %v1019_v16 = vpop.xlane.xlu0 %1018 }
 0x31f   : > { %v1044_v31 = vsub.f32 %v7063_v59, %v1019_v16  ;;  %5997 = vpow2.f32 %v1062_v61 }
 0x320   : > { %v7171_v27 = vpop.eup %5989 }
 0x321   : > { %v1021_v38 = vpop.xlane.xlu1 %1020  ;;  %1088 = vadd.xlane.f32.xlu1 %v7171_v27  ;;  %v1066_v48 = vmul.f32 1.442695, %v1044_v31 }
 0x322   : > { %v1023_v46 = vpop.xlane.xlu0 %1022 }
 0x323   : > { %5999 = vpow2.f32 %v1066_v48 }
 0x324   : > { %v7174_v11 = vpop.eup %5991 }
 0x325   : > { %v7176_v43 = vpop.eup %5993  ;;  %v1025_v14 = vpop.xlane.xlu1 %1024  ;;  %1086 = vadd.xlane.f32.xlu0 %v7174_v11 }
 0x326   : > { %v1047_v39 = vsub.f32 %v7101_v57, %v1025_v14  ;;  %1092 = vadd.xlane.f32.xlu1 %v7176_v43  ;;  %v1027_v13 = vpop.xlane.xlu0 %1026 }
 0x327   : > { %v1048_v26 = vsub.f32 %v7107_v34, %v1027_v13 }
 0x328   : > { %v7181_v2 = vpop.eup %5995  ;;  %v1072_v4 = vmul.f32 1.442695, %v1047_v39 }
 0x329   : > { %v1029_v18 = vpop.xlane.xlu1 %1028  ;;  %v7186_v16 = vpop.eup %5997  ;;  %v1074_v57 = vmul.f32 1.442695, %v1048_v26 }
 0x32a   : > { %6001 = vpow2.f32 %v1072_v4  ;;  %v1049_v20 = vsub.f32 %v7123_v55, %v1029_v18  ;;  %1090 = vadd.xlane.f32.xlu1 %v7181_v2  ;;  %v1031_v59 = vpop.xlane.xlu0 %1030  ;;  %v1043_v18 = vsub.f32 %v7057_v52, %v1017_v54 }
 0x32b   : > { %v1050_v61 = vsub.f32 %v7129_v12, %v1031_v59  ;;  %v1045_v59 = vsub.f32 %v7079_v50, %v1021_v38  ;;  %v7251_v38 = vpack.i.bf16 %v6785_v5, %v6790_v9  ;;  %v7271_v5 = vpack.i.bf16 %v6845_v56, %v6850_v63  ;;  %v8759_v56 = vld [vmem:[#allocation21_spill] sm:$0xff] }
 0x32c   : > { %v1076_v51 = vmul.f32 1.442695, %v1049_v20  ;;  %v1064_v20 = vmul.f32 1.442695, %v1043_v18  ;;  %v7263_v18 = vpack.i.bf16 %v6830_v44, %v6835_v47  ;;  %v7279_v9 = vpack.i.bf16 %v6873_v24, %v6878_v33  ;;  %v8758_v47 = vld [vmem:[#allocation22_spill] sm:$0xff] }
 0x32d   : > { %v7190_v48 = vpop.eup %5999  ;;  %v1078_v55 = vmul.f32 1.442695, %v1050_v61  ;;  %v1033_v26 = vpop.xlane.xlu1 %1032  ;;  %8755 = vst [vmem:[#allocation43_spill] sm:$0xff] %v7271_v5  ;;  %v7315_v63 = vpack.i.bf16 %v8759_v56, %v8758_v47 }
 0x32e   : > { %6003 = vpow2.f32 %v1076_v51  ;;  %1094 = vadd.xlane.f32.xlu1 %v7186_v16  ;;  %v1035_v31 = vpop.xlane.xlu0 %1034  ;;  %v1068_v51 = vmul.f32 1.442695, %v1045_v59  ;;  %8754 = vst [vmem:[#allocation42_spill] sm:$0xff] %v7263_v18  ;;  %8756 = vst [vmem:[#allocation44_spill] sm:$0xff] %v7279_v9 }
 0x32f   : > { %6005 = vpow2.f32 %v1074_v57  ;;  %v1052_v14 = vsub.f32 %v7148_v6, %v1035_v31  ;;  %v1046_v57 = vsub.f32 %v7085_v10, %v1023_v46  ;;  %v1051_v31 = vsub.f32 %v7142_v41, %v1033_v26  ;;  %8760 = vst [vmem:[#allocation22_spill] sm:$0xff] %v7315_v63 }
 0x330   : > { %6007 = vpow2.f32 %v1078_v55  ;;  %v7257_v46 = vpack.i.bf16 %v6815_v25, %v6820_v32  ;;  %v7301_v25 = vpack.i.bf16 %v6768_v60, %v6775_v62  ;;  %v7307_v32 = vpack.i.bf16 %v6800_v17, %v6805_v19  ;;  %v8761_v19 = vld [vmem:[#allocation17_spill] sm:$0xff] }
 0x331   : > { %v1082_v34 = vmul.f32 1.442695, %v1052_v14  ;;  %v1070_v61 = vmul.f32 1.442695, %v1046_v57  ;;  %v1037_v55 = vpop.xlane.xlu1 %1036  ;;  %v1080_v14 = vmul.f32 1.442695, %v1051_v31 }
 0x332   : > { %1098 = vadd.xlane.f32.xlu1 %v7190_v48  ;;  %8753 = vst [vmem:[#allocation41_spill] sm:$0xff] %v7257_v46  ;;  %8757 = vst [vmem:[#allocation45_spill] sm:$0xff] %v7307_v32  ;;  %v7317_v24 = vpop.permute.xlu0 %5640 }
 0x333   : > { %6009 = vpow2.f32 %v1082_v34  ;;  %v1053_v34 = vsub.f32 %v7156_v36, %v1037_v55 }
 0x334   : > { %v7194_v39 = vpop.eup %6001  ;;  %6011 = vpow2.f32 %v1064_v20 }
 0x335   : > { %6013 = vpow2.f32 %v1068_v51  ;;  %v1084_v50 = vmul.f32 1.442695, %v1053_v34  ;;  %v7309_v44 = vpop.permute.xlu1 %5645 }
 0x336   : > { %1104 = vadd.xlane.f32.xlu1 %v7194_v39  ;;  %6015 = vpow2.f32 %v1070_v61 }
 0x337   : > { %6017 = vpow2.f32 %v1080_v14 }
 0x338   : > { %v7197_v13 = vpop.eup %6003  ;;  %6019 = vpow2.f32 %v1084_v50 }
 0x339   : > { %v7202_v12 = vpop.eup %6005 }
 0x33a   : > { %1108 = vadd.xlane.f32.xlu1 %v7197_v13  ;;  %v7205_v4 = vpop.eup %6007 }
 0x33b   : > { %5650 = vrot.lane.b32.xlu0 %v6854_v7, %s6443_s17 }
 0x33d   : > { %v7208_v6 = vpop.eup %6009 }
 0x33e   : > { %1106 = vadd.xlane.f32.xlu1 %v7202_v12  ;;  %v7218_v52 = vpop.eup %6011 }
 0x33f   : > { %v7223_v10 = vpop.eup %6013 }
 0x340   : > { %v7228_v41 = vpop.eup %6015 }
 0x341   : > { %v7233_v36 = vpop.eup %6017 }
 0x342   : > { %1110 = vadd.xlane.f32.xlu1 %v7205_v4  ;;  %v7238_v54 = vpop.eup %6019 }
 0x346   : > { %1114 = vadd.xlane.f32.xlu1 %v7208_v6 }
 0x357   : > { %5655 = vrot.lane.b32.xlu1 %v6882_v42, %s6443_s17 }
 0x35a   : > { %1096 = vadd.xlane.f32.xlu0 %v7218_v52 }
 0x35b   : > { %1361 = vrot.lane.b32.xlu1 %v6909_v28, %s6443_s17 }
 0x35e   : > { %1100 = vadd.xlane.f32.xlu0 %v7223_v10 }
 0x35f   : > { %1365 = vrot.lane.b32.xlu1 %v6919_v30, %s6443_s17 }
 0x362   : > { %1102 = vadd.xlane.f32.xlu0 %v7228_v41 }
 0x363   : > { %1369 = vrot.lane.b32.xlu1 %v6929_v37, %s6443_s17 }
 0x366   : > { %1112 = vadd.xlane.f32.xlu0 %v7233_v36 }
 0x367   : > { %1373 = vrot.lane.b32.xlu1 %v6939_v49, %s6443_s17 }
 0x36a   : > { %1116 = vadd.xlane.f32.xlu0 %v7238_v54 }
 0x36b   : > { %1377 = vrot.lane.b32.xlu1 %v6949_v3, %s6443_s17 }
 0x36f   : > { %1381 = vrot.lane.b32.xlu1 %v6958_v23, %s6443_s17 }
 0x373   : > { %1385 = vrot.lane.b32.xlu1 %v6966_v53, %s6443_s17 }
 0x377   : > { %1389 = vrot.lane.b32.xlu1 %v6974_v21, %s6443_s17 }
 0x37b   : > { %5675 = vrot.lane.b32.xlu1 %v7251_v38, %s6443_s17 }
 0x37f   : > { %5685 = vrot.lane.b32.xlu1 %v7257_v46, %s6443_s17 }
 0x380   : > { %5660 = vrot.lane.b32.xlu0 %v6892_v1, %s6443_s17 }
 0x383   : > { %5690 = vrot.lane.b32.xlu1 %v7263_v18, %s6443_s17 }
 0x384   : > { %5665 = vrot.lane.b32.xlu0 %v6902_v22, %s6443_s17 }
 0x387   : > { %5695 = vrot.lane.b32.xlu1 %v7271_v5, %s6443_s17 }
 0x388   : > { %1359 = vrot.lane.b32.xlu0 %v6728_v35, %s6443_s17 }
 0x38b   : > { %5705 = vrot.lane.b32.xlu1 %v7279_v9, %s6443_s17 }
 0x38c   : > { %1363 = vrot.lane.b32.xlu0 %v6912_v29, %s6443_s17 }
 0x390   : > { %1367 = vrot.lane.b32.xlu0 %v6922_v0, %s6443_s17 }
 0x394   : > { %1371 = vrot.lane.b32.xlu0 %v6932_v45, %s6443_s17 }
 0x398   : > { %1375 = vrot.lane.b32.xlu0 %v6942_v58, %s6443_s17 }
 0x39c   : > { %1379 = vrot.lane.b32.xlu0 %v6952_v15, %s6443_s17 }
 0x3a0   : > { %1383 = vrot.lane.b32.xlu0 %v6960_v40, %s6443_s17 }
 0x3a4   : > { %1387 = vrot.lane.b32.xlu0 %v6968_v8, %s6443_s17 }
 0x3a8   : > { %5670 = vrot.lane.b32.xlu0 %v7301_v25, %s6443_s17 }
 0x3ac   : > { %5680 = vrot.lane.b32.xlu0 %v7307_v32, %s6443_s17 }
 0x3ae   : > { %v1089_v60 = vpop.xlane.xlu1 %1088 }
 0x3af   : > { %6021 = vrcp.f32 %v1089_v60 }
 0x3b0   : > { %5700 = vrot.lane.b32.xlu0 %v7315_v63, %s6443_s17 }
 0x3b2   : > { %v1087_v62 = vpop.xlane.xlu0 %1086 }
 0x3b3   : > { %v1093_v17 = vpop.xlane.xlu1 %1092  ;;  %6023 = vrcp.f32 %v1087_v62 }
 0x3b4   : > { %6025 = vrcp.f32 %v1093_v17  ;;  %5710 = vrot.lane.b32.xlu0 %v8761_v19, %s6444_s18 }
 0x3b7   : > { %v1091_v33 = vpop.xlane.xlu1 %1090 }
 0x3b8   : > { %6027 = vrcp.f32 %v1091_v33 }
 0x3b9   : > { %v6022_v20 = vpop.eup %6021 }
 0x3ba   : > { %v1135_v59 = vmul.f32 %v6022_v20, %v1089_v60 }
 0x3bb   : > { %v1095_v26 = vpop.xlane.xlu1 %1094 }
 0x3bc   : > { %v1151_v51 = vsub.f32 2.0, %v1135_v59  ;;  %6029 = vrcp.f32 %v1095_v26  ;;  %v8762_v59 = vld [vmem:[#allocation40_spill] sm:$0xff] }
 0x3bd   : > { %v6024_v57 = vpop.eup %6023  ;;  %v5638_v19 = vunpack.i.h.bf16 %v8762_v59  ;;  %v5637_v5 = vunpack.i.l.bf16 %v8762_v59 }
 0x3be   : > { %v6026_v61 = vpop.eup %6025  ;;  %v1167_v31 = vmul.f32 %v6022_v20, %v1151_v51  ;;  %v1134_v55 = vmul.f32 %v6024_v57, %v1087_v62 }
 0x3bf   : > { %v1137_v14 = vmul.f32 %v6026_v61, %v1093_v17  ;;  %v1099_v34 = vpop.xlane.xlu1 %1098 }
 0x3c0   : > { %v1183_v50 = vmul.f32 %v7171_v27, %v1167_v31  ;;  %v1150_v47 = vsub.f32 2.0, %v1134_v55  ;;  %6031 = vrcp.f32 %v1099_v34 }
 0x3c1   : > { %v1153_v56 = vsub.f32 2.0, %v1137_v14  ;;  %v5265_v14 = vpack.c.bf16 %v5638_v19, %v5637_v5  ;;  %v5643_v5 = vunpack.i.h.bf16 %v7317_v24  ;;  %v5642_v19 = vunpack.i.l.bf16 %v7317_v24 }
 0x3c2   : > { %v6028_v9 = vpop.eup %6027  ;;  %1199 = vst [vmem:[%s7325_s19 + $0x8] sm:$0xff] %v1183_v50  ;;  %v1166_v60 = vmul.f32 %v6024_v57, %v1150_v47 }
 0x3c3   : > { %v1136_v62 = vmul.f32 %v6028_v9, %v1091_v33  ;;  %v1105_v17 = vpop.xlane.xlu1 %1104  ;;  %v1169_v20 = vmul.f32 %v6026_v61, %v1153_v56  ;;  %v8763_v33 = vld [vmem:[#allocation23_spill] sm:$0xff] }
 0x3c4   : > { %6033 = vrcp.f32 %v1105_v17  ;;  %v1182_v27 = vmul.f32 %v7174_v11, %v1166_v60 }
 0x3c5   : > { %v1152_v51 = vsub.f32 2.0, %v1136_v62  ;;  %v1185_v31 = vmul.f32 %v7176_v43, %v1169_v20  ;;  %v5271_v20 = vpack.c.bf16 %v5643_v5, %v5642_v19  ;;  %v5651_v5 = vpop.permute.xlu0 %5650 }
 0x3c6   : > { %v6030_v55 = vpop.eup %6029  ;;  %1198 = vst [vmem:[%s7325_s19] sm:$0xff] %v1182_v27  ;;  %4699 = vmatprep.mubr.f32.mxu1 %v1182_v27  ;;  %v5653_v19 = vunpack.i.h.bf16 %v5651_v5 }
 0x3c7   : > { %v1138_v57 = vmul.f32 %v6030_v55, %v1095_v26  ;;  %v1109_v47 = vpop.xlane.xlu1 %1108  ;;  %4700 = vmatmul.mubr.f32.vlgmr.msra.gmra.mrb[16].mxu1 %v1183_v50  ;;  %v1168_v63 = vmul.f32 %v6028_v9, %v1152_v51  ;;  %1201 = vst [vmem:[%s7325_s19 + $0x18] sm:$0xff] %v1185_v31  ;;  %v5648_v51 = vunpack.i.h.bf16 %v7309_v44 }
 0x3c8   : > { %6035 = vrcp.f32 %v1109_v47  ;;  %5264 = vmatpush3.bf16.xpose.msk.msra.mxu1 %vm6739_vm1, %v8763_v33 }
 0x3c9   : > { %v1154_v61 = vsub.f32 2.0, %v1138_v57  ;;  %5267 = vmatprep.subr.msk.bf16.mxu1 %vm6739_vm1, %v5265_v14  ;;  %v1184_v11 = vmul.f32 %v7181_v2, %v1168_v63 }
 0x3ca   : > { %v6032_v43 = vpop.eup %6031 }
 0x3cb   : > { %v1140_v26 = vmul.f32 %v6032_v43, %v1099_v34  ;;  %v1107_v9 = vpop.xlane.xlu1 %1106  ;;  %1200 = vst [vmem:[%s7325_s19 + $0x10] sm:$0xff] %v1184_v11  ;;  %4702 = vmatprep.mubr.f32.mxu1 %v1184_v11  ;;  %v1170_v50 = vmul.f32 %v6030_v55, %v1154_v61 }
 0x3cc   : > { %6037 = vrcp.f32 %v1107_v9  ;;  %4703 = vmatmul.mubr.f32.gmra.mrb[18].mxu1 %v1185_v31 }
 0x3cd   : > { %v1156_v56 = vsub.f32 2.0, %v1140_v26  ;;  %v1186_v60 = vmul.f32 %v7186_v16, %v1170_v50  ;;  %v5652_v26 = vunpack.i.l.bf16 %v5651_v5 }
 0x3ce   : > { %v6034_v62 = vpop.eup %6033 }
 0x3cf   : > { %v1143_v2 = vmul.f32 %v6034_v62, %v1105_v17  ;;  %v1111_v63 = vpop.xlane.xlu1 %1110  ;;  %1202 = vst [vmem:[%s7325_s19 + $0x20] sm:$0xff] %v1186_v60  ;;  %4705 = vmatprep.mubr.f32.mxu1 %v1186_v60  ;;  %v1172_v27 = vmul.f32 %v6032_v43, %v1156_v56  ;;  %v5647_v17 = vunpack.i.l.bf16 %v7309_v44 }
 0x3d0   : > { %6039 = vrcp.f32 %v1111_v63  ;;  %5270 = vmatpush3.bf16.xpose.msk.msra.mxu1 %vm6739_vm1, %v5265_v14 }
 0x3d1   : > { %v1159_v24 = vsub.f32 2.0, %v1143_v2  ;;  %5273 = vmatprep.subr.msk.bf16.mxu1 %vm6739_vm1, %v5271_v20  ;;  %v7350_v34 = vmul.f32 %v7190_v48, %v1172_v27  ;;  %v5277_v11 = vpack.c.bf16 %v5648_v51, %v5647_v17 }
 0x3d2   : > { %v6036_v16 = vpop.eup %6035 }
 0x3d3   : > { %v1145_v31 = vmul.f32 %v6036_v16, %v1109_v47  ;;  %v1115_v55 = vpop.xlane.xlu1 %1114  ;;  %1204 = vst [vmem:[%s7325_s19 + $0x30] sm:$0xff] %v7350_v34  ;;  %v1175_v57 = vmul.f32 %v6034_v62, %v1159_v24 }
 0x3d4   : > { %6041 = vrcp.f32 %v1115_v55 }
 0x3d5   : > { %v1161_v14 = vsub.f32 2.0, %v1145_v31  ;;  %v7357_v33 = vmul.f32 %v7194_v39, %v1175_v57 }
 0x3d6   : > { %v6038_v61 = vpop.eup %6037 }
 0x3d7   : > { %v1144_v48 = vmul.f32 %v6038_v61, %v1107_v9  ;;  %1207 = vst [vmem:[%s7325_s19 + $0x48] sm:$0xff] %v7357_v33  ;;  %v1177_v43 = vmul.f32 %v6036_v16, %v1161_v14  ;;  %v5656_v27 = vpop.permute.xlu1 %5655 }
 0x3d8   : > { %5276 = vmatpush3.bf16.xpose.msk.msra.mxu1 %vm6739_vm1, %v5271_v20  ;;  %v5283_v20 = vpack.c.bf16 %v5653_v19, %v5652_v26  ;;  %v5657_v16 = vunpack.i.l.bf16 %v5656_v27 }
 0x3d9   : > { %v1160_v44 = vsub.f32 2.0, %v1144_v48  ;;  %5279 = vmatprep.subr.msk.bf16.mxu1 %vm6739_vm1, %v5277_v11  ;;  %v7366_v47 = vmul.f32 %v7197_v13, %v1177_v43 }
 0x3da   : > { %v6040_v39 = vpop.eup %6039 }
 0x3db   : > { %v1146_v50 = vmul.f32 %v6040_v39, %v1111_v63  ;;  %v1176_v9 = vmul.f32 %v6038_v61, %v1160_v44  ;;  %1209 = vst [vmem:[%s7325_s19 + $0x58] sm:$0xff] %v7366_v47 }
 0x3dd   : > { %v1162_v56 = vsub.f32 2.0, %v1146_v50  ;;  %v7371_v60 = vmul.f32 %v7202_v12, %v1176_v9  ;;  %v5658_v12 = vunpack.i.h.bf16 %v5656_v27 }
 0x3de   : > { %v6042_v62 = vpop.eup %6041 }
 0x3df   : > { %v1148_v2 = vmul.f32 %v6042_v62, %v1115_v55  ;;  %1208 = vst [vmem:[%s7325_s19 + $0x50] sm:$0xff] %v7371_v60  ;;  %v1178_v13 = vmul.f32 %v6040_v39, %v1162_v56  ;;  %v5289_v31 = vpack.c.bf16 %v5658_v12, %v5657_v16 }
 0x3e0   : > { %5282 = vmatpush3.bf16.xpose.msk.msra.mxu1 %vm6739_vm1, %v5277_v11 }
 0x3e1   : > { %v1164_v63 = vsub.f32 2.0, %v1148_v2  ;;  %5285 = vmatprep.subr.msk.bf16.mxu1 %vm6739_vm1, %v5283_v20  ;;  %v7380_v24 = vmul.f32 %v7205_v4, %v1178_v13 }
 0x3e3   : > { %1210 = vst [vmem:[%s7325_s19 + $0x60] sm:$0xff] %v7380_v24  ;;  %v1180_v51 = vmul.f32 %v6042_v62, %v1164_v63 }
 0x3e5   : > { %v7385_v17 = vmul.f32 %v7208_v6, %v1180_v51  ;;  %v7395_v6 = vpop.permute.xlu1 %1361 }
 0x3e7   : > { %v1097_v55 = vpop.xlane.xlu0 %1096  ;;  %1212 = vst [vmem:[%s7325_s19 + $0x70] sm:$0xff] %v7385_v17 }
 0x3e8   : > { %6043 = vrcp.f32 %v1097_v55  ;;  %5288 = vmatpush3.bf16.xpose.msk.msra.mxu1 %vm6739_vm1, %v5283_v20 }
 0x3e9   : > { %5291 = vmatprep.subr.msk.bf16.mxu1 %vm6739_vm1, %v5289_v31  ;;  %v7397_v5 = vpop.permute.xlu1 %1365 }
 0x3eb   : > { %v1101_v4 = vpop.xlane.xlu0 %1100 }
 0x3ec   : > { %6045 = vrcp.f32 %v1101_v4 }
 0x3ed   : > { %v1370_v27 = vpop.permute.xlu1 %1369 }
 0x3ef   : > { %v1103_v57 = vpop.xlane.xlu0 %1102 }
 0x3f0   : > { %6047 = vrcp.f32 %v1103_v57  ;;  %5294 = vmatpush3.bf16.xpose.msk.msra.mxu1 %vm6739_vm1, %v5289_v31 }
 0x3f2   : > { %v6044_v14 = vpop.eup %6043 }
 0x3f3   : > { %v1139_v61 = vmul.f32 %v6044_v14, %v1097_v55  ;;  %v1113_v11 = vpop.xlane.xlu0 %1112 }
 0x3f4   : > { %6049 = vrcp.f32 %v1113_v11 }
 0x3f5   : > { %v1155_v48 = vsub.f32 2.0, %v1139_v61 }
 0x3f6   : > { %v6046_v43 = vpop.eup %6045 }
 0x3f7   : > { %v1141_v44 = vmul.f32 %v6046_v43, %v1101_v4  ;;  %v1117_v39 = vpop.xlane.xlu0 %1116  ;;  %v1171_v19 = vmul.f32 %v6044_v14, %v1155_v48  ;;  %v1374_v48 = vpop.permute.xlu1 %1373 }
 0x3f8   : > { %6051 = vrcp.f32 %v1117_v39 }
 0x3f9   : > { %v1157_v26 = vsub.f32 2.0, %v1141_v44  ;;  %v1187_v50 = vmul.f32 %v7218_v52, %v1171_v19 }
 0x3fa   : > { %v6048_v9 = vpop.eup %6047 }
 0x3fb   : > { %v1142_v56 = vmul.f32 %v6048_v9, %v1103_v57  ;;  %1203 = vst [vmem:[%s7325_s19 + $0x28] sm:$0xff] %v1187_v50  ;;  %4706 = vmatmul.mubr.f32.gmra.mrb[20].mxu1 %v1187_v50  ;;  %v5661_v62 = vpop.permute.xlu0 %5660  ;;  %v1173_v20 = vmul.f32 %v6046_v43, %v1157_v26 }
 0x3fc   : > { %v5663_v2 = vunpack.i.h.bf16 %v5661_v62  ;;  %v5662_v13 = vunpack.i.l.bf16 %v5661_v62  ;;  %4708 = vmatprep.mubr.f32.mxu1 %v7350_v34 }
 0x3fd   : > { %v1158_v63 = vsub.f32 2.0, %v1142_v56  ;;  %v1189_v12 = vmul.f32 %v7223_v10, %v1173_v20 }
 0x3fe   : > { %v6050_v16 = vpop.eup %6049  ;;  %v5295_v51 = vpack.c.bf16 %v5663_v2, %v5662_v13 }
 0x3ff   : > { %v1147_v31 = vmul.f32 %v6050_v16, %v1113_v11  ;;  %1205 = vst [vmem:[%s7325_s19 + $0x38] sm:$0xff] %v1189_v12  ;;  %4709 = vmatmul.mubr.f32.gmra.mrb[22].mxu1 %v1189_v12  ;;  %v5666_v52 = vpop.permute.xlu0 %5665  ;;  %v1174_v55 = vmul.f32 %v6048_v9, %v1158_v63 }
 0x400   : > { %v5668_v4 = vunpack.i.h.bf16 %v5666_v52  ;;  %v5667_v57 = vunpack.i.l.bf16 %v5666_v52  ;;  %5297 = vmatprep.subr.msk.bf16.mxu1 %vm6739_vm1, %v5295_v51 }
 0x401   : > { %v1163_v14 = vsub.f32 2.0, %v1147_v31  ;;  %5300 = vmatpush3.bf16.xpose.msk.msra.mxu1 %vm6739_vm1, %v5295_v51  ;;  %v1190_v10 = vmul.f32 %v7228_v41, %v1174_v55 }
 0x402   : > { %v6052_v34 = vpop.eup %6051  ;;  %v5301_v61 = vpack.c.bf16 %v5668_v4, %v5667_v57 }
 0x403   : > { %v1149_v11 = vmul.f32 %v6052_v34, %v1117_v39  ;;  %1206 = vst [vmem:[%s7325_s19 + $0x40] sm:$0xff] %v1190_v10  ;;  %4711 = vmatprep.mubr.f32.mxu1 %v1190_v10  ;;  %v1360_v43 = vpop.permute.xlu0 %1359  ;;  %v1179_v44 = vmul.f32 %v6050_v16, %v1163_v14  ;;  %v1378_v39 = vpop.permute.xlu1 %1377 }
 0x404   : > { %4712 = vmatmul.mubr.f32.gmra.mrb[24].mxu1 %v7357_v33  ;;  %5303 = vmatprep.subr.msk.bf16.mxu1 %vm6739_vm1, %v5301_v61 }
 0x405   : > { %v1165_v19 = vsub.f32 2.0, %v1149_v11  ;;  %4714 = vmatprep.mubr.f32.mxu1 %v7371_v60  ;;  %v1195_v26 = vmul.f32 %v7233_v36, %v1179_v44 }
 0x407   : > { %v1364_v41 = vpop.permute.xlu0 %1363  ;;  %1211 = vst [vmem:[%s7325_s19 + $0x68] sm:$0xff] %v1195_v26  ;;  %v1181_v50 = vmul.f32 %v6052_v34, %v1165_v19  ;;  %v1382_v60 = vpop.permute.xlu1 %1381 }
 0x408   : > { %4715 = vmatmul.mubr.f32.gmra.mrb[26].mxu1 %v7366_v47 }
 0x409   : > { %4717 = vmatprep.mubr.f32.mxu1 %v7380_v24  ;;  %5306 = vmatpush3.bf16.xpose.msk.msra.mxu1 %vm6739_vm1, %v5301_v61  ;;  %v1197_v33 = vmul.f32 %v7238_v54, %v1181_v50 }
 0x40b   : > { %v1368_v9 = vpop.permute.xlu0 %1367  ;;  %1213 = vst [vmem:[%s7325_s19 + $0x78] sm:$0xff] %v1197_v33  ;;  %v1386_v47 = vpop.permute.xlu1 %1385 }
 0x40c   : > { %4718 = vmatmul.mubr.f32.gmra.mrb[28].mxu1 %v1195_v26 }
 0x40d   : > { %4720 = vmatprep.mubr.f32.mxu1 %v7385_v17 }
 0x40f   : > { %v1372_v36 = vpop.permute.xlu0 %1371  ;;  %v1390_v54 = vpop.permute.xlu1 %1389 }
 0x410   : > { %4721 = vmatmul.mubr.f32.gmra.mrb[30].mxu1 %v1197_v33 }
 0x411   : > { %4755 = vmatprep.mubr.msk.f32.mxu1 %vm748_vm0, %v1360_v43 }
 0x413   : > { %v1376_v56 = vpop.permute.xlu0 %1375  ;;  %v5676_v20 = vpop.permute.xlu1 %5675 }
 0x414   : > { %4756 = vmatmul.mubr.msk.f32.vlgmr.msra.gmra.mrb[32].mxu1 %vm748_vm0, %v7395_v6  ;;  %v5678_v6 = vunpack.i.h.bf16 %v5676_v20  ;;  %v5677_v2 = vunpack.i.l.bf16 %v5676_v20 }
 0x415   : > { %4758 = vmatprep.mubr.msk.f32.mxu1 %vm748_vm0, %v1364_v41 }
 0x417   : > { %v1380_v24 = vpop.permute.xlu0 %1379  ;;  %v5686_v63 = vpop.permute.xlu1 %5685 }
 0x418   : > { %4759 = vmatmul.mubr.msk.f32.gmra.mrb[34].mxu1 %vm748_vm0, %v7397_v5  ;;  %v5688_v4 = vunpack.i.h.bf16 %v5686_v63  ;;  %v5687_v57 = vunpack.i.l.bf16 %v5686_v63 }
 0x419   : > { %4761 = vmatprep.mubr.msk.f32.mxu1 %vm748_vm0, %v1368_v9 }
 0x41a   : > { %v5319_v61 = vpack.c.bf16 %v5688_v4, %v5687_v57 }
 0x41b   : > { %v1384_v17 = vpop.permute.xlu0 %1383  ;;  %v5691_v55 = vpop.permute.xlu1 %5690 }
 0x41c   : > { %4762 = vmatmul.mubr.msk.f32.gmra.mrb[36].mxu1 %vm748_vm0, %v1370_v27  ;;  %v5311_v27 = vpack.c.bf16 %v5678_v6, %v5677_v2  ;;  %v5693_v10 = vunpack.i.h.bf16 %v5691_v55  ;;  %v5692_v34 = vunpack.i.l.bf16 %v5691_v55 }
 0x41d   : > { %4764 = vmatprep.mubr.msk.f32.mxu1 %vm748_vm0, %v1372_v36 }
 0x41e   : > { %v5323_v44 = vpack.c.bf16 %v5693_v10, %v5692_v34  ;;  %v8782_v34 = vld [vmem:[#allocation25_spill] sm:$0xff] }
 0x41f   : > { %v1388_v62 = vpop.permute.xlu0 %1387 }
 0x420   : > { %4765 = vmatmul.mubr.msk.f32.gmra.mrb[38].mxu1 %vm748_vm0, %v1374_v48  ;;  %v5696_v48 = vpop.permute.xlu1 %5695 }
 0x421   : > { %4767 = vmatprep.mubr.msk.f32.mxu1 %vm748_vm0, %v1376_v56  ;;  %v5698_v11 = vunpack.i.h.bf16 %v5696_v48  ;;  %v5697_v43 = vunpack.i.l.bf16 %v5696_v48 }
 0x423   : > { %v5671_v13 = vpop.permute.xlu0 %5670  ;;  %v5327_v50 = vpack.c.bf16 %v5698_v11, %v5697_v43 }
 0x424   : > { %v5673_v12 = vunpack.i.h.bf16 %v5671_v13  ;;  %v5672_v5 = vunpack.i.l.bf16 %v5671_v13  ;;  %4768 = vmatmul.mubr.msk.f32.gmra.mrb[40].mxu1 %vm748_vm0, %v1378_v39  ;;  %v5706_v39 = vpop.permute.xlu1 %5705 }
 0x425   : > { %4770 = vmatprep.mubr.msk.f32.mxu1 %vm748_vm0, %v1380_v24  ;;  %v5708_v33 = vunpack.i.h.bf16 %v5706_v39  ;;  %v5707_v9 = vunpack.i.l.bf16 %v5706_v39 }
 0x426   : > { %v5307_v16 = vpack.c.bf16 %v5673_v12, %v5672_v5 }
 0x427   : > { %v5681_v51 = vpop.permute.xlu0 %5680  ;;  %v5335_v56 = vpack.c.bf16 %v5708_v33, %v5707_v9 }
 0x428   : > { %v5683_v31 = vunpack.i.h.bf16 %v5681_v51  ;;  %v5682_v52 = vunpack.i.l.bf16 %v5681_v51  ;;  %4771 = vmatmul.mubr.msk.f32.gmra.mrb[42].mxu1 %vm748_vm0, %v1382_v60  ;;  %5308 = vmatprep.subr.bf16.mxu0 %v5307_v16 }
 0x429   : > { %4773 = vmatprep.mubr.msk.f32.mxu1 %vm748_vm0, %v1384_v17  ;;  %5310 = vmatpush3.bf16.msra.mxu0 %v5307_v16 }
 0x42a   : > { %5312 = vmatprep.subr.bf16.mxu0 %v5311_v27  ;;  %v5315_v14 = vpack.c.bf16 %v5683_v31, %v5682_v52 }
 0x42b   : > { %v5701_v19 = vpop.permute.xlu0 %5700 }
 0x42c   : > { %4774 = vmatmul.mubr.msk.f32.gmra.mrb[44].mxu1 %vm748_vm0, %v1386_v47  ;;  %v5703_v26 = vunpack.i.h.bf16 %v5701_v19  ;;  %v5702_v41 = vunpack.i.l.bf16 %v5701_v19 }
 0x42d   : > { %4776 = vmatprep.mubr.msk.f32.mxu1 %vm748_vm0, %v1388_v62  ;;  %5314 = vmatpush3.bf16.msra.mxu0 %v5311_v27 }
 0x42e   : > { %5316 = vmatprep.subr.bf16.mxu0 %v5315_v14  ;;  %v5331_v60 = vpack.c.bf16 %v5703_v26, %v5702_v41 }
 0x42f   : > { %v5711_v36 = vpop.permute.xlu0 %5710 }
 0x430   : > { %4777 = vmatmul.mubr.msk.f32.gmra.mrb[46].mxu1 %vm748_vm0, %v1390_v54  ;;  %v5713_v47 = vunpack.i.h.bf16 %v5711_v36  ;;  %v5712_v24 = vunpack.i.l.bf16 %v5711_v36 }
 0x431   : > { %5318 = vmatpush3.bf16.msra.mxu0 %v5315_v14 }
 0x432   : > { %5320 = vmatprep.subr.bf16.mxu0 %v5319_v61  ;;  %v7441_v54 = vpack.c.bf16 %v5713_v47, %v5712_v24 }
 0x435   : > { %5322 = vmatpush3.bf16.msra.mxu0 %v5319_v61 }
 0x436   : > { %5324 = vmatprep.subr.bf16.mxu0 %v5323_v44 }
 0x439   : > { %5326 = vmatpush3.bf16.msra.mxu0 %v5323_v44 }
 0x43a   : > { %5328 = vmatprep.subr.bf16.mxu0 %v5327_v50 }
 0x43d   : > { %5330 = vmatpush3.bf16.msra.mxu0 %v5327_v50 }
 0x43e   : > { %5332 = vmatprep.subr.bf16.mxu0 %v5331_v60 }
 0x441   : > { %5334 = vmatpush3.bf16.msra.mxu0 %v5331_v60 }
 0x442   : > { %5336 = vmatprep.subr.bf16.mxu0 %v5335_v56 }
 0x445   : > { %5338 = vmatpush3.bf16.msra.mxu0 %v5335_v56 }
 0x446   : > { %5341 = vmatprep.subr.msk.bf16.mxu0 %vm6739_vm1, %v7441_v54 }
 0x49a   : > { %v7446_v17 = vpop.f32.mrb[16].mxu1 }
 0x49b   : > { %8765 = vst [vmem:[#allocation21_spill] sm:$0xff] %v7446_v17  ;;  %v7448_v62 = vpop.f32.mrb[17].mxu1  ;;  %v8799_v17 = vld [vmem:[#allocation36_spill] sm:$0xff] }
 0x49c   : > { %8766 = vst [vmem:[#allocation40_spill] sm:$0xff] %v7448_v62  ;;  %v8797_v62 = vld [vmem:[#allocation34_spill] sm:$0xff] }
 0x49f   : > { %v7450_v20 = vpop.f32.mrb[18].mxu1 }
 0x4a0   : > { %8767 = vst [vmem:[#allocation23_spill] sm:$0xff] %v7450_v20  ;;  %v7452_v6 = vpop.f32.mrb[19].mxu1 }
 0x4a1   : > { %8768 = vst [vmem:[#allocation16_spill] sm:$0xff] %v7452_v6 }
 0x4ce   : > { %v7454_v2 = vpop.f32.mrb[20].mxu1 }
 0x4cf   : > { %8769 = vst [vmem:[#allocation46_spill] sm:$0xff] %v7454_v2  ;;  %v7456_v13 = vpop.f32.mrb[21].mxu1  ;;  %v8791_v2 = vld [vmem:[#allocation19_spill] sm:$0xff] }
 0x4d0   : > { %8770 = vst [vmem:[#allocation47_spill] sm:$0xff] %v7456_v13 }
 0x4d2   : > { %v7458_v63 = vpop.f32.mrb[22].mxu1 }
 0x4d3   : > { %8771 = vst [vmem:[#allocation48_spill] sm:$0xff] %v7458_v63  ;;  %v7460_v12 = vpop.f32.mrb[23].mxu1  ;;  %v8788_v63 = vld [vmem:[#allocation18_spill] sm:$0xff] }
 0x4d4   : > { %8772 = vst [vmem:[#allocation49_spill] sm:$0xff] %v7460_v12 }
 0x4d7   : > { %v7462_v5 = vpop.f32.mrb[24].mxu1 }
 0x4d8   : > { %8773 = vst [vmem:[#allocation50_spill] sm:$0xff] %v7462_v5  ;;  %v7464_v16 = vpop.f32.mrb[25].mxu1 }
 0x4d9   : > { %8774 = vst [vmem:[#allocation51_spill] sm:$0xff] %v7464_v16 }
 0x4db   : > { %v7466_v27 = vpop.f32.mrb[26].mxu1 }
 0x4dc   : > { %8775 = vst [vmem:[#allocation52_spill] sm:$0xff] %v7466_v27  ;;  %v7468_v51 = vpop.f32.mrb[27].mxu1 }
 0x4dd   : > { %8776 = vst [vmem:[#allocation53_spill] sm:$0xff] %v7468_v51 }
 0x4df   : > { %v7470_v31 = vpop.f32.mrb[28].mxu1 }
 0x4e0   : > { %8777 = vst [vmem:[#allocation54_spill] sm:$0xff] %v7470_v31  ;;  %v7472_v52 = vpop.f32.mrb[29].mxu1 }
 0x4e1   : > { %8778 = vst [vmem:[#allocation55_spill] sm:$0xff] %v7472_v52 }
 0x4e3   : > { %v7474_v55 = vpop.f32.mrb[30].mxu1 }
 0x4e4   : > { %8779 = vst [vmem:[#allocation56_spill] sm:$0xff] %v7474_v55  ;;  %v7476_v4 = vpop.f32.mrb[31].mxu1 }
 0x4e5   : > { %8780 = vst [vmem:[#allocation57_spill] sm:$0xff] %v7476_v4 }
 0x4e7   : > { %v4757_v57 = vpop.f32.mrb[32].mxu1 }
 0x4e8   : > { %v1553_v14 = vpop.f32.mrb[33].mxu1  ;;  %v1633_v61 = vsel %vm717_vm2, %v4757_v57, -1e+30 }
 0x4e9   : > { %1650 = vmax.xlane.f32.xlu1 %v1633_v61  ;;  %v1632_v11 = vsel %vm716_vm3, %v1553_v14, -1e+30 }
 0x4ea   : > { %1648 = vmax.xlane.f32.xlu0 %v1632_v11 }
 0x4eb   : > { %v4760_v43 = vpop.f32.mrb[34].mxu1 }
 0x4ec   : > { %v1563_v44 = vpop.f32.mrb[35].mxu1  ;;  %v1635_v20 = vsel %vm8694_vm4, %v4760_v43, -1e+30  ;;  %vm8798_vm4 = vcmp.ge.s32.totalorder %v8797_v62, %v8782_v34 }
 0x4ed   : > { %v1634_v5 = vsel %vm718_vm5, %v1563_v44, -1e+30 }
 0x4ef   : > { %v4763_v19 = vpop.f32.mrb[36].mxu1 }
 0x4f0   : > { %v1573_v26 = vpop.f32.mrb[37].mxu1  ;;  %v7487_v50 = vsel %vm721_vm7, %v4763_v19, -1e+30 }
 0x4f1   : > { %1658 = vmax.xlane.f32.xlu1 %v7487_v50 }
 0x4f3   : > { %v4766_v39 = vpop.f32.mrb[38].mxu1 }
 0x4f4   : > { %v1583_v33 = vpop.f32.mrb[39].mxu1  ;;  %v7493_v60 = vsel %vm723_vm9, %v4766_v39, -1e+30 }
 0x4f5   : > { %1662 = vmax.xlane.f32.xlu1 %v7493_v60  ;;  %v1638_v6 = vsel %vm722_vm8, %v1583_v33, -1e+30 }
 0x4f7   : > { %v4769_v36 = vpop.f32.mrb[40].mxu1 }
 0x4f8   : > { %v1593_v56 = vpop.f32.mrb[41].mxu1  ;;  %v7499_v24 = vsel %vm725_vm11, %v4769_v36, -1e+30 }
 0x4f9   : > { %1666 = vmax.xlane.f32.xlu1 %v7499_v24  ;;  %v1640_v43 = vsel %vm724_vm10, %v1593_v56, -1e+30 }
 0x4fb   : > { %v4772_v57 = vpop.f32.mrb[42].mxu1 }
 0x4fc   : > { %v1603_v14 = vpop.f32.mrb[43].mxu1  ;;  %v7505_v55 = vsel %vm727_vm13, %v4772_v57, -1e+30 }
 0x4fd   : > { %1670 = vmax.xlane.f32.xlu1 %v7505_v55  ;;  %v7542_v44 = vsel %vm8798_vm4, %v1603_v14, -1e+30 }
 0x4ff   : > { %v4775_v39 = vpop.f32.mrb[44].mxu1 }
 0x500   : > { %5715 = vrot.lane.b32.xlu0 %v8788_v63, %s6444_s18  ;;  %v1613_v4 = vpop.f32.mrb[45].mxu1  ;;  %v7513_v36 = vsel %vm729_vm15, %v4775_v39, -1e+30 }
 0x501   : > { %1674 = vmax.xlane.f32.xlu1 %v7513_v36 }
 0x503   : > { %v4778_v52 = vpop.f32.mrb[46].mxu1 }
 0x504   : > { %v1623_v13 = vpop.f32.mrb[47].mxu1  ;;  %v7519_v57 = vsel %vm731_vm14, %v4778_v52, -1e+30  ;;  %v1636_v52 = vsel %vm8695_vm6, %v1573_v26, -1e+30  ;;  %vm8800_vm6 = vcmp.ge.s32.totalorder %v8799_v17, %v8782_v34 }
 0x505   : > { %1678 = vmax.xlane.f32.xlu1 %v7519_v57  ;;  %v7548_v26 = vsel %vm8800_vm6, %v1613_v4, -1e+30  ;;  %v7554_v16 = vsel %vm730_vm12, %v1623_v13, -1e+30  ;;  %v8802_v13 = vld [vmem:[#allocation20_spill] sm:$0xff] }
 0x516   : > { %5720 = vrot.lane.b32.xlu1 %v8791_v2, %s6444_s18 }
 0x51f   : > { %1654 = vmax.xlane.f32.xlu0 %v1635_v20 }
 0x523   : > { %1652 = vmax.xlane.f32.xlu0 %v1634_v5 }
 0x527   : > { %1656 = vmax.xlane.f32.xlu0 %v1636_v52 }
 0x52b   : > { %1660 = vmax.xlane.f32.xlu0 %v1638_v6 }
 0x52f   : > { %1664 = vmax.xlane.f32.xlu0 %v1640_v43 }
 0x533   : > { %1668 = vmax.xlane.f32.xlu0 %v7542_v44 }
 0x537   : > { %1672 = vmax.xlane.f32.xlu0 %v7548_v26 }
 0x53b   : > { %1676 = vmax.xlane.f32.xlu0 %v7554_v16 }
 0x576   : > { %v1651_v56 = vpop.xlane.xlu1 %1650 }
 0x577   : > { %v1681_v62 = vsub.f32 %v1633_v61, %v1651_v56  ;;  %v1649_v14 = vpop.xlane.xlu0 %1648 }
 0x578   : > { %v1680_v51 = vsub.f32 %v1632_v11, %v1649_v14 }
 0x579   : > { %v1698_v39 = vmul.f32 1.442695, %v1681_v62 }
 0x57a   : > { %v1696_v27 = vmul.f32 1.442695, %v1680_v51 }
 0x57b   : > { %6053 = vpow2.f32 %v1698_v39  ;;  %v7565_v2 = vpop.permute.xlu0 %5715 }
 0x57c   : > { %6055 = vpow2.f32 %v1696_v27 }
 0x57e   : > { %v1659_v33 = vpop.xlane.xlu1 %1658 }
 0x57f   : > { %v1685_v27 = vsub.f32 %v7487_v50, %v1659_v33 }
 0x581   : > { %v1706_v63 = vmul.f32 1.442695, %v1685_v27 }
 0x582   : > { %v1663_v61 = vpop.xlane.xlu1 %1662 }
 0x583   : > { %v1687_v12 = vsub.f32 %v7493_v60, %v1663_v61 }
 0x585   : > { %v7557_v17 = vpop.eup %6053 }
 0x586   : > { %v7559_v4 = vpop.eup %6055  ;;  %1730 = vadd.xlane.f32.xlu0 %v7557_v17  ;;  %v1667_v51 = vpop.xlane.xlu1 %1666 }
 0x587   : > { %1728 = vadd.xlane.f32.xlu1 %v7559_v4 }
 0x58a   : > { %v1671_v47 = vpop.xlane.xlu1 %1670 }
 0x59c   : > { %5725 = vrot.lane.b32.xlu0 %v8802_v13, %s6444_s18  ;;  %v1689_v13 = vsub.f32 %v7499_v24, %v1667_v51 }
 0x59e   : > { %v1714_v50 = vmul.f32 1.442695, %v1689_v13 }
 0x5ac   : > { %v1655_v11 = vpop.xlane.xlu0 %1654 }
 0x5ad   : > { %v1683_v62 = vsub.f32 %v1635_v20, %v1655_v11  ;;  %v1710_v20 = vmul.f32 1.442695, %v1687_v12  ;;  %v1691_v11 = vsub.f32 %v7505_v55, %v1671_v47 }
 0x5af   : > { %v1702_v39 = vmul.f32 1.442695, %v1683_v62 }
 0x5b0   : > { %v1653_v56 = vpop.xlane.xlu0 %1652 }
 0x5b1   : > { %6057 = vpow2.f32 %v1702_v39  ;;  %v1682_v14 = vsub.f32 %v1634_v5, %v1653_v56  ;;  %v1718_v39 = vmul.f32 1.442695, %v1691_v11 }
 0x5b3   : > { %v1700_v31 = vmul.f32 1.442695, %v1682_v14 }
 0x5b4   : > { %v1657_v19 = vpop.xlane.xlu0 %1656 }
 0x5b5   : > { %6059 = vpow2.f32 %v1700_v31  ;;  %v1684_v9 = vsub.f32 %v1636_v52, %v1657_v19 }
 0x5b6   : > { %6061 = vpow2.f32 %v1706_v63  ;;  %v1675_v63 = vpop.xlane.xlu1 %1674 }
 0x5b7   : > { %v1704_v41 = vmul.f32 1.442695, %v1684_v9 }
 0x5b8   : > { %v1661_v62 = vpop.xlane.xlu0 %1660 }
 0x5b9   : > { %6063 = vpow2.f32 %v1704_v41  ;;  %v1686_v33 = vsub.f32 %v1638_v6, %v1661_v62 }
 0x5ba   : > { %6065 = vpow2.f32 %v1710_v20  ;;  %v1679_v51 = vpop.xlane.xlu1 %1678 }
 0x5bb   : > { %v7571_v5 = vpop.eup %6057  ;;  %6067 = vpow2.f32 %v1714_v50  ;;  %v1708_v24 = vmul.f32 1.442695, %v1686_v33  ;;  %v1695_v14 = vsub.f32 %v7519_v57, %v1679_v51  ;;  %v8804_v51 = vld [vmem:[#allocation43_spill] sm:$0xff] }
 0x5bc   : > { %v1665_v60 = vpop.xlane.xlu0 %1664  ;;  %1734 = vadd.xlane.f32.xlu0 %v7571_v5  ;;  %6069 = vpow2.f32 %v1718_v39 }
 0x5bd   : > { %v1688_v31 = vsub.f32 %v1640_v43, %v1665_v60  ;;  %6071 = vpow2.f32 %v1708_v24  ;;  %v1693_v43 = vsub.f32 %v7513_v36, %v1675_v63 }
 0x5bf   : > { %v7574_v19 = vpop.eup %6059  ;;  %v1712_v55 = vmul.f32 1.442695, %v1688_v31  ;;  %v1722_v56 = vmul.f32 1.442695, %v1693_v43  ;;  %v5721_v31 = vpop.permute.xlu1 %5720 }
 0x5c0   : > { %v1669_v12 = vpop.xlane.xlu0 %1668  ;;  %1732 = vadd.xlane.f32.xlu1 %v7574_v19  ;;  %v7578_v41 = vpop.eup %6061 }
 0x5c1   : > { %v1690_v6 = vsub.f32 %v7542_v44, %v1669_v12  ;;  %6073 = vpow2.f32 %v1712_v55 }
 0x5c3   : > { %v7580_v9 = vpop.eup %6063  ;;  %v1716_v47 = vmul.f32 1.442695, %v1690_v6  ;;  %v8803_v6 = vld [vmem:[#allocation22_spill] sm:$0xff] }
 0x5c4   : > { %v1673_v52 = vpop.xlane.xlu0 %1672  ;;  %1738 = vadd.xlane.f32.xlu1 %v7578_v41  ;;  %1736 = vadd.xlane.f32.xlu0 %v7580_v9  ;;  %v7586_v61 = vpop.eup %6065 }
 0x5c5   : > { %v1692_v13 = vsub.f32 %v7548_v26, %v1673_v52  ;;  %v7588_v27 = vpop.eup %6067  ;;  %6075 = vpow2.f32 %v1716_v47  ;;  %v1726_v26 = vmul.f32 1.442695, %v1695_v14 }
 0x5c6   : > { %v7593_v20 = vpop.eup %6069 }
 0x5c7   : > { %v1720_v44 = vmul.f32 1.442695, %v1692_v13  ;;  %v7595_v11 = vpop.eup %6071 }
 0x5c8   : > { %1742 = vadd.xlane.f32.xlu1 %v7586_v61  ;;  %1746 = vadd.xlane.f32.xlu0 %v7588_v27  ;;  %v1677_v36 = vpop.xlane.xlu0 %1676 }
 0x5c9   : > { %6077 = vpow2.f32 %v1720_v44  ;;  %v1694_v62 = vsub.f32 %v7554_v16, %v1677_v36 }
 0x5ca   : > { %6079 = vpow2.f32 %v1722_v56  ;;  %v8805_v56 = vld [vmem:[#allocation17_spill] sm:$0xff] }
 0x5cb   : > { %v7600_v50 = vpop.eup %6073  ;;  %6081 = vpow2.f32 %v1726_v26  ;;  %v1724_v57 = vmul.f32 1.442695, %v1694_v62  ;;  %v5718_v26 = vunpack.i.h.bf16 %v7565_v2  ;;  %v5717_v62 = vunpack.i.l.bf16 %v7565_v2 }
 0x5cc   : > { %1740 = vadd.xlane.f32.xlu1 %v7595_v11  ;;  %1750 = vadd.xlane.f32.xlu0 %v7593_v20  ;;  %v5723_v2 = vunpack.i.h.bf16 %v5721_v31 }
 0x5cd   : > { %6083 = vpow2.f32 %v1724_v57 }
 0x5cf   : > { %v7603_v33 = vpop.eup %6075 }
 0x5d0   : > { %1744 = vadd.xlane.f32.xlu1 %v7600_v50 }
 0x5d3   : > { %v7605_v39 = vpop.eup %6077 }
 0x5d4   : > { %1748 = vadd.xlane.f32.xlu1 %v7603_v33  ;;  %1752 = vadd.xlane.f32.xlu0 %v7605_v39  ;;  %v7609_v60 = vpop.eup %6079 }
 0x5d5   : > { %v7612_v16 = vpop.eup %6081 }
 0x5d7   : > { %v7615_v24 = vpop.eup %6083 }
 0x5d8   : > { %1754 = vadd.xlane.f32.xlu1 %v7609_v60 }
 0x5dc   : > { %1758 = vadd.xlane.f32.xlu1 %v7612_v16 }
 0x5e0   : > { %1756 = vadd.xlane.f32.xlu1 %v7615_v24 }
 0x5ea   : > { %5735 = vrot.lane.b32.xlu0 %v6882_v42, %s6444_s18 }
 0x5ee   : > { %5740 = vrot.lane.b32.xlu0 %v6892_v1, %s6444_s18 }
 0x5f1   : > { %5730 = vrot.lane.b32.xlu1 %v6854_v7, %s6444_s18 }
 0x5f2   : > { %5745 = vrot.lane.b32.xlu0 %v6902_v22, %s6444_s18 }
 0x5f5   : > { %2068 = vrot.lane.b32.xlu1 %v6909_v28, %s6444_s18 }
 0x5f6   : > { %2066 = vrot.lane.b32.xlu0 %v6728_v35, %s6444_s18 }
 0x5f9   : > { %2072 = vrot.lane.b32.xlu1 %v6919_v30, %s6444_s18 }
 0x5fa   : > { %2070 = vrot.lane.b32.xlu0 %v6912_v29, %s6444_s18 }
 0x5fd   : > { %2076 = vrot.lane.b32.xlu1 %v6929_v37, %s6444_s18 }
 0x5fe   : > { %2074 = vrot.lane.b32.xlu0 %v6922_v0, %s6444_s18 }
 0x601   : > { %2080 = vrot.lane.b32.xlu1 %v6939_v49, %s6444_s18 }
 0x602   : > { %2078 = vrot.lane.b32.xlu0 %v6932_v45, %s6444_s18 }
 0x605   : > { %2084 = vrot.lane.b32.xlu1 %v6949_v3, %s6444_s18 }
 0x606   : > { %2082 = vrot.lane.b32.xlu0 %v6942_v58, %s6444_s18 }
 0x609   : > { %2088 = vrot.lane.b32.xlu1 %v6958_v23, %s6444_s18 }
 0x60a   : > { %2086 = vrot.lane.b32.xlu0 %v6952_v15, %s6444_s18 }
 0x60d   : > { %2092 = vrot.lane.b32.xlu1 %v6966_v53, %s6444_s18 }
 0x60e   : > { %2090 = vrot.lane.b32.xlu0 %v6960_v40, %s6444_s18 }
 0x611   : > { %2096 = vrot.lane.b32.xlu1 %v6974_v21, %s6444_s18 }
 0x612   : > { %2094 = vrot.lane.b32.xlu0 %v6968_v8, %s6444_s18 }
 0x613   : > { %v1731_v63 = vpop.xlane.xlu0 %1730 }
 0x614   : > { %6085 = vrcp.f32 %v1731_v63  ;;  %v1729_v12 = vpop.xlane.xlu1 %1728 }
 0x615   : > { %6087 = vrcp.f32 %v1729_v12  ;;  %5755 = vrot.lane.b32.xlu1 %v7251_v38, %s6444_s18 }
 0x616   : > { %5750 = vrot.lane.b32.xlu0 %v7301_v25, %s6444_s18 }
 0x619   : > { %5765 = vrot.lane.b32.xlu1 %v7257_v46, %s6444_s18 }
 0x61a   : > { %5760 = vrot.lane.b32.xlu0 %v7307_v32, %s6444_s18 }
 0x61d   : > { %5770 = vrot.lane.b32.xlu1 %v7263_v18, %s6444_s18 }
 0x61e   : > { %v6086_v55 = vpop.eup %6085  ;;  %5780 = vrot.lane.b32.xlu0 %v8803_v6, %s6444_s18 }
 0x61f   : > { %v6088_v47 = vpop.eup %6087  ;;  %v1777_v52 = vmul.f32 %v6086_v55, %v1731_v63  ;;  %v8806_v63 = vld [vmem:[#allocation44_spill] sm:$0xff] }
 0x620   : > { %v1776_v43 = vmul.f32 %v6088_v47, %v1729_v12 }
 0x621   : > { %v1793_v13 = vsub.f32 2.0, %v1777_v52  ;;  %5775 = vrot.lane.b32.xlu1 %v8804_v51, %s6444_s18  ;;  %v5345_v52 = vpack.c.bf16 %v5718_v26, %v5717_v62 }
 0x622   : > { %v1792_v44 = vsub.f32 2.0, %v1776_v43  ;;  %5790 = vrot.lane.b32.xlu0 %v8805_v56, %s6445_s30 }
 0x623   : > { %v1809_v14 = vmul.f32 %v6086_v55, %v1793_v13  ;;  %v5722_v55 = vunpack.i.l.bf16 %v5721_v31 }
 0x624   : > { %v1808_v36 = vmul.f32 %v6088_v47, %v1792_v44  ;;  %v5726_v47 = vpop.permute.xlu0 %5725 }
 0x625   : > { %v1825_v57 = vmul.f32 %v7557_v17, %v1809_v14  ;;  %5785 = vrot.lane.b32.xlu1 %v8806_v63, %s6444_s18  ;;  %v5351_v17 = vpack.c.bf16 %v5723_v2, %v5722_v55  ;;  %v5727_v43 = vunpack.i.l.bf16 %v5726_v47 }
 0x626   : > { %v1824_v12 = vmul.f32 %v7559_v4, %v1808_v36  ;;  %v5728_v4 = vunpack.i.h.bf16 %v5726_v47 }
 0x627   : > { %4112 = vst [vmem:[%s7325_s19 + $0x88] sm:$0xff] %v1825_v57 }
 0x628   : > { %4111 = vst [vmem:[%s7325_s19 + $0x80] sm:$0xff] %v1824_v12  ;;  %4811 = vmatprep.mubr.f32.mxu0 %v1824_v12  ;;  %v5357_v13 = vpack.c.bf16 %v5728_v4, %v5727_v43 }
 0x629   : > { %4812 = vmatmul.mubr.f32.vlgmr.msra.gmra.mrb[48].mxu0 %v1825_v57 }
 0x62a   : > { %5344 = vmatpush3.bf16.xpose.msk.msra.mxu0 %vm6739_vm1, %v7441_v54 }
 0x62b   : > { %5347 = vmatprep.subr.msk.bf16.mxu0 %vm6739_vm1, %v5345_v52 }
 0x632   : > { %5350 = vmatpush3.bf16.xpose.msk.msra.mxu0 %vm6739_vm1, %v5345_v52 }
 0x633   : > { %5353 = vmatprep.subr.msk.bf16.mxu0 %vm6739_vm1, %v5351_v17 }
 0x63a   : > { %5356 = vmatpush3.bf16.xpose.msk.msra.mxu0 %vm6739_vm1, %v5351_v17 }
 0x63b   : > { %5359 = vmatprep.subr.msk.bf16.mxu0 %vm6739_vm1, %v5357_v13 }
 0x642   : > { %5362 = vmatpush3.bf16.xpose.msk.msra.mxu0 %vm6739_vm1, %v5357_v13 }
 0x649   : > { %v1735_v54 = vpop.xlane.xlu0 %1734 }
 0x64a   : > { %6089 = vrcp.f32 %v1735_v54 }
 0x64d   : > { %v1733_v31 = vpop.xlane.xlu1 %1732 }
 0x64e   : > { %6091 = vrcp.f32 %v1733_v31 }
 0x651   : > { %v1739_v44 = vpop.xlane.xlu1 %1738  ;;  %v1737_v56 = vpop.xlane.xlu0 %1736 }
 0x652   : > { %6093 = vrcp.f32 %v1739_v44 }
 0x653   : > { %6095 = vrcp.f32 %v1737_v56 }
 0x654   : > { %v6090_v14 = vpop.eup %6089 }
 0x655   : > { %v1779_v36 = vmul.f32 %v6090_v14, %v1735_v54  ;;  %v1743_v26 = vpop.xlane.xlu1 %1742  ;;  %v1747_v62 = vpop.xlane.xlu0 %1746 }
 0x656   : > { %6097 = vrcp.f32 %v1743_v26 }
 0x657   : > { %v1795_v57 = vsub.f32 2.0, %v1779_v36  ;;  %6099 = vrcp.f32 %v1747_v62 }
 0x658   : > { %v6092_v12 = vpop.eup %6091 }
 0x659   : > { %v1778_v52 = vmul.f32 %v6092_v12, %v1733_v31  ;;  %v1741_v2 = vpop.xlane.xlu1 %1740  ;;  %v1751_v55 = vpop.xlane.xlu0 %1750  ;;  %v1811_v17 = vmul.f32 %v6090_v14, %v1795_v57 }
 0x65a   : > { %6101 = vrcp.f32 %v1741_v2 }
 0x65b   : > { %v1794_v47 = vsub.f32 2.0, %v1778_v52  ;;  %6103 = vrcp.f32 %v1751_v55  ;;  %v1827_v4 = vmul.f32 %v7571_v5, %v1811_v17 }
 0x65c   : > { %v6094_v43 = vpop.eup %6093 }
 0x65d   : > { %v6096_v13 = vpop.eup %6095  ;;  %v1781_v54 = vmul.f32 %v6094_v43, %v1739_v44  ;;  %v1745_v63 = vpop.xlane.xlu1 %1744  ;;  %v1810_v6 = vmul.f32 %v6092_v12, %v1794_v47  ;;  %4114 = vst [vmem:[%s7325_s19 + $0x98] sm:$0xff] %v1827_v4 }
 0x65e   : > { %v1780_v36 = vmul.f32 %v6096_v13, %v1737_v56  ;;  %6105 = vrcp.f32 %v1745_v63 }
 0x65f   : > { %v1797_v51 = vsub.f32 2.0, %v1781_v54  ;;  %v1826_v31 = vmul.f32 %v7574_v19, %v1810_v6 }
 0x660   : > { %v6098_v46 = vpop.eup %6097  ;;  %v1796_v18 = vsub.f32 2.0, %v1780_v36 }
 0x661   : > { %v6100_v14 = vpop.eup %6099  ;;  %v1783_v57 = vmul.f32 %v6098_v46, %v1743_v26  ;;  %v1749_v52 = vpop.xlane.xlu1 %1748  ;;  %4113 = vst [vmem:[%s7325_s19 + $0x90] sm:$0xff] %v1826_v31  ;;  %4814 = vmatprep.mubr.f32.mxu0 %v1826_v31  ;;  %v1813_v17 = vmul.f32 %v6094_v43, %v1797_v51 }
 0x662   : > { %v1753_v5 = vpop.xlane.xlu0 %1752  ;;  %v1785_v32 = vmul.f32 %v6100_v14, %v1747_v62  ;;  %6107 = vrcp.f32 %v1749_v52  ;;  %4815 = vmatmul.mubr.f32.gmra.mrb[50].mxu0 %v1827_v4  ;;  %v1812_v44 = vmul.f32 %v6096_v13, %v1796_v18 }
 0x663   : > { %v1799_v56 = vsub.f32 2.0, %v1783_v57  ;;  %6109 = vrcp.f32 %v1753_v5  ;;  %v1829_v12 = vmul.f32 %v7578_v41, %v1813_v17 }
 0x664   : > { %v6102_v19 = vpop.eup %6101  ;;  %v1801_v6 = vsub.f32 2.0, %v1785_v32  ;;  %v1828_v47 = vmul.f32 %v7580_v9, %v1812_v44 }
 0x665   : > { %v6104_v26 = vpop.eup %6103  ;;  %v1782_v54 = vmul.f32 %v6102_v19, %v1741_v2  ;;  %v1755_v36 = vpop.xlane.xlu1 %1754  ;;  %4116 = vst [vmem:[%s7325_s19 + $0xa8] sm:$0xff] %v1829_v12  ;;  %v1815_v51 = vmul.f32 %v6098_v46, %v1799_v56 }
 0x666   : > { %v7703_v31 = vpop.permute.xlu0 %5735  ;;  %v1787_v62 = vmul.f32 %v6104_v26, %v1751_v55  ;;  %6111 = vrcp.f32 %v1755_v36  ;;  %4115 = vst [vmem:[%s7325_s19 + $0xa0] sm:$0xff] %v1828_v47  ;;  %4817 = vmatprep.mubr.f32.mxu0 %v1828_v47  ;;  %v1817_v32 = vmul.f32 %v6100_v14, %v1801_v6 }
 0x667   : > { %v1798_v18 = vsub.f32 2.0, %v1782_v54  ;;  %4818 = vmatmul.mubr.f32.gmra.mrb[52].mxu0 %v1829_v12  ;;  %v1831_v41 = vmul.f32 %v7586_v61, %v1815_v51 }
 0x668   : > { %v6106_v4 = vpop.eup %6105  ;;  %v1803_v9 = vsub.f32 2.0, %v1787_v62  ;;  %v1833_v46 = vmul.f32 %v7588_v27, %v1817_v32  ;;  %v5737_v32 = vunpack.i.l.bf16 %v7703_v31 }
 0x669   : > { %v1784_v43 = vmul.f32 %v6106_v4, %v1745_v63  ;;  %v1759_v2 = vpop.xlane.xlu1 %1758  ;;  %v1814_v57 = vmul.f32 %v6102_v19, %v1798_v18  ;;  %4118 = vst [vmem:[%s7325_s19 + $0xb8] sm:$0xff] %v1831_v41 }
 0x66a   : > { %v7708_v13 = vpop.permute.xlu0 %5740  ;;  %6113 = vrcp.f32 %v1759_v2  ;;  %v1819_v55 = vmul.f32 %v6104_v26, %v1803_v9  ;;  %4120 = vst [vmem:[%s7325_s19 + $0xc8] sm:$0xff] %v1833_v46 }
 0x66b   : > { %v1800_v17 = vsub.f32 2.0, %v1784_v43  ;;  %v1830_v44 = vmul.f32 %v7595_v11, %v1814_v57 }
 0x66c   : > { %v6108_v61 = vpop.eup %6107  ;;  %v1835_v14 = vmul.f32 %v7593_v20, %v1819_v55  ;;  %v5738_v20 = vunpack.i.h.bf16 %v7703_v31 }
 0x66d   : > { %v6110_v56 = vpop.eup %6109  ;;  %v1786_v63 = vmul.f32 %v6108_v61, %v1749_v52  ;;  %v1757_v12 = vpop.xlane.xlu1 %1756  ;;  %4117 = vst [vmem:[%s7325_s19 + $0xb0] sm:$0xff] %v1830_v44  ;;  %4820 = vmatprep.mubr.f32.mxu0 %v1830_v44  ;;  %v1816_v6 = vmul.f32 %v6106_v4, %v1800_v17 }
 0x66e   : > { %v7716_v19 = vpop.permute.xlu0 %5745  ;;  %v1788_v27 = vmul.f32 %v6110_v56, %v1753_v5  ;;  %6115 = vrcp.f32 %v1757_v12  ;;  %4821 = vmatmul.mubr.f32.gmra.mrb[54].mxu0 %v1831_v41  ;;  %4122 = vst [vmem:[%s7325_s19 + $0xd8] sm:$0xff] %v1835_v14  ;;  %v5369_v31 = vpack.c.bf16 %v5738_v20, %v5737_v32 }
 0x66f   : > { %v1802_v47 = vsub.f32 2.0, %v1786_v63  ;;  %v1832_v11 = vmul.f32 %v7600_v50, %v1816_v6  ;;  %v5743_v6 = vunpack.i.h.bf16 %v7708_v13 }
 0x670   : > { %v6112_v26 = vpop.eup %6111  ;;  %v1804_v54 = vsub.f32 2.0, %v1788_v27  ;;  %v5742_v27 = vunpack.i.l.bf16 %v7708_v13 }
 0x671   : > { %v1789_v51 = vmul.f32 %v6112_v26, %v1755_v36  ;;  %v5731_v52 = vpop.permute.xlu1 %5730  ;;  %4119 = vst [vmem:[%s7325_s19 + $0xc0] sm:$0xff] %v1832_v11  ;;  %4823 = vmatprep.mubr.f32.mxu0 %v1832_v11  ;;  %v1818_v18 = vmul.f32 %v6108_v61, %v1802_v47 }
 0x672   : > { %v2067_v62 = vpop.permute.xlu0 %2066  ;;  %v5733_v5 = vunpack.i.h.bf16 %v5731_v52  ;;  %v5732_v4 = vunpack.i.l.bf16 %v5731_v52  ;;  %4824 = vmatmul.mubr.f32.gmra.mrb[56].mxu0 %v1833_v46  ;;  %v1820_v41 = vmul.f32 %v6110_v56, %v1804_v54  ;;  %v5748_v52 = vunpack.i.h.bf16 %v7716_v19 }
 0x673   : > { %v1805_v9 = vsub.f32 2.0, %v1789_v51  ;;  %v1834_v50 = vmul.f32 %v7603_v33, %v1818_v18  ;;  %v5375_v51 = vpack.c.bf16 %v5743_v6, %v5742_v27 }
 0x674   : > { %v6114_v43 = vpop.eup %6113  ;;  %v5363_v36 = vpack.c.bf16 %v5733_v5, %v5732_v4  ;;  %v1836_v57 = vmul.f32 %v7605_v39, %v1820_v41 }
 0x675   : > { %v1791_v55 = vmul.f32 %v6114_v43, %v1759_v2  ;;  %v2069_v17 = vpop.permute.xlu1 %2068  ;;  %4121 = vst [vmem:[%s7325_s19 + $0xd0] sm:$0xff] %v1834_v50  ;;  %4826 = vmatprep.mubr.f32.mxu0 %v1834_v50  ;;  %v1821_v61 = vmul.f32 %v6112_v26, %v1805_v9 }
 0x676   : > { %v2071_v44 = vpop.permute.xlu0 %2070  ;;  %4827 = vmatmul.mubr.f32.gmra.mrb[58].mxu0 %v1835_v14  ;;  %5365 = vmatprep.subr.msk.bf16.mxu0 %vm6739_vm1, %v5363_v36  ;;  %4123 = vst [vmem:[%s7325_s19 + $0xe0] sm:$0xff] %v1836_v57 }
 0x677   : > { %v1807_v46 = vsub.f32 2.0, %v1791_v55  ;;  %4829 = vmatprep.mubr.f32.mxu0 %v1836_v57  ;;  %5368 = vmatpush3.bf16.xpose.msk.msra.mxu0 %vm6739_vm1, %v5363_v36  ;;  %v1837_v33 = vmul.f32 %v7609_v60, %v1821_v61 }
 0x678   : > { %v6116_v39 = vpop.eup %6115  ;;  %5371 = vmatprep.subr.msk.bf16.mxu0 %vm6739_vm1, %v5369_v31 }
 0x679   : > { %v1790_v2 = vmul.f32 %v6116_v39, %v1757_v12  ;;  %v2073_v56 = vpop.permute.xlu1 %2072  ;;  %4124 = vst [vmem:[%s7325_s19 + $0xe8] sm:$0xff] %v1837_v33  ;;  %v1823_v14 = vmul.f32 %v6114_v43, %v1807_v46 }
 0x67a   : > { %v2075_v63 = vpop.permute.xlu0 %2074  ;;  %4830 = vmatmul.mubr.f32.gmra.mrb[60].mxu0 %v1837_v33 }
 0x67b   : > { %v1806_v47 = vsub.f32 2.0, %v1790_v2  ;;  %v1839_v11 = vmul.f32 %v7612_v16, %v1823_v14  ;;  %v5747_v16 = vunpack.i.l.bf16 %v7716_v19 }
 0x67d   : > { %v2077_v60 = vpop.permute.xlu1 %2076  ;;  %v1822_v54 = vmul.f32 %v6116_v39, %v1806_v47  ;;  %4126 = vst [vmem:[%s7325_s19 + $0xf8] sm:$0xff] %v1839_v11  ;;  %v5381_v5 = vpack.c.bf16 %v5748_v52, %v5747_v16 }
 0x67e   : > { %v2079_v26 = vpop.permute.xlu0 %2078 }
 0x67f   : > { %5374 = vmatpush3.bf16.xpose.msk.msra.mxu0 %vm6739_vm1, %v5369_v31  ;;  %v1838_v12 = vmul.f32 %v7615_v24, %v1822_v54 }
 0x680   : > { %5377 = vmatprep.subr.msk.bf16.mxu0 %vm6739_vm1, %v5375_v51 }
 0x681   : > { %v2081_v20 = vpop.permute.xlu1 %2080  ;;  %4125 = vst [vmem:[%s7325_s19 + $0xf0] sm:$0xff] %v1838_v12  ;;  %4832 = vmatprep.mubr.f32.mxu0 %v1838_v12 }
 0x682   : > { %v2083_v13 = vpop.permute.xlu0 %2082  ;;  %4833 = vmatmul.mubr.f32.gmra.mrb[62].mxu0 %v1839_v11 }
 0x683   : > { %4867 = vmatprep.mubr.msk.f32.mxu0 %vm748_vm0, %v2067_v62 }
 0x685   : > { %v2085_v18 = vpop.permute.xlu1 %2084 }
 0x686   : > { %v2087_v32 = vpop.permute.xlu0 %2086 }
 0x687   : > { %5380 = vmatpush3.bf16.xpose.msk.msra.mxu0 %vm6739_vm1, %v5375_v51 }
 0x688   : > { %5383 = vmatprep.subr.msk.bf16.mxu0 %vm6739_vm1, %v5381_v5 }
 0x689   : > { %v2089_v24 = vpop.permute.xlu1 %2088 }
 0x68a   : > { %v2091_v4 = vpop.permute.xlu0 %2090 }
 0x68d   : > { %v7752_v41 = vpop.permute.xlu1 %2092 }
 0x68e   : > { %v7754_v9 = vpop.permute.xlu0 %2094 }
 0x68f   : > { %5386 = vmatpush3.bf16.xpose.msk.msra.mxu0 %vm6739_vm1, %v5381_v5 }
 0x691   : > { %v7758_v19 = vpop.permute.xlu1 %2096 }
 0x692   : > { %v5751_v62 = vpop.permute.xlu0 %5750 }
 0x693   : > { %v5753_v50 = vunpack.i.h.bf16 %v5751_v62  ;;  %v5752_v43 = vunpack.i.l.bf16 %v5751_v62 }
 0x695   : > { %v5387_v36 = vpack.c.bf16 %v5753_v50, %v5752_v43  ;;  %v5756_v57 = vpop.permute.xlu1 %5755 }
 0x696   : > { %v5761_v55 = vpop.permute.xlu0 %5760  ;;  %v5758_v61 = vunpack.i.h.bf16 %v5756_v57  ;;  %v5757_v31 = vunpack.i.l.bf16 %v5756_v57  ;;  %4868 = vmatmul.mubr.msk.f32.vlgmr.msra.gmra.mrb[64].mxu0 %vm748_vm0, %v2069_v17 }
 0x697   : > { %v5763_v46 = vunpack.i.h.bf16 %v5761_v55  ;;  %v5762_v33 = vunpack.i.l.bf16 %v5761_v55  ;;  %5388 = vmatprep.subr.bf16.mxu1 %v5387_v36  ;;  %4870 = vmatprep.mubr.msk.f32.mxu0 %vm748_vm0, %v2071_v44 }
 0x698   : > { %5390 = vmatpush3.bf16.msra.mxu1 %v5387_v36  ;;  %v5391_v39 = vpack.c.bf16 %v5758_v61, %v5757_v31 }
 0x699   : > { %v5766_v2 = vpop.permute.xlu1 %5765  ;;  %v5395_v27 = vpack.c.bf16 %v5763_v46, %v5762_v33 }
 0x69a   : > { %v5768_v14 = vunpack.i.h.bf16 %v5766_v2  ;;  %v5767_v6 = vunpack.i.l.bf16 %v5766_v2  ;;  %4871 = vmatmul.mubr.msk.f32.gmra.mrb[66].mxu0 %vm748_vm0, %v2073_v56  ;;  %5392 = vmatprep.subr.bf16.mxu1 %v5391_v39  ;;  %v5781_v52 = vpop.permute.xlu0 %5780 }
 0x69b   : > { %4873 = vmatprep.mubr.msk.f32.mxu0 %vm748_vm0, %v2075_v63  ;;  %v5783_v63 = vunpack.i.h.bf16 %v5781_v52  ;;  %v5782_v16 = vunpack.i.l.bf16 %v5781_v52 }
 0x69c   : > { %5394 = vmatpush3.bf16.msra.mxu1 %v5391_v39  ;;  %v5399_v17 = vpack.c.bf16 %v5768_v14, %v5767_v6 }
 0x69d   : > { %5396 = vmatprep.subr.bf16.mxu1 %v5395_v27  ;;  %v5771_v47 = vpop.permute.xlu1 %5770 }
 0x69e   : > { %v5773_v11 = vunpack.i.h.bf16 %v5771_v47  ;;  %v5772_v54 = vunpack.i.l.bf16 %v5771_v47  ;;  %4874 = vmatmul.mubr.msk.f32.gmra.mrb[68].mxu0 %vm748_vm0, %v2077_v60  ;;  %v5791_v50 = vpop.permute.xlu0 %5790 }
 0x69f   : > { %4876 = vmatprep.mubr.msk.f32.mxu0 %vm748_vm0, %v2079_v26  ;;  %v5792_v43 = vunpack.i.l.bf16 %v5791_v50 }
 0x6a0   : > { %5398 = vmatpush3.bf16.msra.mxu1 %v5395_v27  ;;  %v5403_v56 = vpack.c.bf16 %v5773_v11, %v5772_v54 }
 0x6a1   : > { %5400 = vmatprep.subr.bf16.mxu1 %v5399_v17  ;;  %v5776_v44 = vpop.permute.xlu1 %5775 }
 0x6a2   : > { %v5778_v51 = vunpack.i.h.bf16 %v5776_v44  ;;  %v5777_v12 = vunpack.i.l.bf16 %v5776_v44  ;;  %4877 = vmatmul.mubr.msk.f32.gmra.mrb[70].mxu0 %vm748_vm0, %v2081_v20  ;;  %v5411_v20 = vpack.c.bf16 %v5783_v63, %v5782_v16 }
 0x6a3   : > { %4879 = vmatprep.mubr.msk.f32.mxu0 %vm748_vm0, %v2083_v13  ;;  %v5793_v13 = vunpack.i.h.bf16 %v5791_v50 }
 0x6a4   : > { %5402 = vmatpush3.bf16.msra.mxu1 %v5399_v17  ;;  %v5407_v60 = vpack.c.bf16 %v5778_v51, %v5777_v12 }
 0x6a5   : > { %5404 = vmatprep.subr.bf16.mxu1 %v5403_v56  ;;  %v5786_v5 = vpop.permute.xlu1 %5785 }
 0x6a6   : > { %4880 = vmatmul.mubr.msk.f32.gmra.mrb[72].mxu0 %vm748_vm0, %v2085_v18  ;;  %v5788_v26 = vunpack.i.h.bf16 %v5786_v5  ;;  %v5787_v62 = vunpack.i.l.bf16 %v5786_v5 }
 0x6a7   : > { %4882 = vmatprep.mubr.msk.f32.mxu0 %vm748_vm0, %v2087_v32  ;;  %v7776_v32 = vpack.c.bf16 %v5793_v13, %v5792_v43 }
 0x6a8   : > { %5406 = vmatpush3.bf16.msra.mxu1 %v5403_v56  ;;  %v5415_v18 = vpack.c.bf16 %v5788_v26, %v5787_v62 }
 0x6a9   : > { %5408 = vmatprep.subr.bf16.mxu1 %v5407_v60 }
 0x6aa   : > { %4883 = vmatmul.mubr.msk.f32.gmra.mrb[74].mxu0 %vm748_vm0, %v2089_v24 }
 0x6ab   : > { %4885 = vmatprep.mubr.msk.f32.mxu0 %vm748_vm0, %v2091_v4 }
 0x6ac   : > { %5410 = vmatpush3.bf16.msra.mxu1 %v5407_v60 }
 0x6ad   : > { %5412 = vmatprep.subr.bf16.mxu1 %v5411_v20 }
 0x6ae   : > { %4886 = vmatmul.mubr.msk.f32.gmra.mrb[76].mxu0 %vm748_vm0, %v7752_v41 }
 0x6af   : > { %4888 = vmatprep.mubr.msk.f32.mxu0 %vm748_vm0, %v7754_v9 }
 0x6b0   : > { %5414 = vmatpush3.bf16.msra.mxu1 %v5411_v20 }
 0x6b1   : > { %5416 = vmatprep.subr.bf16.mxu1 %v5415_v18 }
 0x6b2   : > { %4889 = vmatmul.mubr.msk.f32.gmra.mrb[78].mxu0 %vm748_vm0, %v7758_v19 }
 0x6b4   : > { %5418 = vmatpush3.bf16.msra.mxu1 %v5415_v18 }
 0x6b5   : > { %5421 = vmatprep.subr.msk.bf16.mxu1 %vm6739_vm1, %v7776_v32 }
 0x6fc   : > { %v7783_v24 = vpop.f32.mrb[48].mxu0 }
 0x6fd   : > { %8807 = vst [vmem:[#allocation24_spill] sm:$0xff] %v7783_v24  ;;  %v7785_v4 = vpop.f32.mrb[49].mxu0  ;;  %v8830_v24 = vld [vmem:[#allocation19_spill] sm:$0xff] }
 0x6fe   : > { %8808 = vst [vmem:[#allocation25_spill] sm:$0xff] %v7785_v4 }
 0x735   : > { %v7787_v41 = vpop.f32.mrb[50].mxu0 }
 0x736   : > { %8809 = vst [vmem:[#allocation15_spill] sm:$0xff] %v7787_v41  ;;  %v7789_v36 = vpop.f32.mrb[51].mxu0  ;;  %v8838_v41 = vld [vmem:[#allocation34_spill] sm:$0xff] }
 0x737   : > { %8810 = vst [vmem:[#allocation17_spill] sm:$0xff] %v7789_v36 }
 0x73a   : > { %v7791_v9 = vpop.f32.mrb[52].mxu0 }
 0x73b   : > { %8811 = vst [vmem:[#allocation58_spill] sm:$0xff] %v7791_v9  ;;  %v7793_v57 = vpop.f32.mrb[53].mxu0 }
 0x73c   : > { %8812 = vst [vmem:[#allocation59_spill] sm:$0xff] %v7793_v57 }
 0x741   : > { %v7795_v55 = vpop.f32.mrb[54].mxu0 }
 0x742   : > { %8813 = vst [vmem:[#allocation60_spill] sm:$0xff] %v7795_v55  ;;  %v7797_v19 = vpop.f32.mrb[55].mxu0 }
 0x743   : > { %8814 = vst [vmem:[#allocation61_spill] sm:$0xff] %v7797_v19 }
 0x745   : > { %v7799_v61 = vpop.f32.mrb[56].mxu0 }
 0x746   : > { %8815 = vst [vmem:[#allocation62_spill] sm:$0xff] %v7799_v61  ;;  %v7803_v46 = vpop.f32.mrb[57].mxu0 }
 0x747   : > { %8816 = vst [vmem:[#allocation63_spill] sm:$0xff] %v7803_v46 }
 0x749   : > { %v7807_v39 = vpop.f32.mrb[58].mxu0 }
 0x74a   : > { %8817 = vst [vmem:[#allocation64_spill] sm:$0xff] %v7807_v39  ;;  %v7811_v14 = vpop.f32.mrb[59].mxu0  ;;  %v8840_v39 = vld [vmem:[#allocation36_spill] sm:$0xff] }
 0x74b   : > { %8818 = vst [vmem:[#allocation65_spill] sm:$0xff] %v7811_v14 }
 0x74d   : > { %v7815_v27 = vpop.f32.mrb[60].mxu0 }
 0x74e   : > { %8819 = vst [vmem:[#allocation66_spill] sm:$0xff] %v7815_v27  ;;  %v7819_v11 = vpop.f32.mrb[61].mxu0 }
 0x74f   : > { %8820 = vst [vmem:[#allocation67_spill] sm:$0xff] %v7819_v11 }
 0x755   : > { %v7823_v17 = vpop.f32.mrb[62].mxu0 }
 0x756   : > { %8821 = vst [vmem:[#allocation68_spill] sm:$0xff] %v7823_v17  ;;  %v7827_v51 = vpop.f32.mrb[63].mxu0  ;;  %v8834_v17 = vld [vmem:[#allocation28_spill] sm:$0xff] }
 0x757   : > { %8822 = vst [vmem:[#allocation69_spill] sm:$0xff] %v7827_v51  ;;  %vm8835_vm6 = vcmp.ge.s32.totalorder %v8834_v17, %v8782_v34 }
 0x769   : > { %v4869_v56 = vpop.f32.mrb[64].mxu0 }
 0x76a   : > { %v2340_v52 = vsel %vm717_vm2, %v4869_v56, -1e+30  ;;  %v2260_v63 = vpop.f32.mrb[65].mxu0 }
 0x76b   : > { %v2339_v16 = vsel %vm716_vm3, %v2260_v63, -1e+30  ;;  %2357 = vmax.xlane.f32.xlu1 %v2340_v52 }
 0x76c   : > { %2355 = vmax.xlane.f32.xlu0 %v2339_v16 }
 0x76d   : > { %v4872_v60 = vpop.f32.mrb[66].mxu0 }
 0x76e   : > { %v2270_v5 = vpop.f32.mrb[67].mxu0 }
 0x76f   : > { %v2341_v55 = vsel %vm718_vm5, %v2270_v5, -1e+30 }
 0x771   : > { %v4875_v26 = vpop.f32.mrb[68].mxu0 }
 0x772   : > { %v7840_v20 = vsel %vm721_vm7, %v4875_v26, -1e+30  ;;  %v2280_v50 = vpop.f32.mrb[69].mxu0 }
 0x773   : > { %2365 = vmax.xlane.f32.xlu1 %v7840_v20 }
 0x775   : > { %v4878_v13 = vpop.f32.mrb[70].mxu0 }
 0x776   : > { %v7846_v18 = vsel %vm723_vm9, %v4878_v13, -1e+30  ;;  %v2290_v56 = vpop.f32.mrb[71].mxu0 }
 0x777   : > { %2369 = vmax.xlane.f32.xlu1 %v7846_v18  ;;  %v2345_v27 = vsel %vm722_vm8, %v2290_v56, -1e+30 }
 0x779   : > { %v4881_v63 = vpop.f32.mrb[72].mxu0 }
 0x77a   : > { %v7852_v54 = vsel %vm725_vm11, %v4881_v63, -1e+30  ;;  %v2300_v26 = vpop.f32.mrb[73].mxu0  ;;  %v8828_v63 = vld [vmem:[#allocation18_spill] sm:$0xff] }
 0x77b   : > { %2373 = vmax.xlane.f32.xlu1 %v7852_v54 }
 0x77d   : > { %v4884_v31 = vpop.f32.mrb[74].mxu0 }
 0x77e   : > { %v7858_v47 = vsel %vm727_vm13, %v4884_v31, -1e+30  ;;  %v2310_v13 = vpop.f32.mrb[75].mxu0 }
 0x77f   : > { %2377 = vmax.xlane.f32.xlu1 %v7858_v47 }
 0x781   : > { %v4887_v2 = vpop.f32.mrb[76].mxu0 }
 0x782   : > { %v7864_v33 = vsel %vm729_vm15, %v4887_v2, -1e+30  ;;  %5795 = vrot.lane.b32.xlu0 %v8828_v63, %s6445_s30  ;;  %v2320_v19 = vpop.f32.mrb[77].mxu0  ;;  %v8831_v2 = vld [vmem:[#allocation26_spill] sm:$0xff] }
 0x783   : > { %2381 = vmax.xlane.f32.xlu1 %v7864_v33  ;;  %vm8832_vm4 = vcmp.ge.s32.totalorder %v8831_v2, %v8782_v34 }
 0x784   : > { %v2342_v61 = vsel %vm8832_vm4, %v4872_v60, -1e+30  ;;  %v2347_v60 = vsel %vm724_vm10, %v2300_v26, -1e+30  ;;  %vm8839_vm4 = vcmp.ge.s32.totalorder %v8838_v41, %v8782_v34 }
 0x785   : > { %v4890_v51 = vpop.f32.mrb[78].mxu0  ;;  %v7895_v5 = vsel %vm8839_vm4, %v2310_v13, -1e+30 }
 0x786   : > { %v7872_v31 = vsel %vm731_vm14, %v4890_v51, -1e+30  ;;  %v2330_v11 = vpop.f32.mrb[79].mxu0  ;;  %v2343_v51 = vsel %vm8835_vm6, %v2280_v50, -1e+30  ;;  %vm8841_vm6 = vcmp.ge.s32.totalorder %v8840_v39, %v8782_v34 }
 0x787   : > { %2385 = vmax.xlane.f32.xlu1 %v7872_v31  ;;  %v7901_v50 = vsel %vm8841_vm6, %v2320_v19, -1e+30  ;;  %v7907_v36 = vsel %vm730_vm12, %v2330_v11, -1e+30  ;;  %v8843_v11 = vld [vmem:[#allocation20_spill] sm:$0xff] }
 0x798   : > { %5800 = vrot.lane.b32.xlu1 %v8830_v24, %s6445_s30 }
 0x7a1   : > { %2361 = vmax.xlane.f32.xlu0 %v2342_v61 }
 0x7a5   : > { %2359 = vmax.xlane.f32.xlu0 %v2341_v55 }
 0x7a9   : > { %2363 = vmax.xlane.f32.xlu0 %v2343_v51 }
 0x7ad   : > { %2367 = vmax.xlane.f32.xlu0 %v2345_v27 }
 0x7b1   : > { %2371 = vmax.xlane.f32.xlu0 %v2347_v60 }
 0x7b5   : > { %2375 = vmax.xlane.f32.xlu0 %v7895_v5 }
 0x7b9   : > { %2379 = vmax.xlane.f32.xlu0 %v7901_v50 }
 0x7bd   : > { %2383 = vmax.xlane.f32.xlu0 %v7907_v36 }
 0x7f8   : > { %v2358_v26 = vpop.xlane.xlu1 %2357 }
 0x7f9   : > { %v2388_v14 = vsub.f32 %v2340_v52, %v2358_v26  ;;  %v2356_v13 = vpop.xlane.xlu0 %2355 }
 0x7fa   : > { %v2387_v4 = vsub.f32 %v2339_v16, %v2356_v13 }
 0x7fb   : > { %v2405_v46 = vmul.f32 1.442695, %v2388_v14 }
 0x7fc   : > { %v2403_v57 = vmul.f32 1.442695, %v2387_v4 }
 0x7fd   : > { %6117 = vpow2.f32 %v2405_v46  ;;  %v7918_v41 = vpop.permute.xlu0 %5795 }
 0x7fe   : > { %6119 = vpow2.f32 %v2403_v57 }
 0x800   : > { %v2366_v56 = vpop.xlane.xlu1 %2365 }
 0x801   : > { %v2392_v57 = vsub.f32 %v7840_v20, %v2366_v56 }
 0x803   : > { %v2413_v24 = vmul.f32 1.442695, %v2392_v57 }
 0x804   : > { %v2370_v52 = vpop.xlane.xlu1 %2369 }
 0x805   : > { %v2394_v44 = vsub.f32 %v7846_v18, %v2370_v52 }
 0x807   : > { %v7910_v39 = vpop.eup %6117 }
 0x808   : > { %v7912_v19 = vpop.eup %6119  ;;  %2437 = vadd.xlane.f32.xlu0 %v7910_v39  ;;  %v2374_v4 = vpop.xlane.xlu1 %2373 }
 0x809   : > { %2435 = vadd.xlane.f32.xlu1 %v7912_v19 }
 0x80c   : > { %v2378_v12 = vpop.xlane.xlu1 %2377 }
 0x81e   : > { %5805 = vrot.lane.b32.xlu0 %v8843_v11, %s6445_s30  ;;  %v2396_v11 = vsub.f32 %v7852_v54, %v2374_v4 }
 0x820   : > { %v2421_v20 = vmul.f32 1.442695, %v2396_v11 }
 0x82e   : > { %v2362_v16 = vpop.xlane.xlu0 %2361 }
 0x82f   : > { %v2390_v14 = vsub.f32 %v2342_v61, %v2362_v16  ;;  %v2417_v61 = vmul.f32 1.442695, %v2394_v44  ;;  %v2398_v16 = vsub.f32 %v7858_v47, %v2378_v12 }
 0x831   : > { %v2409_v46 = vmul.f32 1.442695, %v2390_v14 }
 0x832   : > { %v2360_v26 = vpop.xlane.xlu0 %2359 }
 0x833   : > { %6121 = vpow2.f32 %v2409_v46  ;;  %v2389_v13 = vsub.f32 %v2341_v55, %v2360_v26  ;;  %v2425_v46 = vmul.f32 1.442695, %v2398_v16 }
 0x835   : > { %v2407_v6 = vmul.f32 1.442695, %v2389_v13 }
 0x836   : > { %v2364_v9 = vpop.xlane.xlu0 %2363 }
 0x837   : > { %6123 = vpow2.f32 %v2407_v6  ;;  %v2391_v17 = vsub.f32 %v2343_v51, %v2364_v9 }
 0x838   : > { %6125 = vpow2.f32 %v2413_v24 }
 0x839   : > { %v2411_v43 = vmul.f32 1.442695, %v2391_v17  ;;  %v2382_v17 = vpop.xlane.xlu1 %2381 }
 0x83a   : > { %v2368_v14 = vpop.xlane.xlu0 %2367 }
 0x83b   : > { %6127 = vpow2.f32 %v2411_v43  ;;  %v2393_v56 = vsub.f32 %v2345_v27, %v2368_v14 }
 0x83c   : > { %6129 = vpow2.f32 %v2417_v61 }
 0x83d   : > { %v7924_v55 = vpop.eup %6121  ;;  %6131 = vpow2.f32 %v2421_v20  ;;  %v2415_v54 = vmul.f32 1.442695, %v2393_v56  ;;  %v2386_v57 = vpop.xlane.xlu1 %2385 }
 0x83e   : > { %v2372_v18 = vpop.xlane.xlu0 %2371  ;;  %2441 = vadd.xlane.f32.xlu0 %v7924_v55  ;;  %6133 = vpow2.f32 %v2425_v46  ;;  %v2402_v11 = vsub.f32 %v7872_v31, %v2386_v57 }
 0x83f   : > { %v2395_v6 = vsub.f32 %v2347_v60, %v2372_v18  ;;  %6135 = vpow2.f32 %v2415_v54  ;;  %v2400_v60 = vsub.f32 %v7864_v33, %v2382_v17 }
 0x841   : > { %v7927_v9 = vpop.eup %6123  ;;  %v2419_v47 = vmul.f32 1.442695, %v2395_v6  ;;  %v2429_v13 = vmul.f32 1.442695, %v2400_v60 }
 0x842   : > { %v2376_v44 = vpop.xlane.xlu0 %2375  ;;  %2439 = vadd.xlane.f32.xlu1 %v7927_v9  ;;  %v7931_v12 = vpop.eup %6125 }
 0x843   : > { %v2397_v27 = vsub.f32 %v7895_v5, %v2376_v44  ;;  %6137 = vpow2.f32 %v2419_v47 }
 0x845   : > { %v7933_v43 = vpop.eup %6127  ;;  %v2423_v51 = vmul.f32 1.442695, %v2397_v27 }
 0x846   : > { %v2380_v24 = vpop.xlane.xlu0 %2379  ;;  %2445 = vadd.xlane.f32.xlu1 %v7931_v12  ;;  %2443 = vadd.xlane.f32.xlu0 %v7933_v43  ;;  %v7939_v4 = vpop.eup %6129 }
 0x847   : > { %v2399_v52 = vsub.f32 %v7901_v50, %v2380_v24  ;;  %v7941_v26 = vpop.eup %6131  ;;  %6139 = vpow2.f32 %v2423_v51  ;;  %v2433_v50 = vmul.f32 1.442695, %v2402_v11 }
 0x848   : > { %v7946_v61 = vpop.eup %6133 }
 0x849   : > { %v2427_v5 = vmul.f32 1.442695, %v2399_v52  ;;  %v7948_v16 = vpop.eup %6135 }
 0x84a   : > { %2449 = vadd.xlane.f32.xlu1 %v7939_v4  ;;  %2453 = vadd.xlane.f32.xlu0 %v7941_v26  ;;  %v2384_v33 = vpop.xlane.xlu0 %2383 }
 0x84b   : > { %6141 = vpow2.f32 %v2427_v5  ;;  %v2401_v14 = vsub.f32 %v7907_v36, %v2384_v33 }
 0x84c   : > { %6143 = vpow2.f32 %v2429_v13 }
 0x84d   : > { %v7953_v20 = vpop.eup %6137  ;;  %6145 = vpow2.f32 %v2433_v50  ;;  %v2431_v31 = vmul.f32 1.442695, %v2401_v14 }
 0x84e   : > { %2447 = vadd.xlane.f32.xlu1 %v7948_v16  ;;  %2457 = vadd.xlane.f32.xlu0 %v7946_v61 }
 0x84f   : > { %6147 = vpow2.f32 %v2431_v31 }
 0x851   : > { %v7956_v56 = vpop.eup %6139 }
 0x852   : > { %2451 = vadd.xlane.f32.xlu1 %v7953_v20 }
 0x855   : > { %v7958_v46 = vpop.eup %6141 }
 0x856   : > { %2455 = vadd.xlane.f32.xlu1 %v7956_v56  ;;  %2459 = vadd.xlane.f32.xlu0 %v7958_v46  ;;  %v7962_v18 = vpop.eup %6143 }
 0x857   : > { %v7965_v36 = vpop.eup %6145 }
 0x859   : > { %v7968_v54 = vpop.eup %6147 }
 0x85a   : > { %2461 = vadd.xlane.f32.xlu1 %v7962_v18 }
 0x85e   : > { %2465 = vadd.xlane.f32.xlu1 %v7965_v36 }
 0x862   : > { %2463 = vadd.xlane.f32.xlu1 %v7968_v54 }
 0x86c   : > { %5815 = vrot.lane.b32.xlu0 %v6882_v42, %s6445_s30 }
 0x870   : > { %5820 = vrot.lane.b32.xlu0 %v6892_v1, %s6445_s30  ;;  %v8844_v1 = vld [vmem:[#allocation45_spill] sm:$0xff] }
 0x873   : > { %5810 = vrot.lane.b32.xlu1 %v6854_v7, %s6445_s30 }
 0x874   : > { %5825 = vrot.lane.b32.xlu0 %v6902_v22, %s6445_s30  ;;  %v8845_v22 = vld [vmem:[#allocation42_spill] sm:$0xff] }
 0x877   : > { %2759 = vrot.lane.b32.xlu1 %v6909_v28, %s6445_s30  ;;  %v8846_v28 = vld [vmem:[#allocation41_spill] sm:$0xff] }
 0x878   : > { %2757 = vrot.lane.b32.xlu0 %v6728_v35, %s6445_s30  ;;  %v5801_v35 = vpop.permute.xlu1 %5800 }
 0x87b   : > { %2763 = vrot.lane.b32.xlu1 %v6919_v30, %s6445_s30 }
 0x87c   : > { %2761 = vrot.lane.b32.xlu0 %v6912_v29, %s6445_s30 }
 0x87f   : > { %2767 = vrot.lane.b32.xlu1 %v6929_v37, %s6445_s30 }
 0x880   : > { %2765 = vrot.lane.b32.xlu0 %v6922_v0, %s6445_s30 }
 0x883   : > { %2771 = vrot.lane.b32.xlu1 %v6939_v49, %s6445_s30 }
 0x884   : > { %2769 = vrot.lane.b32.xlu0 %v6932_v45, %s6445_s30 }
 0x887   : > { %2775 = vrot.lane.b32.xlu1 %v6949_v3, %s6445_s30 }
 0x888   : > { %2773 = vrot.lane.b32.xlu0 %v6942_v58, %s6445_s30 }
 0x88b   : > { %2779 = vrot.lane.b32.xlu1 %v6958_v23, %s6445_s30  ;;  %v5797_v23 = vunpack.i.l.bf16 %v7918_v41 }
 0x88c   : > { %2777 = vrot.lane.b32.xlu0 %v6952_v15, %s6445_s30  ;;  %v5798_v15 = vunpack.i.h.bf16 %v7918_v41 }
 0x88f   : > { %2783 = vrot.lane.b32.xlu1 %v6966_v53, %s6445_s30 }
 0x890   : > { %2781 = vrot.lane.b32.xlu0 %v6960_v40, %s6445_s30 }
 0x893   : > { %2787 = vrot.lane.b32.xlu1 %v6974_v21, %s6445_s30  ;;  %v5803_v21 = vunpack.i.h.bf16 %v5801_v35 }
 0x894   : > { %2785 = vrot.lane.b32.xlu0 %v6968_v8, %s6445_s30  ;;  %v5425_v8 = vpack.c.bf16 %v5798_v15, %v5797_v23 }
 0x895   : > { %v2438_v7 = vpop.xlane.xlu0 %2437 }
 0x896   : > { %6149 = vrcp.f32 %v2438_v7  ;;  %v2436_v42 = vpop.xlane.xlu1 %2435 }
 0x897   : > { %6151 = vrcp.f32 %v2436_v42  ;;  %5830 = vrot.lane.b32.xlu1 %v7301_v25, %s6445_s30 }
 0x898   : > { %5835 = vrot.lane.b32.xlu0 %v7251_v38, %s6445_s30  ;;  %v5802_v38 = vunpack.i.l.bf16 %v5801_v35 }
 0x899   : > { %v5806_v41 = vpop.permute.xlu0 %5805 }
 0x89a   : > { %v5431_v25 = vpack.c.bf16 %v5803_v21, %v5802_v38 }
 0x89b   : > { %5840 = vrot.lane.b32.xlu1 %v8844_v1, %s6445_s30 }
 0x89c   : > { %5850 = vrot.lane.b32.xlu0 %v8845_v22, %s6445_s30 }
 0x89f   : > { %5845 = vrot.lane.b32.xlu1 %v8846_v28, %s6445_s30 }
 0x8a0   : > { %v6150_v29 = vpop.eup %6149 }
 0x8a1   : > { %v6152_v30 = vpop.eup %6151  ;;  %v2484_v0 = vmul.f32 %v6150_v29, %v2438_v7 }
 0x8a2   : > { %v2483_v37 = vmul.f32 %v6152_v30, %v2436_v42 }
 0x8a3   : > { %v2500_v45 = vsub.f32 2.0, %v2484_v0 }
 0x8a4   : > { %v2499_v49 = vsub.f32 2.0, %v2483_v37 }
 0x8a5   : > { %v2516_v58 = vmul.f32 %v6150_v29, %v2500_v45 }
 0x8a6   : > { %v2515_v3 = vmul.f32 %v6152_v30, %v2499_v49 }
 0x8a7   : > { %v2532_v40 = vmul.f32 %v7910_v39, %v2516_v58  ;;  %v5808_v39 = vunpack.i.h.bf16 %v5806_v41 }
 0x8a8   : > { %v2531_v53 = vmul.f32 %v7912_v19, %v2515_v3  ;;  %v5807_v19 = vunpack.i.l.bf16 %v5806_v41 }
 0x8a9   : > { %4160 = vst [vmem:[%s7325_s19 + $0x108] sm:$0xff] %v2532_v40 }
 0x8aa   : > { %4159 = vst [vmem:[%s7325_s19 + $0x100] sm:$0xff] %v2531_v53  ;;  %4923 = vmatprep.mubr.f32.mxu1 %v2531_v53  ;;  %v5437_v6 = vpack.c.bf16 %v5808_v39, %v5807_v19 }
 0x8ab   : > { %4924 = vmatmul.mubr.f32.vlgmr.msra.gmra.mrb[48].mxu1 %v2532_v40 }
 0x8ac   : > { %5424 = vmatpush3.bf16.xpose.msk.msra.mxu1 %vm6739_vm1, %v7776_v32 }
 0x8ad   : > { %5427 = vmatprep.subr.msk.bf16.mxu1 %vm6739_vm1, %v5425_v8 }
 0x8b4   : > { %5430 = vmatpush3.bf16.xpose.msk.msra.mxu1 %vm6739_vm1, %v5425_v8 }
 0x8b5   : > { %5433 = vmatprep.subr.msk.bf16.mxu1 %vm6739_vm1, %v5431_v25 }
 0x8bc   : > { %5436 = vmatpush3.bf16.xpose.msk.msra.mxu1 %vm6739_vm1, %v5431_v25 }
 0x8bd   : > { %5439 = vmatprep.subr.msk.bf16.mxu1 %vm6739_vm1, %v5437_v6 }
 0x8c4   : > { %5442 = vmatpush3.bf16.xpose.msk.msra.mxu1 %vm6739_vm1, %v5437_v6 }
 0x8cb   : > { %v2442_v32 = vpop.xlane.xlu0 %2441 }
 0x8cc   : > { %6153 = vrcp.f32 %v2442_v32 }
 0x8cf   : > { %v2440_v17 = vpop.xlane.xlu1 %2439 }
 0x8d0   : > { %6155 = vrcp.f32 %v2440_v17 }
 0x8d3   : > { %v2446_v44 = vpop.xlane.xlu1 %2445  ;;  %v2444_v47 = vpop.xlane.xlu0 %2443 }
 0x8d4   : > { %6157 = vrcp.f32 %v2446_v44 }
 0x8d5   : > { %6159 = vrcp.f32 %v2444_v47 }
 0x8d6   : > { %v6154_v27 = vpop.eup %6153 }
 0x8d7   : > { %v2486_v51 = vmul.f32 %v6154_v27, %v2442_v32  ;;  %v2450_v24 = vpop.xlane.xlu1 %2449  ;;  %v2454_v60 = vpop.xlane.xlu0 %2453 }
 0x8d8   : > { %6161 = vrcp.f32 %v2450_v24 }
 0x8d9   : > { %v2502_v52 = vsub.f32 2.0, %v2486_v51  ;;  %6163 = vrcp.f32 %v2454_v60 }
 0x8da   : > { %v6156_v57 = vpop.eup %6155 }
 0x8db   : > { %v2518_v5 = vmul.f32 %v6154_v27, %v2502_v52  ;;  %v2485_v13 = vmul.f32 %v6156_v57, %v2440_v17  ;;  %v2448_v11 = vpop.xlane.xlu1 %2447  ;;  %v2458_v33 = vpop.xlane.xlu0 %2457 }
 0x8dc   : > { %6165 = vrcp.f32 %v2448_v11 }
 0x8dd   : > { %v2501_v50 = vsub.f32 2.0, %v2485_v13  ;;  %6167 = vrcp.f32 %v2458_v33  ;;  %v2534_v14 = vmul.f32 %v7924_v55, %v2518_v5 }
 0x8de   : > { %v6158_v31 = vpop.eup %6157 }
 0x8df   : > { %v6160_v35 = vpop.eup %6159  ;;  %v2488_v7 = vmul.f32 %v6158_v31, %v2446_v44  ;;  %v2452_v42 = vpop.xlane.xlu1 %2451  ;;  %v2517_v1 = vmul.f32 %v6156_v57, %v2501_v50  ;;  %4162 = vst [vmem:[%s7325_s19 + $0x118] sm:$0xff] %v2534_v14 }
 0x8e0   : > { %v2487_v22 = vmul.f32 %v6160_v35, %v2444_v47  ;;  %6169 = vrcp.f32 %v2452_v42 }
 0x8e1   : > { %v2504_v28 = vsub.f32 2.0, %v2488_v7  ;;  %v2533_v29 = vmul.f32 %v7927_v9, %v2517_v1 }
 0x8e2   : > { %v6162_v30 = vpop.eup %6161  ;;  %v2503_v0 = vsub.f32 2.0, %v2487_v22 }
 0x8e3   : > { %v6164_v37 = vpop.eup %6163  ;;  %v2520_v45 = vmul.f32 %v6158_v31, %v2504_v28  ;;  %v2490_v49 = vmul.f32 %v6162_v30, %v2450_v24  ;;  %v2456_v58 = vpop.xlane.xlu1 %2455  ;;  %4161 = vst [vmem:[%s7325_s19 + $0x110] sm:$0xff] %v2533_v29  ;;  %4926 = vmatprep.mubr.f32.mxu1 %v2533_v29 }
 0x8e4   : > { %v2460_v55 = vpop.xlane.xlu0 %2459  ;;  %v2519_v3 = vmul.f32 %v6160_v35, %v2503_v0  ;;  %v2492_v15 = vmul.f32 %v6164_v37, %v2454_v60  ;;  %6171 = vrcp.f32 %v2456_v58  ;;  %4927 = vmatmul.mubr.f32.gmra.mrb[50].mxu1 %v2534_v14 }
 0x8e5   : > { %v2506_v23 = vsub.f32 2.0, %v2490_v49  ;;  %6173 = vrcp.f32 %v2460_v55  ;;  %v2536_v40 = vmul.f32 %v7931_v12, %v2520_v45 }
 0x8e6   : > { %v6166_v9 = vpop.eup %6165  ;;  %v2508_v53 = vsub.f32 2.0, %v2492_v15  ;;  %v2535_v8 = vmul.f32 %v7933_v43, %v2519_v3 }
 0x8e7   : > { %v6168_v21 = vpop.eup %6167  ;;  %v2522_v38 = vmul.f32 %v6162_v30, %v2506_v23  ;;  %v2489_v25 = vmul.f32 %v6166_v9, %v2448_v11  ;;  %v2462_v41 = vpop.xlane.xlu1 %2461  ;;  %4164 = vst [vmem:[%s7325_s19 + $0x128] sm:$0xff] %v2536_v40 }
 0x8e8   : > { %v8048_v39 = vpop.permute.xlu0 %5815  ;;  %v2524_v19 = vmul.f32 %v6164_v37, %v2508_v53  ;;  %v2494_v6 = vmul.f32 %v6168_v21, %v2458_v33  ;;  %6175 = vrcp.f32 %v2462_v41  ;;  %4163 = vst [vmem:[%s7325_s19 + $0x120] sm:$0xff] %v2535_v8  ;;  %4929 = vmatprep.mubr.f32.mxu1 %v2535_v8 }
 0x8e9   : > { %v2505_v32 = vsub.f32 2.0, %v2489_v25  ;;  %4930 = vmatmul.mubr.f32.gmra.mrb[52].mxu1 %v2536_v40  ;;  %v2538_v12 = vmul.f32 %v7939_v4, %v2522_v38  ;;  %v5818_v1 = vunpack.i.h.bf16 %v8048_v39  ;;  %v5817_v30 = vunpack.i.l.bf16 %v8048_v39 }
 0x8ea   : > { %v6170_v17 = vpop.eup %6169  ;;  %v2510_v43 = vsub.f32 2.0, %v2494_v6  ;;  %v2540_v44 = vmul.f32 %v7941_v26, %v2524_v19 }
 0x8eb   : > { %v2521_v47 = vmul.f32 %v6166_v9, %v2505_v32  ;;  %v2491_v27 = vmul.f32 %v6170_v17, %v2452_v42  ;;  %v2466_v51 = vpop.xlane.xlu1 %2465  ;;  %4166 = vst [vmem:[%s7325_s19 + $0x138] sm:$0xff] %v2538_v12  ;;  %v5449_v9 = vpack.c.bf16 %v5818_v1, %v5817_v30 }
 0x8ec   : > { %v8054_v24 = vpop.permute.xlu0 %5820  ;;  %v2526_v60 = vmul.f32 %v6168_v21, %v2510_v43  ;;  %6177 = vrcp.f32 %v2466_v51  ;;  %4168 = vst [vmem:[%s7325_s19 + $0x148] sm:$0xff] %v2540_v44 }
 0x8ed   : > { %v2507_v52 = vsub.f32 2.0, %v2491_v27  ;;  %v2537_v57 = vmul.f32 %v7948_v16, %v2521_v47  ;;  %v5822_v39 = vunpack.i.l.bf16 %v8054_v24 }
 0x8ee   : > { %v6172_v5 = vpop.eup %6171  ;;  %v2542_v4 = vmul.f32 %v7946_v61, %v2526_v60 }
 0x8ef   : > { %v6174_v13 = vpop.eup %6173  ;;  %v2523_v11 = vmul.f32 %v6170_v17, %v2507_v52  ;;  %v2493_v26 = vmul.f32 %v6172_v5, %v2456_v58  ;;  %v2464_v33 = vpop.xlane.xlu1 %2463  ;;  %4165 = vst [vmem:[%s7325_s19 + $0x130] sm:$0xff] %v2537_v57  ;;  %4932 = vmatprep.mubr.f32.mxu1 %v2537_v57 }
 0x8f0   : > { %v8061_v50 = vpop.permute.xlu0 %5825  ;;  %v2495_v14 = vmul.f32 %v6174_v13, %v2460_v55  ;;  %6179 = vrcp.f32 %v2464_v33  ;;  %4933 = vmatmul.mubr.f32.gmra.mrb[54].mxu1 %v2538_v12  ;;  %4170 = vst [vmem:[%s7325_s19 + $0x158] sm:$0xff] %v2542_v4 }
 0x8f1   : > { %v2509_v31 = vsub.f32 2.0, %v2493_v26  ;;  %v2539_v35 = vmul.f32 %v7953_v20, %v2523_v11  ;;  %v5828_v27 = vunpack.i.h.bf16 %v8061_v50 }
 0x8f2   : > { %v6176_v16 = vpop.eup %6175  ;;  %v2511_v7 = vsub.f32 2.0, %v2495_v14 }
 0x8f3   : > { %v2525_v42 = vmul.f32 %v6172_v5, %v2509_v31  ;;  %v2496_v61 = vmul.f32 %v6176_v16, %v2462_v41  ;;  %v5811_v22 = vpop.permute.xlu1 %5810  ;;  %4167 = vst [vmem:[%s7325_s19 + $0x140] sm:$0xff] %v2539_v35  ;;  %4935 = vmatprep.mubr.f32.mxu1 %v2539_v35  ;;  %v5823_v41 = vunpack.i.h.bf16 %v8054_v24 }
 0x8f4   : > { %v2758_v28 = vpop.permute.xlu0 %2757  ;;  %v2527_v29 = vmul.f32 %v6174_v13, %v2511_v7  ;;  %v5813_v0 = vunpack.i.h.bf16 %v5811_v22  ;;  %v5812_v37 = vunpack.i.l.bf16 %v5811_v22  ;;  %4936 = vmatmul.mubr.f32.gmra.mrb[56].mxu1 %v2540_v44 }
 0x8f5   : > { %v2512_v45 = vsub.f32 2.0, %v2496_v61  ;;  %v2541_v20 = vmul.f32 %v7956_v56, %v2525_v42  ;;  %v5455_v17 = vpack.c.bf16 %v5823_v41, %v5822_v39 }
 0x8f6   : > { %v6178_v49 = vpop.eup %6177  ;;  %v5443_v58 = vpack.c.bf16 %v5813_v0, %v5812_v37  ;;  %v2543_v55 = vmul.f32 %v7958_v46, %v2527_v29 }
 0x8f7   : > { %v2528_v3 = vmul.f32 %v6176_v16, %v2512_v45  ;;  %v2498_v15 = vmul.f32 %v6178_v49, %v2466_v51  ;;  %v2760_v23 = vpop.permute.xlu1 %2759  ;;  %4169 = vst [vmem:[%s7325_s19 + $0x150] sm:$0xff] %v2541_v20  ;;  %4938 = vmatprep.mubr.f32.mxu1 %v2541_v20 }
 0x8f8   : > { %v2762_v40 = vpop.permute.xlu0 %2761  ;;  %4939 = vmatmul.mubr.f32.gmra.mrb[58].mxu1 %v2542_v4  ;;  %5445 = vmatprep.subr.msk.bf16.mxu1 %vm6739_vm1, %v5443_v58  ;;  %4171 = vst [vmem:[%s7325_s19 + $0x160] sm:$0xff] %v2543_v55 }
 0x8f9   : > { %v2514_v53 = vsub.f32 2.0, %v2498_v15  ;;  %4941 = vmatprep.mubr.f32.mxu1 %v2543_v55  ;;  %5448 = vmatpush3.bf16.xpose.msk.msra.mxu1 %vm6739_vm1, %v5443_v58  ;;  %v2544_v56 = vmul.f32 %v7962_v18, %v2528_v3 }
 0x8fa   : > { %v6180_v46 = vpop.eup %6179  ;;  %5451 = vmatprep.subr.msk.bf16.mxu1 %vm6739_vm1, %v5449_v9 }
 0x8fb   : > { %v2530_v8 = vmul.f32 %v6178_v49, %v2514_v53  ;;  %v2497_v21 = vmul.f32 %v6180_v46, %v2464_v33  ;;  %v2764_v38 = vpop.permute.xlu1 %2763  ;;  %4172 = vst [vmem:[%s7325_s19 + $0x168] sm:$0xff] %v2544_v56 }
 0x8fc   : > { %v2766_v25 = vpop.permute.xlu0 %2765  ;;  %4942 = vmatmul.mubr.f32.gmra.mrb[60].mxu1 %v2544_v56 }
 0x8fd   : > { %v2513_v19 = vsub.f32 2.0, %v2497_v21  ;;  %v2546_v6 = vmul.f32 %v7965_v36, %v2530_v8  ;;  %v5827_v36 = vunpack.i.l.bf16 %v8061_v50 }
 0x8ff   : > { %v2529_v18 = vmul.f32 %v6180_v46, %v2513_v19  ;;  %v2768_v32 = vpop.permute.xlu1 %2767  ;;  %4174 = vst [vmem:[%s7325_s19 + $0x178] sm:$0xff] %v2546_v6  ;;  %v5461_v60 = vpack.c.bf16 %v5828_v27, %v5827_v36 }
 0x900   : > { %v2770_v12 = vpop.permute.xlu0 %2769 }
 0x901   : > { %5454 = vmatpush3.bf16.xpose.msk.msra.mxu1 %vm6739_vm1, %v5449_v9  ;;  %v2545_v43 = vmul.f32 %v7968_v54, %v2529_v18 }
 0x902   : > { %5457 = vmatprep.subr.msk.bf16.mxu1 %vm6739_vm1, %v5455_v17 }
 0x903   : > { %v2772_v44 = vpop.permute.xlu1 %2771  ;;  %4173 = vst [vmem:[%s7325_s19 + $0x170] sm:$0xff] %v2545_v43  ;;  %4944 = vmatprep.mubr.f32.mxu1 %v2545_v43 }
 0x904   : > { %v2774_v47 = vpop.permute.xlu0 %2773  ;;  %4945 = vmatmul.mubr.f32.gmra.mrb[62].mxu1 %v2546_v6 }
 0x905   : > { %4979 = vmatprep.mubr.msk.f32.mxu1 %vm748_vm0, %v2758_v28 }
 0x907   : > { %v2776_v51 = vpop.permute.xlu1 %2775 }
 0x908   : > { %v2778_v24 = vpop.permute.xlu0 %2777 }
 0x909   : > { %5460 = vmatpush3.bf16.xpose.msk.msra.mxu1 %vm6739_vm1, %v5455_v17 }
 0x90a   : > { %5463 = vmatprep.subr.msk.bf16.mxu1 %vm6739_vm1, %v5461_v60 }
 0x90b   : > { %v2780_v54 = vpop.permute.xlu1 %2779 }
 0x90c   : > { %v2782_v52 = vpop.permute.xlu0 %2781 }
 0x90f   : > { %v2784_v57 = vpop.permute.xlu1 %2783 }
 0x910   : > { %v2786_v5 = vpop.permute.xlu0 %2785 }
 0x911   : > { %5466 = vmatpush3.bf16.xpose.msk.msra.mxu1 %vm6739_vm1, %v5461_v60  ;;  %vm8847_vm1 = vcmp.ge.s32.totalorder %v8831_v2, %v8782_v34 }
 0x913   : > { %v2788_v4 = vpop.permute.xlu1 %2787 }
 0x914   : > { %v5836_v13 = vpop.permute.xlu0 %5835 }
 0x915   : > { %v5838_v26 = vunpack.i.h.bf16 %v5836_v13  ;;  %v5837_v33 = vunpack.i.l.bf16 %v5836_v13 }
 0x917   : > { %v5831_v11 = vpop.permute.xlu1 %5830  ;;  %v5471_v16 = vpack.c.bf16 %v5838_v26, %v5837_v33 }
 0x918   : > { %v5833_v50 = vunpack.i.h.bf16 %v5831_v11  ;;  %v5832_v14 = vunpack.i.l.bf16 %v5831_v11  ;;  %4980 = vmatmul.mubr.msk.f32.vlgmr.msra.gmra.mrb[64].mxu1 %vm748_vm0, %v2760_v23  ;;  %v5851_v28 = vpop.permute.xlu0 %5850 }
 0x919   : > { %4982 = vmatprep.mubr.msk.f32.mxu1 %vm748_vm0, %v2762_v40  ;;  %v5853_v29 = vunpack.i.h.bf16 %v5851_v28  ;;  %v5852_v30 = vunpack.i.l.bf16 %v5851_v28 }
 0x91a   : > { %v5467_v31 = vpack.c.bf16 %v5833_v50, %v5832_v14 }
 0x91b   : > { %v5841_v35 = vpop.permute.xlu1 %5840  ;;  %v5483_v37 = vpack.c.bf16 %v5853_v29, %v5852_v30 }
 0x91c   : > { %v5843_v7 = vunpack.i.h.bf16 %v5841_v35  ;;  %v5842_v42 = vunpack.i.l.bf16 %v5841_v35  ;;  %4983 = vmatmul.mubr.msk.f32.gmra.mrb[66].mxu1 %vm748_vm0, %v2764_v38  ;;  %5468 = vmatprep.subr.bf16.mxu0 %v5467_v31 }
 0x91d   : > { %4985 = vmatprep.mubr.msk.f32.mxu1 %vm748_vm0, %v2766_v25  ;;  %5470 = vmatpush3.bf16.msra.mxu0 %v5467_v31 }
 0x91e   : > { %5472 = vmatprep.subr.bf16.mxu0 %v5471_v16  ;;  %v5475_v61 = vpack.c.bf16 %v5843_v7, %v5842_v42 }
 0x91f   : > { %v5846_v59 = vpop.permute.xlu1 %5845 }
 0x920   : > { %v5848_v1 = vunpack.i.h.bf16 %v5846_v59  ;;  %v5847_v22 = vunpack.i.l.bf16 %v5846_v59  ;;  %4986 = vmatmul.mubr.msk.f32.gmra.mrb[68].mxu1 %vm748_vm0, %v2768_v32 }
 0x921   : > { %4988 = vmatprep.mubr.msk.f32.mxu1 %vm748_vm0, %v2770_v12  ;;  %5474 = vmatpush3.bf16.msra.mxu0 %v5471_v16 }
 0x922   : > { %5476 = vmatprep.subr.bf16.mxu0 %v5475_v61  ;;  %v5479_v0 = vpack.c.bf16 %v5848_v1, %v5847_v22 }
 0x924   : > { %4989 = vmatmul.mubr.msk.f32.gmra.mrb[70].mxu1 %vm748_vm0, %v2772_v44 }
 0x925   : > { %4991 = vmatprep.mubr.msk.f32.mxu1 %vm748_vm0, %v2774_v47  ;;  %5478 = vmatpush3.bf16.msra.mxu0 %v5475_v61 }
 0x926   : > { %5480 = vmatprep.subr.bf16.mxu0 %v5479_v0 }
 0x928   : > { %4992 = vmatmul.mubr.msk.f32.gmra.mrb[72].mxu1 %vm748_vm0, %v2776_v51 }
 0x929   : > { %4994 = vmatprep.mubr.msk.f32.mxu1 %vm748_vm0, %v2778_v24  ;;  %5482 = vmatpush3.bf16.msra.mxu0 %v5479_v0 }
 0x92a   : > { %5484 = vmatprep.subr.bf16.mxu0 %v5483_v37 }
 0x92c   : > { %4995 = vmatmul.mubr.msk.f32.gmra.mrb[74].mxu1 %vm748_vm0, %v2780_v54 }
 0x92d   : > { %4997 = vmatprep.mubr.msk.f32.mxu1 %vm748_vm0, %v2782_v52  ;;  %5486 = vmatpush3.bf16.msra.mxu0 %v5483_v37 }
 0x930   : > { %4998 = vmatmul.mubr.msk.f32.gmra.mrb[76].mxu1 %vm748_vm0, %v2784_v57 }
 0x931   : > { %5000 = vmatprep.mubr.msk.f32.mxu1 %vm748_vm0, %v2786_v5  ;;  %v8849_v5 = vld [vmem:[#allocation28_spill] sm:$0xff] }
 0x934   : > { %5001 = vmatmul.mubr.msk.f32.gmra.mrb[78].mxu1 %vm748_vm0, %v2788_v4 }
 0x97e   : > { %v8114_v45 = vpop.f32.mrb[48].mxu1 }
 0x97f   : > { %v8116_v20 = vpop.f32.mrb[49].mxu1 }
 0x9b7   : > { %v8118_v49 = vpop.f32.mrb[50].mxu1 }
 0x9b8   : > { %v8120_v58 = vpop.f32.mrb[51].mxu1 }
 0x9bc   : > { %v8122_v55 = vpop.f32.mrb[52].mxu1 }
 0x9bd   : > { %v8124_v3 = vpop.f32.mrb[53].mxu1 }
 0x9c3   : > { %v8126_v15 = vpop.f32.mrb[54].mxu1 }
 0x9c4   : > { %v8128_v23 = vpop.f32.mrb[55].mxu1 }
 0x9c7   : > { %v8130_v40 = vpop.f32.mrb[56].mxu1 }
 0x9c8   : > { %v5884_v9 = vpack.i.bf16 %v8130_v40, %v8114_v45  ;;  %v8134_v53 = vpop.f32.mrb[57].mxu1 }
 0x9c9   : > { %v5879_v56 = vpack.i.bf16 %v8134_v53, %v8116_v20  ;;  %v8871_v53 = vld [vmem:[#allocation64_spill] sm:$0xff] }
 0x9cb   : > { %v8138_v46 = vpop.f32.mrb[58].mxu1 }
 0x9cc   : > { %v5904_v8 = vpack.i.bf16 %v8138_v46, %v8118_v49  ;;  %v8142_v21 = vpop.f32.mrb[59].mxu1  ;;  %v8877_v46 = vld [vmem:[#allocation68_spill] sm:$0xff] }
 0x9cd   : > { %v5899_v38 = vpack.i.bf16 %v8142_v21, %v8120_v58 }
 0x9cf   : > { %v8146_v25 = vpop.f32.mrb[60].mxu1 }
 0x9d0   : > { %v5924_v41 = vpack.i.bf16 %v8146_v25, %v8122_v55  ;;  %v8150_v39 = vpop.f32.mrb[61].mxu1  ;;  %v8883_v25 = vld [vmem:[#allocation67_spill] sm:$0xff] }
 0x9d1   : > { %v5919_v19 = vpack.i.bf16 %v8150_v39, %v8124_v3 }
 0x9d7   : > { %v8154_v6 = vpop.f32.mrb[62].mxu1 }
 0x9d8   : > { %v5954_v18 = vpack.i.bf16 %v8154_v6, %v8126_v15  ;;  %v8158_v32 = vpop.f32.mrb[63].mxu1 }
 0x9d9   : > { %v5939_v12 = vpack.i.bf16 %v8158_v32, %v8128_v23 }
 0x9eb   : > { %v4981_v17 = vpop.f32.mrb[64].mxu1 }
 0x9ec   : > { %v3031_v43 = vsel %vm717_vm2, %v4981_v17, -1e+30  ;;  %v2951_v44 = vpop.f32.mrb[65].mxu1  ;;  %vm8850_vm2 = vcmp.ge.s32.totalorder %v8849_v5, %v8782_v34 }
 0x9ed   : > { %v3030_v47 = vsel %vm716_vm3, %v2951_v44, -1e+30  ;;  %3048 = vmax.xlane.f32.xlu1 %v3031_v43  ;;  %vm8857_vm3 = vmmov %vm8839_vm4 }
 0x9ee   : > { %3046 = vmax.xlane.f32.xlu0 %v3030_v47 }
 0x9ef   : > { %v4984_v27 = vpop.f32.mrb[66].mxu1 }
 0x9f0   : > { %v3033_v36 = vsel %vm8847_vm1, %v4984_v27, -1e+30  ;;  %v2961_v51 = vpop.f32.mrb[67].mxu1 }
 0x9f1   : > { %v3032_v48 = vsel %vm718_vm5, %v2961_v51, -1e+30  ;;  %vm8860_vm5 = vmmov %vm8841_vm6 }
 0x9f2   : > { %3052 = vmax.xlane.f32.xlu0 %v3033_v36 }
 0x9f3   : > { %v4987_v24 = vpop.f32.mrb[68].mxu1 }
 0x9f4   : > { %v3035_v10 = vsel %vm721_vm7, %v4987_v24, -1e+30  ;;  %v2971_v60 = vpop.f32.mrb[69].mxu1  ;;  %v8862_v24 = vld [vmem:[#allocation43_spill] sm:$0xff]  ;;  %vm3656_vm7 = vcmask 523264  }
 0x9f5   : > { %3056 = vmax.xlane.f32.xlu1 %v3035_v10  ;;  %v3034_v4 = vsel %vm8850_vm2, %v2971_v60, -1e+30 }
 0x9f6   : > { %3050 = vmax.xlane.f32.xlu0 %v3032_v48 }
 0x9f7   : > { %v4990_v54 = vpop.f32.mrb[70].mxu1 }
 0x9f8   : > { %v8180_v2 = vsel %vm723_vm9, %v4990_v54, -1e+30  ;;  %v2981_v57 = vpop.f32.mrb[71].mxu1 }
 0x9f9   : > { %3060 = vmax.xlane.f32.xlu1 %v8180_v2  ;;  %v8194_v33 = vsel %vm722_vm8, %v2981_v57, -1e+30  ;;  %vm3673_vm8 = vcmask 785408  }
 0x9fa   : > { %3054 = vmax.xlane.f32.xlu0 %v3034_v4 }
 0x9fb   : > { %v4993_v62 = vpop.f32.mrb[72].mxu1 }
 0x9fc   : > { %v8189_v63 = vsel %vm725_vm11, %v4993_v62, -1e+30  ;;  %v2991_v11 = vpop.f32.mrb[73].mxu1 }
 0x9fd   : > { %3064 = vmax.xlane.f32.xlu1 %v8189_v63  ;;  %v3038_v7 = vsel %vm724_vm10, %v2991_v11, -1e+30 }
 0x9fe   : > { %3058 = vmax.xlane.f32.xlu0 %v8194_v33 }
 0x9ff   : > { %v4996_v50 = vpop.f32.mrb[74].mxu1 }
 0xa00   : > { %v8201_v31 = vsel %vm727_vm13, %v4996_v50, -1e+30  ;;  %v3001_v35 = vpop.f32.mrb[75].mxu1 }
 0xa01   : > { %3068 = vmax.xlane.f32.xlu1 %v8201_v31  ;;  %v3040_v28 = vsel %vm8857_vm3, %v3001_v35, -1e+30 }
 0xa02   : > { %3062 = vmax.xlane.f32.xlu0 %v3038_v7 }
 0xa03   : > { %v4999_v42 = vpop.f32.mrb[76].mxu1 }
 0xa04   : > { %v8210_v61 = vsel %vm729_vm15, %v4999_v42, -1e+30  ;;  %v3011_v1 = vpop.f32.mrb[77].mxu1 }
 0xa05   : > { %3072 = vmax.xlane.f32.xlu1 %v8210_v61  ;;  %v8224_v44 = vsel %vm8860_vm5, %v3011_v1, -1e+30 }
 0xa06   : > { %3066 = vmax.xlane.f32.xlu0 %v3040_v28 }
 0xa07   : > { %v5002_v29 = vpop.f32.mrb[78].mxu1 }
 0xa08   : > { %v8219_v0 = vsel %vm731_vm14, %v5002_v29, -1e+30  ;;  %v3021_v37 = vpop.f32.mrb[79].mxu1 }
 0xa09   : > { %3076 = vmax.xlane.f32.xlu1 %v8219_v0  ;;  %v8231_v51 = vsel %vm730_vm12, %v3021_v37, -1e+30 }
 0xa0a   : > { %3070 = vmax.xlane.f32.xlu0 %v8224_v44 }
 0xa0e   : > { %3074 = vmax.xlane.f32.xlu0 %v8231_v51 }
 0xa1a   : > { %5855 = vrot.lane.b32.xlu1 %v8862_v24, %s6445_s30 }
 0xa7a   : > { %v3049_v60 = vpop.xlane.xlu1 %3048 }
 0xa7b   : > { %v3079_v54 = vsub.f32 %v3031_v43, %v3049_v60  ;;  %v3047_v52 = vpop.xlane.xlu0 %3046 }
 0xa7c   : > { %v3078_v57 = vsub.f32 %v3030_v47, %v3047_v52 }
 0xa7d   : > { %v3096_v5 = vmul.f32 1.442695, %v3079_v54 }
 0xa7e   : > { %v3094_v62 = vmul.f32 1.442695, %v3078_v57 }
 0xa7f   : > { %6181 = vpow2.f32 %v3096_v5  ;;  %v3053_v13 = vpop.xlane.xlu0 %3052 }
 0xa80   : > { %v3081_v11 = vsub.f32 %v3033_v36, %v3053_v13  ;;  %6183 = vpow2.f32 %v3094_v62 }
 0xa82   : > { %v3100_v26 = vmul.f32 1.442695, %v3081_v11  ;;  %v3057_v50 = vpop.xlane.xlu1 %3056 }
 0xa83   : > { %v3051_v34 = vpop.xlane.xlu0 %3050  ;;  %v3083_v14 = vsub.f32 %v3035_v10, %v3057_v50 }
 0xa84   : > { %6185 = vpow2.f32 %v3100_v26  ;;  %v3080_v35 = vsub.f32 %v3032_v48, %v3051_v34 }
 0xa85   : > { %v3104_v1 = vmul.f32 1.442695, %v3083_v14 }
 0xa86   : > { %v3098_v16 = vmul.f32 1.442695, %v3080_v35  ;;  %v3061_v42 = vpop.xlane.xlu1 %3060 }
 0xa87   : > { %v3055_v59 = vpop.xlane.xlu0 %3054  ;;  %v3085_v10 = vsub.f32 %v8180_v2, %v3061_v42 }
 0xa88   : > { %6187 = vpow2.f32 %v3098_v16  ;;  %v3082_v43 = vsub.f32 %v3034_v4, %v3055_v59 }
 0xa89   : > { %v8236_v22 = vpop.eup %6181  ;;  %6189 = vpow2.f32 %v3104_v1  ;;  %v3108_v27 = vmul.f32 1.442695, %v3085_v10  ;;  %v8863_v10 = vld [vmem:[#allocation22_spill] sm:$0xff] }
 0xa8a   : > { %v8238_v47 = vpop.xlane.xlu1 %3064  ;;  %3128 = vadd.xlane.f32.xlu0 %v8236_v22  ;;  %v3102_v29 = vmul.f32 1.442695, %v3082_v43  ;;  %v8241_v30 = vpop.eup %6183 }
 0xa8b   : > { %v3059_v36 = vpop.xlane.xlu0 %3058 }
 0xa8c   : > { %6191 = vpow2.f32 %v3102_v29  ;;  %v3084_v24 = vsub.f32 %v8194_v33, %v3059_v36 }
 0xa8e   : > { %v8244_v48 = vpop.eup %6185  ;;  %v3069_v37 = vpop.xlane.xlu1 %3068  ;;  %3126 = vadd.xlane.f32.xlu0 %v8241_v30  ;;  %v3106_v5 = vmul.f32 1.442695, %v3084_v24 }
 0xa8f   : > { %v3063_v17 = vpop.xlane.xlu0 %3062  ;;  %3132 = vadd.xlane.f32.xlu1 %v8244_v48 }
 0xa90   : > { %v3086_v4 = vsub.f32 %v3038_v7, %v3063_v17  ;;  %v8864_v17 = vld [vmem:[#allocation44_spill] sm:$0xff] }
 0xa92   : > { %v8249_v60 = vpop.eup %6187  ;;  %v3110_v54 = vmul.f32 1.442695, %v3086_v4  ;;  %v3073_v52 = vpop.xlane.xlu1 %3072  ;;  %v8865_v4 = vld [vmem:[#allocation63_spill] sm:$0xff] }
 0xa93   : > { %v3067_v57 = vpop.xlane.xlu0 %3066  ;;  %3130 = vadd.xlane.f32.xlu0 %v8249_v60  ;;  %v8252_v62 = vpop.eup %6189  ;;  %v3091_v20 = vsub.f32 %v8210_v61, %v3073_v52  ;;  %v8874_v61 = vld [vmem:[#allocation66_spill] sm:$0xff] }
 0xa94   : > { %6193 = vpow2.f32 %v3110_v54  ;;  %v3088_v2 = vsub.f32 %v3040_v28, %v3067_v57  ;;  %v3087_v54 = vsub.f32 %v8189_v63, %v8238_v47  ;;  %v8875_v47 = vld [vmem:[#allocation58_spill] sm:$0xff] }
 0xa95   : > { %6195 = vpow2.f32 %v3108_v27  ;;  %v8866_v27 = vld [vmem:[#allocation25_spill] sm:$0xff]  ;;  %v3120_v45 = vmul.f32 1.442695, %v3091_v20 }
 0xa96   : > { %v3114_v13 = vmul.f32 1.442695, %v3088_v2  ;;  %v3077_v11 = vpop.xlane.xlu1 %3076  ;;  %v8256_v7 = vpop.eup %6191  ;;  %v8867_v24 = vpack.i.bf16 %v8865_v4, %v8866_v27  ;;  %v3112_v57 = vmul.f32 1.442695, %v3087_v54  ;;  %v3089_v2 = vsub.f32 %v8201_v31, %v3069_v37 }
 0xa97   : > { %v3071_v26 = vpop.xlane.xlu0 %3070  ;;  %3136 = vadd.xlane.f32.xlu0 %v8252_v62  ;;  %v3093_v40 = vsub.f32 %v8219_v0, %v3077_v11  ;;  %v8876_v37 = vpack.i.bf16 %v8874_v61, %v8875_v47 }
 0xa98   : > { %6197 = vpow2.f32 %v3114_v13  ;;  %v3090_v33 = vsub.f32 %v8224_v44, %v3071_v26  ;;  %v8869_v13 = vld [vmem:[#allocation17_spill] sm:$0xff] }
 0xa99   : > { %6199 = vpow2.f32 %v3106_v5  ;;  %v8868_v5 = vld [vmem:[#allocation65_spill] sm:$0xff] }
 0xa9a   : > { %v3118_v50 = vmul.f32 1.442695, %v3090_v33  ;;  %v5856_v34 = vpop.permute.xlu1 %5855  ;;  %v8870_v26 = vpack.i.bf16 %v8868_v5, %v8869_v13  ;;  %v3116_v33 = vmul.f32 1.442695, %v3089_v2 }
 0xa9b   : > { %v5858_v14 = vunpack.i.h.bf16 %v5856_v34  ;;  %v5857_v35 = vunpack.i.l.bf16 %v5856_v34  ;;  %3134 = vadd.xlane.f32.xlu0 %v8256_v7  ;;  %v3075_v28 = vpop.xlane.xlu0 %3074  ;;  %v8881_v34 = vld [vmem:[#allocation24_spill] sm:$0xff] }
 0xa9c   : > { %6201 = vpow2.f32 %v3118_v50  ;;  %v3092_v16 = vsub.f32 %v8231_v51, %v3075_v28  ;;  %v8880_v50 = vld [vmem:[#allocation62_spill] sm:$0xff]  ;;  %v8887_v28 = vld [vmem:[#allocation61_spill] sm:$0xff] }
 0xa9d   : > { %v5487_v42 = vpack.c.bf16 %v5858_v14, %v5857_v35  ;;  %v8882_v55 = vpack.i.bf16 %v8880_v50, %v8881_v34  ;;  %v8886_v35 = vld [vmem:[#allocation69_spill] sm:$0xff] }
 0xa9e   : > { %v8260_v59 = vpop.eup %6193  ;;  %v3122_v1 = vmul.f32 1.442695, %v3092_v16  ;;  %v8888_v16 = vpack.i.bf16 %v8886_v35, %v8887_v28 }
 0xa9f   : > { %v8262_v43 = vpop.eup %6195  ;;  %3142 = vadd.xlane.f32.xlu1 %v8260_v59  ;;  %5488 = vmatprep.subr.bf16.mxu0 %v5487_v42 }
 0xaa0   : > { %6203 = vpow2.f32 %v3122_v1  ;;  %3140 = vadd.xlane.f32.xlu0 %v8262_v43  ;;  %5490 = vmatpush3.bf16.msra.mxu0 %v5487_v42 }
 0xaa1   : > { %6205 = vpow2.f32 %v3112_v57 }
 0xaa2   : > { %v8266_v44 = vpop.eup %6197  ;;  %6207 = vpow2.f32 %v3116_v33 }
 0xaa3   : > { %v8268_v36 = vpop.eup %6199  ;;  %3146 = vadd.xlane.f32.xlu1 %v8266_v44  ;;  %6209 = vpow2.f32 %v3120_v45 }
 0xaa4   : > { %3138 = vadd.xlane.f32.xlu0 %v8268_v36 }
 0xaa6   : > { %v8272_v51 = vpop.eup %6201 }
 0xaa7   : > { %3150 = vadd.xlane.f32.xlu1 %v8272_v51 }
 0xaaa   : > { %v8275_v29 = vpop.eup %6203 }
 0xaab   : > { %3154 = vadd.xlane.f32.xlu1 %v8275_v29  ;;  %v8311_v31 = vpop.eup %6205 }
 0xaac   : > { %v8318_v52 = vpop.eup %6207 }
 0xaad   : > { %v8325_v49 = vpop.eup %6209 }
 0xaba   : > { %5860 = vrot.lane.b32.xlu0 %v8863_v10, %s6445_s30 }
 0xabc   : > { %5865 = vrot.lane.b32.xlu1 %v8864_v17, %s6445_s30 }
 0xac0   : > { %5870 = vrot.lane.b32.xlu1 %v8867_v24, %s6445_s30 }
 0xac4   : > { %5880 = vrot.lane.b32.xlu1 %v5879_v56, %s6444_s18  ;;  %v8872_v56 = vld [vmem:[#allocation15_spill] sm:$0xff] }
 0xac5   : > { %v8873_v63 = vpack.i.bf16 %v8871_v53, %v8872_v56 }
 0xac8   : > { %5885 = vrot.lane.b32.xlu1 %v5884_v9, %s6444_s18  ;;  %v3124_v9 = vmul.f32 1.442695, %v3093_v40 }
 0xaca   : > { %6211 = vpow2.f32 %v3124_v9 }
 0xacc   : > { %5890 = vrot.lane.b32.xlu1 %v8870_v26, %s6445_s30 }
 0xad0   : > { %5895 = vrot.lane.b32.xlu1 %v8873_v63, %s6445_s30 }
 0xad4   : > { %5905 = vrot.lane.b32.xlu1 %v5904_v8, %s6444_s18  ;;  %v8878_v8 = vld [vmem:[#allocation60_spill] sm:$0xff]  ;;  %v8332_v11 = vpop.eup %6211 }
 0xad5   : > { %v8879_v0 = vpack.i.bf16 %v8877_v46, %v8878_v8 }
 0xad8   : > { %5915 = vrot.lane.b32.xlu1 %v8876_v37, %s6445_s30 }
 0xad9   : > { %3144 = vadd.xlane.f32.xlu0 %v8311_v31 }
 0xadc   : > { %5925 = vrot.lane.b32.xlu1 %v5924_v41, %s6444_s18  ;;  %v8884_v41 = vld [vmem:[#allocation59_spill] sm:$0xff] }
 0xadd   : > { %3148 = vadd.xlane.f32.xlu0 %v8318_v52  ;;  %v8885_v14 = vpack.i.bf16 %v8883_v25, %v8884_v41 }
 0xae0   : > { %5935 = vrot.lane.b32.xlu1 %v8879_v0, %s6445_s30 }
 0xae1   : > { %3152 = vadd.xlane.f32.xlu0 %v8325_v49 }
 0xae5   : > { %3156 = vadd.xlane.f32.xlu0 %v8332_v11 }
 0xafb   : > { %5875 = vrot.lane.b32.xlu0 %v8882_v55, %s6445_s30 }
 0xaff   : > { %5900 = vrot.lane.b32.xlu0 %v5899_v38, %s6444_s18 }
 0xb03   : > { %5910 = vrot.lane.b32.xlu0 %v8885_v14, %s6445_s30 }
 0xb07   : > { %5920 = vrot.lane.b32.xlu0 %v5919_v19, %s6444_s18 }
 0xb0b   : > { %5930 = vrot.lane.b32.xlu0 %v8888_v16, %s6445_s30 }
 0xb0f   : > { %5940 = vrot.lane.b32.xlu0 %v5939_v12, %s6444_s18 }
 0xb17   : > { %v3129_v58 = vpop.xlane.xlu0 %3128 }
 0xb18   : > { %6213 = vrcp.f32 %v3129_v58 }
 0xb1b   : > { %v3127_v21 = vpop.xlane.xlu0 %3126 }
 0xb1c   : > { %6215 = vrcp.f32 %v3127_v21  ;;  %v3133_v38 = vpop.xlane.xlu1 %3132 }
 0xb1d   : > { %6217 = vrcp.f32 %v3133_v38 }
 0xb20   : > { %v3131_v42 = vpop.xlane.xlu0 %3130 }
 0xb21   : > { %6219 = vrcp.f32 %v3131_v42 }
 0xb22   : > { %v6214_v3 = vpop.eup %6213 }
 0xb23   : > { %v3175_v39 = vmul.f32 %v6214_v3, %v3129_v58 }
 0xb24   : > { %v3137_v19 = vpop.xlane.xlu0 %3136 }
 0xb25   : > { %v3191_v1 = vsub.f32 2.0, %v3175_v39  ;;  %6221 = vrcp.f32 %v3137_v19 }
 0xb26   : > { %v6216_v10 = vpop.eup %6215 }
 0xb27   : > { %v6218_v17 = vpop.eup %6217  ;;  %v3207_v4 = vmul.f32 %v6214_v3, %v3191_v1  ;;  %v3174_v27 = vmul.f32 %v6216_v10, %v3127_v21 }
 0xb28   : > { %v3177_v23 = vmul.f32 %v6218_v17, %v3133_v38  ;;  %v3135_v32 = vpop.xlane.xlu0 %3134 }
 0xb29   : > { %v8360_v12 = vmul.f32 %v8236_v22, %v3207_v4  ;;  %v3190_v24 = vsub.f32 2.0, %v3174_v27  ;;  %6223 = vrcp.f32 %v3135_v32 }
 0xb2a   : > { %v3193_v54 = vsub.f32 2.0, %v3177_v23 }
 0xb2b   : > { %v6220_v57 = vpop.eup %6219  ;;  %4208 = vst [vmem:[%s7325_s19 + $0x188] sm:$0xff] %v8360_v12  ;;  %v3206_v2 = vmul.f32 %v6216_v10, %v3190_v24 }
 0xb2c   : > { %v3209_v5 = vmul.f32 %v6218_v17, %v3193_v54  ;;  %v3176_v13 = vmul.f32 %v6220_v57, %v3131_v42  ;;  %v3143_v26 = vpop.xlane.xlu1 %3142 }
 0xb2d   : > { %6225 = vrcp.f32 %v3143_v26  ;;  %v3141_v33 = vpop.xlane.xlu0 %3140  ;;  %v3222_v20 = vmul.f32 %v8241_v30, %v3206_v2 }
 0xb2e   : > { %v3192_v53 = vsub.f32 2.0, %v3176_v13  ;;  %6227 = vrcp.f32 %v3141_v33  ;;  %v8366_v22 = vmul.f32 %v8244_v48, %v3209_v5 }
 0xb2f   : > { %v6222_v56 = vpop.eup %6221  ;;  %4207 = vst [vmem:[%s7325_s19 + $0x180] sm:$0xff] %v3222_v20  ;;  %5035 = vmatprep.mubr.f32.mxu0 %v3222_v20 }
 0xb30   : > { %v3208_v63 = vmul.f32 %v6220_v57, %v3192_v53  ;;  %v3179_v45 = vmul.f32 %v6222_v56, %v3137_v19  ;;  %v3147_v40 = vpop.xlane.xlu1 %3146  ;;  %4210 = vst [vmem:[%s7325_s19 + $0x198] sm:$0xff] %v8366_v22 }
 0xb31   : > { %6229 = vrcp.f32 %v3147_v40  ;;  %v3139_v9 = vpop.xlane.xlu0 %3138 }
 0xb32   : > { %v3195_v61 = vsub.f32 2.0, %v3179_v45  ;;  %6231 = vrcp.f32 %v3139_v9  ;;  %v3224_v30 = vmul.f32 %v8249_v60, %v3208_v63 }
 0xb33   : > { %v6224_v47 = vpop.eup %6223 }
 0xb34   : > { %v3211_v37 = vmul.f32 %v6222_v56, %v3195_v61  ;;  %v3178_v48 = vmul.f32 %v6224_v47, %v3135_v32  ;;  %v3151_v46 = vpop.xlane.xlu1 %3150  ;;  %4209 = vst [vmem:[%s7325_s19 + $0x190] sm:$0xff] %v3224_v30 }
 0xb35   : > { %6233 = vrcp.f32 %v3151_v46  ;;  %v5861_v8 = vpop.permute.xlu0 %5860 }
 0xb36   : > { %v3194_v0 = vsub.f32 2.0, %v3178_v48  ;;  %v5863_v50 = vunpack.i.h.bf16 %v5861_v8  ;;  %v5862_v34 = vunpack.i.l.bf16 %v5861_v8  ;;  %v3227_v55 = vmul.f32 %v8252_v62, %v3211_v37 }
 0xb37   : > { %v6226_v25 = vpop.eup %6225 }
 0xb38   : > { %v6228_v41 = vpop.eup %6227  ;;  %v3210_v14 = vmul.f32 %v6224_v47, %v3194_v0  ;;  %v3182_v35 = vmul.f32 %v6226_v25, %v3143_v26  ;;  %v5491_v28 = vpack.c.bf16 %v5863_v50, %v5862_v34  ;;  %v3155_v60 = vpop.xlane.xlu1 %3154  ;;  %4212 = vst [vmem:[%s7325_s19 + $0x1a8] sm:$0xff] %v3227_v55 }
 0xb39   : > { %v3181_v16 = vmul.f32 %v6228_v41, %v3141_v33  ;;  %6235 = vrcp.f32 %v3155_v60 }
 0xb3a   : > { %v3198_v58 = vsub.f32 2.0, %v3182_v35  ;;  %5492 = vmatprep.subr.bf16.mxu0 %v5491_v28  ;;  %v3226_v21 = vmul.f32 %v8256_v7, %v3210_v14 }
 0xb3b   : > { %v6230_v38 = vpop.eup %6229  ;;  %v3197_v42 = vsub.f32 2.0, %v3181_v16  ;;  %5494 = vmatpush3.bf16.msra.mxu0 %v5491_v28  ;;  %v3690_v28 = vld [vmem:[#allocation7] sm:$0xff] }
 0xb3c   : > { %v6232_v3 = vpop.eup %6231  ;;  %v3214_v39 = vmul.f32 %v6226_v25, %v3198_v58  ;;  %v3184_v62 = vmul.f32 %v6230_v38, %v3147_v40  ;;  %v5866_v19 = vpop.permute.xlu1 %5865  ;;  %4211 = vst [vmem:[%s7325_s19 + $0x1a0] sm:$0xff] %v3226_v21  ;;  %v3693_v58 = vld [vmem:[#allocation7 + $0x18] sm:$0xff] }
 0xb3d   : > { %v3213_v1 = vmul.f32 %v6228_v41, %v3197_v42  ;;  %v3180_v10 = vmul.f32 %v6232_v3, %v3139_v9  ;;  %v5868_v17 = vunpack.i.h.bf16 %v5866_v19  ;;  %v5867_v4 = vunpack.i.l.bf16 %v5866_v19  ;;  %v3695_v42 = vld [vmem:[#allocation7 + $0x28] sm:$0xff] }
 0xb3e   : > { %v3200_v27 = vsub.f32 2.0, %v3184_v62  ;;  %v3230_v23 = vmul.f32 %v8260_v59, %v3214_v39  ;;  %v3697_v39 = vld [vmem:[#allocation7 + $0x38] sm:$0xff]  ;;  %v3698_v62 = vld [vmem:[#allocation7 + $0x40] sm:$0xff]  ;;  %v3699_v19 = vld [vmem:[#allocation7 + $0x48] sm:$0xff] }
 0xb3f   : > { %v6234_v32 = vpop.eup %6233  ;;  %v3196_v24 = vsub.f32 2.0, %v3180_v10  ;;  %v5495_v7 = vpack.c.bf16 %v5868_v17, %v5867_v4  ;;  %v3229_v54 = vmul.f32 %v8262_v43, %v3213_v1  ;;  %v5515_v1 = vpack.c.bf16 %v3699_v19, %v3698_v62  ;;  %v3700_v10 = vld [vmem:[#allocation7 + $0x50] sm:$0xff]  ;;  %v3701_v17 = vld [vmem:[#allocation7 + $0x58] sm:$0xff] }
 0xb40   : > { %v3216_v57 = vmul.f32 %v6230_v38, %v3200_v27  ;;  %v3186_v2 = vmul.f32 %v6234_v32, %v3151_v46  ;;  %4215 = vst [vmem:[%s7325_s19 + $0x1c0] sm:$0xff] %v3230_v23  ;;  %v3694_v38 = vld [vmem:[#allocation7 + $0x20] sm:$0xff]  ;;  %v5519_v4 = vpack.c.bf16 %v3701_v17, %v3700_v10 }
 0xb41   : > { %v3212_v5 = vmul.f32 %v6232_v3, %v3196_v24  ;;  %5496 = vmatprep.subr.bf16.mxu0 %v5495_v7  ;;  %4214 = vst [vmem:[%s7325_s19 + $0x1b8] sm:$0xff] %v3229_v54  ;;  %v3696_v3 = vld [vmem:[#allocation7 + $0x30] sm:$0xff] }
 0xb42   : > { %v3202_v13 = vsub.f32 2.0, %v3186_v2  ;;  %5498 = vmatpush3.bf16.msra.mxu0 %v5495_v7  ;;  %v3232_v26 = vmul.f32 %v8266_v44, %v3216_v57 }
 0xb43   : > { %v6236_v59 = vpop.eup %6235  ;;  %v3228_v33 = vmul.f32 %v8268_v36, %v3212_v5  ;;  %v3702_v5 = vld [vmem:[#allocation7 + $0x60] sm:$0xff] }
 0xb44   : > { %v3218_v20 = vmul.f32 %v6234_v32, %v3202_v13  ;;  %v3188_v53 = vmul.f32 %v6236_v59, %v3155_v60  ;;  %4217 = vst [vmem:[%s7325_s19 + $0x1d0] sm:$0xff] %v3232_v26  ;;  %v3691_v60 = vld [vmem:[#allocation7 + $0x8] sm:$0xff] }
 0xb45   : > { %5036 = vmatmul.mubr.f32.vlgmr.msra.gmra.mrb[80].mxu0 %v8360_v12  ;;  %4213 = vst [vmem:[%s7325_s19 + $0x1b0] sm:$0xff] %v3228_v33  ;;  %v5499_v16 = vpack.c.bf16 %v3691_v60, %v3690_v28  ;;  %v3703_v13 = vld [vmem:[#allocation7 + $0x68] sm:$0xff] }
 0xb46   : > { %v3204_v43 = vsub.f32 2.0, %v3188_v53  ;;  %5038 = vmatprep.mubr.f32.mxu0 %v3224_v30  ;;  %v3234_v56 = vmul.f32 %v8272_v51, %v3218_v20 }
 0xb47   : > { %5500 = vmatprep.subr.bf16.mxu0 %v5499_v16  ;;  %5531 = vmatprep.subr.bf16.mxu1 %v5499_v16 }
 0xb48   : > { %v3220_v63 = vmul.f32 %v6236_v59, %v3204_v43  ;;  %4219 = vst [vmem:[%s7325_s19 + $0x1e0] sm:$0xff] %v3234_v56  ;;  %5502 = vmatpush3.bf16.msra.mxu0 %v5499_v16  ;;  %5539 = vmatpush3.bf16.msra.mxu1 %v5499_v16  ;;  %v3704_v59 = vld [vmem:[#allocation7 + $0x70] sm:$0xff] }
 0xb49   : > { %5039 = vmatmul.mubr.f32.gmra.mrb[82].mxu0 %v8366_v22 }
 0xb4a   : > { %5041 = vmatprep.mubr.f32.mxu0 %v3226_v21  ;;  %v3236_v44 = vmul.f32 %v8275_v29, %v3220_v63 }
 0xb4c   : > { %4221 = vst [vmem:[%s7325_s19 + $0x1f0] sm:$0xff] %v3236_v44 }
 0xb4d   : > { %5042 = vmatmul.mubr.f32.gmra.mrb[84].mxu0 %v3227_v55 }
 0xb4e   : > { %5044 = vmatprep.mubr.f32.mxu0 %v3228_v33  ;;  %v3705_v33 = vld [vmem:[#allocation7 + $0x78] sm:$0xff] }
 0xb4f   : > { %v5527_v20 = vpack.c.bf16 %v3705_v33, %v3704_v59 }
 0xb51   : > { %5045 = vmatmul.mubr.f32.gmra.mrb[86].mxu0 %v3229_v54 }
 0xb52   : > { %5047 = vmatprep.mubr.f32.mxu0 %v3230_v23 }
 0xb66   : > { %v3145_v36 = vpop.xlane.xlu0 %3144 }
 0xb67   : > { %6237 = vrcp.f32 %v3145_v36 }
 0xb6a   : > { %v3149_v12 = vpop.xlane.xlu0 %3148 }
 0xb6b   : > { %6239 = vrcp.f32 %v3149_v12 }
 0xb6e   : > { %v3153_v45 = vpop.xlane.xlu0 %3152 }
 0xb6f   : > { %6241 = vrcp.f32 %v3153_v45 }
 0xb71   : > { %v6238_v51 = vpop.eup %6237 }
 0xb72   : > { %v3183_v40 = vmul.f32 %v6238_v51, %v3145_v36  ;;  %v3157_v9 = vpop.xlane.xlu0 %3156 }
 0xb73   : > { %6243 = vrcp.f32 %v3157_v9 }
 0xb74   : > { %v3199_v22 = vsub.f32 2.0, %v3183_v40 }
 0xb75   : > { %v6240_v61 = vpop.eup %6239 }
 0xb76   : > { %v3215_v29 = vmul.f32 %v6238_v51, %v3199_v22  ;;  %v3185_v30 = vmul.f32 %v6240_v61, %v3149_v12  ;;  %v5876_v15 = vpop.permute.xlu0 %5875 }
 0xb78   : > { %v3201_v47 = vsub.f32 2.0, %v3185_v30  ;;  %v3231_v37 = vmul.f32 %v8311_v31, %v3215_v29 }
 0xb79   : > { %v6242_v48 = vpop.eup %6241 }
 0xb7a   : > { %v3217_v46 = vmul.f32 %v6240_v61, %v3201_v47  ;;  %v3187_v8 = vmul.f32 %v6242_v48, %v3153_v45  ;;  %4216 = vst [vmem:[%s7325_s19 + $0x1c8] sm:$0xff] %v3231_v37  ;;  %5048 = vmatmul.mubr.f32.gmra.mrb[88].mxu0 %v3231_v37  ;;  %v5871_v37 = vpop.permute.xlu1 %5870 }
 0xb7b   : > { %5050 = vmatprep.mubr.f32.mxu0 %v3232_v26  ;;  %v5523_v26 = vpack.c.bf16 %v3703_v13, %v3702_v5  ;;  %v8894_v13 = vld [vmem:[#allocation50_spill] sm:$0xff] }
 0xb7c   : > { %v3203_v0 = vsub.f32 2.0, %v3187_v8  ;;  %v3233_v50 = vmul.f32 %v8318_v52, %v3217_v46  ;;  %v3692_v52 = vld [vmem:[#allocation7 + $0x10] sm:$0xff] }
 0xb7d   : > { %v6244_v34 = vpop.eup %6243  ;;  %v5503_v21 = vpack.c.bf16 %v3693_v58, %v3692_v52  ;;  %v5877_v58 = vunpack.i.l.bf16 %v5876_v15 }
 0xb7e   : > { %v3219_v55 = vmul.f32 %v6242_v48, %v3203_v0  ;;  %v3189_v25 = vmul.f32 %v6244_v34, %v3157_v9  ;;  %4218 = vst [vmem:[%s7325_s19 + $0x1d8] sm:$0xff] %v3233_v50  ;;  %5051 = vmatmul.mubr.f32.gmra.mrb[90].mxu0 %v3233_v50  ;;  %v5881_v48 = vpop.permute.xlu1 %5880 }
 0xb7f   : > { %5053 = vmatprep.mubr.f32.mxu0 %v3234_v56  ;;  %5504 = vmatprep.subr.bf16.mxu0 %v5503_v21  ;;  %v5882_v28 = vunpack.i.l.bf16 %v5881_v48 }
 0xb80   : > { %v3205_v41 = vsub.f32 2.0, %v3189_v25  ;;  %v3235_v31 = vmul.f32 %v8325_v49, %v3219_v55  ;;  %5532 = vmatprep.subr.bf16.mxu1 %v5503_v21  ;;  %v5507_v49 = vpack.c.bf16 %v3695_v42, %v3694_v38  ;;  %5506 = vmatpush3.bf16.msra.mxu0 %v5503_v21  ;;  %v8889_v38 = vld [vmem:[#allocation40_spill] sm:$0xff] }
 0xb81   : > { %5540 = vmatpush3.bf16.msra.mxu1 %v5503_v21  ;;  %v5878_v21 = vunpack.i.h.bf16 %v5876_v15 }
 0xb82   : > { %v3221_v14 = vmul.f32 %v6244_v34, %v3205_v41  ;;  %4220 = vst [vmem:[%s7325_s19 + $0x1e8] sm:$0xff] %v3235_v31  ;;  %5054 = vmatmul.mubr.f32.gmra.mrb[92].mxu0 %v3235_v31  ;;  %5508 = vmatprep.subr.bf16.mxu0 %v5507_v49  ;;  %v5886_v46 = vpop.permute.xlu1 %5885  ;;  %v5873_v41 = vunpack.i.h.bf16 %v5871_v37  ;;  %v5872_v31 = vunpack.i.l.bf16 %v5871_v37 }
 0xb83   : > { %5056 = vmatprep.mubr.f32.mxu0 %v3236_v44  ;;  %5533 = vmatprep.subr.bf16.mxu1 %v5507_v49 }
 0xb84   : > { %v3237_v35 = vmul.f32 %v8332_v11, %v3221_v14  ;;  %v5511_v11 = vpack.c.bf16 %v3697_v39, %v3696_v3  ;;  %5510 = vmatpush3.bf16.msra.mxu0 %v5507_v49  ;;  %v3640_v42 = vsel %vm748_vm0, %v8889_v38, %v5872_v31  ;;  %v5888_v39 = vunpack.i.h.bf16 %v5886_v46 }
 0xb85   : > { %5541 = vmatpush3.bf16.msra.mxu1 %v5507_v49  ;;  %v8890_v49 = vld [vmem:[#allocation51_spill] sm:$0xff]  ;;  %v3657_v62 = vsel %vm3656_vm7, %v3640_v42, %v5882_v28 }
 0xb86   : > { %4222 = vst [vmem:[%s7325_s19 + $0x1f8] sm:$0xff] %v3237_v35  ;;  %5057 = vmatmul.mubr.f32.gmra.mrb[94].mxu0 %v3237_v35  ;;  %5512 = vmatprep.subr.bf16.mxu0 %v5511_v11  ;;  %v5891_v8 = vpop.permute.xlu1 %5890  ;;  %v5883_v35 = vunpack.i.h.bf16 %v5881_v48  ;;  %v3648_v3 = vsel %vm748_vm0, %v8890_v49, %v5873_v41  ;;  %v8895_v41 = vld [vmem:[#allocation23_spill] sm:$0xff] }
 0xb87   : > { %5534 = vmatprep.subr.bf16.mxu1 %v5511_v11  ;;  %v5893_v52 = vunpack.i.h.bf16 %v5891_v8  ;;  %v5892_v16 = vunpack.i.l.bf16 %v5891_v8 }
 0xb88   : > { %5514 = vmatpush3.bf16.msra.mxu0 %v5511_v11  ;;  %v3665_v19 = vsel %vm3656_vm7, %v3648_v3, %v5883_v35  ;;  %v8896_v35 = vld [vmem:[#allocation52_spill] sm:$0xff] }
 0xb89   : > { %5542 = vmatpush3.bf16.msra.mxu1 %v5511_v11  ;;  %5516 = vmatprep.subr.bf16.mxu0 %v5515_v1 }
 0xb8a   : > { %5535 = vmatprep.subr.bf16.mxu1 %v5515_v1  ;;  %v8411_v6 = vpop.permute.xlu1 %5895 }
 0xb8b   : > { %v5898_v10 = vunpack.i.h.bf16 %v8411_v6 }
 0xb8c   : > { %5518 = vmatpush3.bf16.msra.mxu0 %v5515_v1 }
 0xb8d   : > { %5543 = vmatpush3.bf16.msra.mxu1 %v5515_v1  ;;  %5520 = vmatprep.subr.bf16.mxu0 %v5519_v4  ;;  %v5887_v1 = vunpack.i.l.bf16 %v5886_v46  ;;  %v3651_v28 = vsel %vm748_vm0, %v8896_v35, %v5898_v10 }
 0xb8e   : > { %5536 = vmatprep.subr.bf16.mxu1 %v5519_v4  ;;  %v8413_v0 = vpop.permute.xlu1 %5905 }
 0xb8f   : > { %v5907_v5 = vunpack.i.l.bf16 %v8413_v0 }
 0xb90   : > { %5522 = vmatpush3.bf16.msra.mxu0 %v5519_v4 }
 0xb91   : > { %5544 = vmatpush3.bf16.msra.mxu1 %v5519_v4  ;;  %5524 = vmatprep.subr.bf16.mxu0 %v5523_v26  ;;  %v8891_v4 = vld [vmem:[#allocation16_spill] sm:$0xff] }
 0xb92   : > { %5537 = vmatprep.subr.bf16.mxu1 %v5523_v26  ;;  %v8417_v34 = vpop.permute.xlu1 %5915 }
 0xb94   : > { %5526 = vmatpush3.bf16.msra.mxu0 %v5523_v26 }
 0xb95   : > { %5545 = vmatpush3.bf16.msra.mxu1 %v5523_v26  ;;  %5528 = vmatprep.subr.bf16.mxu0 %v5527_v20  ;;  %v3649_v26 = vsel %vm748_vm0, %v8894_v13, %v5878_v21  ;;  %v8898_v21 = vld [vmem:[#allocation54_spill] sm:$0xff] }
 0xb96   : > { %5538 = vmatprep.subr.bf16.mxu1 %v5527_v20  ;;  %v8421_v25 = vpop.permute.xlu1 %5925 }
 0xb97   : > { %v5927_v37 = vunpack.i.l.bf16 %v8421_v25 }
 0xb98   : > { %5530 = vmatpush3.bf16.msra.mxu0 %v5527_v20 }
 0xb99   : > { %5546 = vmatpush3.bf16.msra.mxu1 %v5527_v20  ;;  %v5918_v20 = vunpack.i.h.bf16 %v8417_v34 }
 0xb9a   : > { %v8425_v60 = vpop.permute.xlu1 %5935 }
 0xb9b   : > { %v3653_v38 = vsel %vm748_vm0, %v8898_v21, %v5918_v20  ;;  %v5938_v20 = vunpack.i.h.bf16 %v8425_v60 }
 0xc18   : > { %v5037_v27 = vpop.f32.mrb[80].mxu0 }
 0xc19   : > { %v3369_v23 = vpop.f32.mrb[81].mxu0 }
 0xc1c   : > { %v5040_v32 = vpop.f32.mrb[82].mxu0 }
 0xc1d   : > { %v3379_v24 = vpop.f32.mrb[83].mxu0 }
 0xc20   : > { %v5043_v7 = vpop.f32.mrb[84].mxu0 }
 0xc21   : > { %v3389_v54 = vpop.f32.mrb[85].mxu0 }
 0xc24   : > { %v5046_v57 = vpop.f32.mrb[86].mxu0 }
 0xc25   : > { %v3399_v2 = vpop.f32.mrb[87].mxu0 }
 0xc4d   : > { %v5049_v53 = vpop.f32.mrb[88].mxu0 }
 0xc4e   : > { %v5944_v43 = vpack.i.bf16 %v5049_v53, %v5037_v27  ;;  %v3409_v56 = vpop.f32.mrb[89].mxu0  ;;  %v3642_v27 = vsel %vm748_vm0, %v8891_v4, %v5892_v16  ;;  %v5917_v53 = vunpack.i.l.bf16 %v8417_v34  ;;  %v8900_v4 = vld [vmem:[#allocation55_spill] sm:$0xff] }
 0xc4f   : > { %v5949_v63 = vpack.i.bf16 %v3409_v56, %v3369_v23  ;;  %v8892_v23 = vld [vmem:[#allocation53_spill] sm:$0xff] }
 0xc50   : > { %5945 = vrot.lane.b32.xlu1 %v5944_v43, %s6443_s17 }
 0xc51   : > { %v5052_v44 = vpop.f32.mrb[90].mxu0 }
 0xc52   : > { %v5959_v36 = vpack.i.bf16 %v5052_v44, %v5040_v32  ;;  %v3419_v12 = vpop.f32.mrb[91].mxu0  ;;  %v3650_v32 = vsel %vm748_vm0, %v8892_v23, %v5893_v52 }
 0xc53   : > { %v5964_v45 = vpack.i.bf16 %v3419_v12, %v3379_v24  ;;  %v5897_v24 = vunpack.i.l.bf16 %v8411_v6 }
 0xc54   : > { %5950 = vrot.lane.b32.xlu1 %v5949_v63, %s6443_s17  ;;  %v5928_v63 = vunpack.i.h.bf16 %v8421_v25 }
 0xc55   : > { %5965 = vrot.lane.b32.xlu0 %v5964_v45, %s6443_s17  ;;  %v5055_v51 = vpop.f32.mrb[92].mxu0  ;;  %v3643_v31 = vsel %vm748_vm0, %v8895_v41, %v5897_v24 }
 0xc56   : > { %v5969_v40 = vpack.i.bf16 %v5055_v51, %v5043_v7  ;;  %v3429_v9 = vpop.f32.mrb[93].mxu0  ;;  %v5908_v7 = vunpack.i.h.bf16 %v8413_v0  ;;  %v3660_v52 = vsel %vm3656_vm7, %v3643_v31, %v5907_v5 }
 0xc57   : > { %v5974_v22 = vpack.i.bf16 %v3429_v9, %v3389_v54  ;;  %v8893_v54 = vld [vmem:[#allocation21_spill] sm:$0xff]  ;;  %v3666_v9 = vsel %vm3656_vm7, %v3649_v26, %v5888_v39  ;;  %v3670_v39 = vsel %vm3656_vm7, %v3653_v38, %v5928_v63 }
 0xc58   : > { %5955 = vrot.lane.b32.xlu1 %v5954_v18, %s6444_s18  ;;  %v5901_v18 = vpop.permute.xlu0 %5900  ;;  %v3668_v16 = vsel %vm3656_vm7, %v3651_v28, %v5908_v7 }
 0xc59   : > { %5975 = vrot.lane.b32.xlu0 %v5974_v22, %s6443_s17  ;;  %v5058_v61 = vpop.f32.mrb[94].mxu0  ;;  %v5903_v59 = vunpack.i.h.bf16 %v5901_v18 }
 0xc5a   : > { %v5984_v29 = vpack.i.bf16 %v5058_v61, %v5046_v57  ;;  %v3439_v30 = vpop.f32.mrb[95].mxu0  ;;  %v3641_v57 = vsel %vm748_vm0, %v8893_v54, %v5877_v58 }
 0xc5b   : > { %v5979_v47 = vpack.i.bf16 %v3439_v30, %v3399_v2  ;;  %v5902_v2 = vunpack.i.l.bf16 %v5901_v18  ;;  %v3658_v45 = vsel %vm3656_vm7, %v3641_v57, %v5887_v1  ;;  %v8899_v1 = vld [vmem:[#allocation47_spill] sm:$0xff] }
 0xc5c   : > { %5960 = vrot.lane.b32.xlu1 %v5959_v36, %s6443_s17  ;;  %v8415_v50 = vpop.permute.xlu0 %5910 }
 0xc5d   : > { %5980 = vrot.lane.b32.xlu0 %v5979_v47, %s6443_s17  ;;  %v3659_v22 = vsel %vm3656_vm7, %v3642_v27, %v5902_v2  ;;  %v3667_v47 = vsel %vm3656_vm7, %v3650_v32, %v5903_v59  ;;  %v5913_v6 = vunpack.i.h.bf16 %v8415_v50  ;;  %v5912_v18 = vunpack.i.l.bf16 %v8415_v50  ;;  %v8897_v50 = vld [vmem:[#allocation46_spill] sm:$0xff] }
 0xc5e   : > { %v3645_v58 = vsel %vm748_vm0, %v8897_v50, %v5917_v53  ;;  %v5937_v53 = vunpack.i.l.bf16 %v8425_v60 }
 0xc5f   : > { %v3662_v3 = vsel %vm3656_vm7, %v3645_v58, %v5927_v37  ;;  %v3644_v10 = vsel %vm748_vm0, %v8899_v1, %v5912_v18  ;;  %v3652_v27 = vsel %vm748_vm0, %v8900_v4, %v5913_v6  ;;  %v8903_v37 = vld [vmem:[#allocation48_spill] sm:$0xff] }
 0xc60   : > { %5970 = vrot.lane.b32.xlu1 %v5969_v40, %s6443_s17  ;;  %v8419_v55 = vpop.permute.xlu0 %5920 }
 0xc61   : > { %v5923_v34 = vunpack.i.h.bf16 %v8419_v55  ;;  %v5922_v25 = vunpack.i.l.bf16 %v8419_v55 }
 0xc63   : > { %v3661_v24 = vsel %vm3656_vm7, %v3644_v10, %v5922_v25  ;;  %v3669_v7 = vsel %vm3656_vm7, %v3652_v27, %v5923_v34 }
 0xc64   : > { %5985 = vrot.lane.b32.xlu1 %v5984_v29, %s6443_s17  ;;  %v8423_v14 = vpop.permute.xlu0 %5930  ;;  %s6335_s17 = sshll.u32 %s6446_s29, 4  ;;  %s6336_s17 = int_to_ptr.vmem [resolvable:$false] %s6335_s17 }
 0xc65   : > { %v5933_v23 = vunpack.i.h.bf16 %v8423_v14  ;;  %v5932_v32 = vunpack.i.l.bf16 %v8423_v14  ;;  %s6337_s18 = scalar_lea.vmem %s6336_s17, 16384  ;;  %p6338_p5 = scmp.lt.s32.totalorder %s8522_s13, %s6336_s17 }
 0xc66   : > { %p6339_p9 = scmp.lt.s32.totalorder %s6337_s18, %s6331_s27 }
 0xc68   : > { %v8434_v17 = vpop.permute.xlu0 %5940  ;;  %p6340_p12 = por %p6339_p9, %p6338_p5 }
 0xc69   : > { %v5943_v54 = vunpack.i.h.bf16 %v8434_v17  ;;  %v5942_v57 = vunpack.i.l.bf16 %v8434_v17 }
 0xc6a   : > { %p6341_p2 = pnand %p6340_p12, %p6334_p3 }
 0xcc2   : > { %v5946_v11 = vpop.permute.xlu1 %5945 }
 0xcc3   : > { %v5947_v33 = vunpack.i.l.bf16 %v5946_v11  ;;  %v5948_v43 = vunpack.i.h.bf16 %v5946_v11 }
 0xcc5   : > { %v3675_v30 = vsel %vm3673_vm8, %v3658_v45, %v5947_v33  ;;  %v3683_v46 = vsel %vm3673_vm8, %v3666_v9, %v5948_v43 }
 0xcc6   : > { %v5951_v56 = vpop.permute.xlu1 %5950 }
 0xcc7   : > { %v5953_v44 = vunpack.i.h.bf16 %v5951_v56  ;;  %v5952_v36 = vunpack.i.l.bf16 %v5951_v56  ;;  %v5966_v12 = vpop.permute.xlu0 %5965 }
 0xcc8   : > { %v5968_v51 = vunpack.i.h.bf16 %v5966_v12  ;;  %v5967_v40 = vunpack.i.l.bf16 %v5966_v12  ;;  %v8902_v12 = vld [vmem:[#allocation57_spill] sm:$0xff] }
 0xcc9   : > { %v3674_v61 = vsel %vm3673_vm8, %v3657_v62, %v5952_v36  ;;  %v3682_v29 = vsel %vm3673_vm8, %v3665_v19, %v5953_v44  ;;  %v8901_v44 = vld [vmem:[#allocation49_spill] sm:$0xff]  ;;  %v3654_v45 = vsel %vm748_vm0, %v8902_v12, %v5933_v23 }
 0xcca   : > { %v8458_v48 = vpop.permute.xlu1 %5955  ;;  %5091 = vmatprep.mubr.f32.mxu0 %v3674_v61  ;;  %5103 = vmatprep.mubr.f32.mxu1 %v3682_v29  ;;  %v3676_v8 = vsel %vm3673_vm8, %v3659_v22, %v5967_v40  ;;  %v3684_v15 = vsel %vm3673_vm8, %v3667_v47, %v5968_v51  ;;  %v3646_v36 = vsel %vm748_vm0, %v8901_v44, %v5932_v32 }
 0xccb   : > { %5092 = vmatmul.mubr.f32.vlgmr.msra.gmra.mrb[96].mxu0 %v3675_v30  ;;  %5104 = vmatmul.mubr.f32.vlgmr.msra.gmra.mrb[80].mxu1 %v3683_v46  ;;  %v5976_v0 = vpop.permute.xlu0 %5975  ;;  %v5958_v17 = vunpack.i.h.bf16 %v8458_v48  ;;  %v5957_v63 = vunpack.i.l.bf16 %v8458_v48  ;;  %v3663_v60 = vsel %vm3656_vm7, %v3646_v36, %v5942_v57  ;;  %v3671_v9 = vsel %vm3656_vm7, %v3654_v45, %v5943_v54  ;;  %v8904_v46 = vld [vmem:[#allocation56_spill] sm:$0xff] }
 0xccc   : > { %5094 = vmatprep.mubr.f32.mxu0 %v3676_v8  ;;  %5106 = vmatprep.mubr.f32.mxu1 %v3684_v15  ;;  %v5978_v42 = vunpack.i.h.bf16 %v5976_v0  ;;  %v5977_v55 = vunpack.i.l.bf16 %v5976_v0  ;;  %v3647_v48 = vsel %vm748_vm0, %v8903_v37, %v5937_v53  ;;  %v3655_v8 = vsel %vm748_vm0, %v8904_v46, %v5938_v20 }
 0xccd   : > { %v3664_v15 = vsel %vm3656_vm7, %v3647_v48, %v5957_v63  ;;  %v3672_v6 = vsel %vm3656_vm7, %v3655_v8, %v5958_v17 }
 0xcce   : > { %v5961_v49 = vpop.permute.xlu1 %5960  ;;  %v3678_v33 = vsel %vm3673_vm8, %v3661_v24, %v5977_v55  ;;  %v3686_v14 = vsel %vm3673_vm8, %v3669_v7, %v5978_v42 }
 0xccf   : > { %v5963_v11 = vunpack.i.h.bf16 %v5961_v49  ;;  %v5962_v62 = vunpack.i.l.bf16 %v5961_v49  ;;  %v5981_v19 = vpop.permute.xlu0 %5980 }
 0xcd0   : > { %v5983_v13 = vunpack.i.h.bf16 %v5981_v19  ;;  %v5982_v26 = vunpack.i.l.bf16 %v5981_v19 }
 0xcd1   : > { %v3677_v2 = vsel %vm3673_vm8, %v3660_v52, %v5962_v62  ;;  %v3685_v5 = vsel %vm3673_vm8, %v3668_v16, %v5963_v11 }
 0xcd2   : > { %5095 = vmatmul.mubr.f32.gmra.mrb[98].mxu0 %v3677_v2  ;;  %5107 = vmatmul.mubr.f32.gmra.mrb[82].mxu1 %v3685_v5  ;;  %v5971_v59 = vpop.permute.xlu1 %5970  ;;  %v3680_v61 = vsel %vm3673_vm8, %v3663_v60, %v5982_v26  ;;  %v3688_v29 = vsel %vm3673_vm8, %v3671_v9, %v5983_v13 }
 0xcd3   : > { %v5973_v43 = vunpack.i.h.bf16 %v5971_v59  ;;  %v5972_v56 = vunpack.i.l.bf16 %v5971_v59  ;;  %5097 = vmatprep.mubr.f32.mxu0 %v3678_v33  ;;  %5109 = vmatprep.mubr.f32.mxu1 %v3686_v14 }
 0xcd5   : > { %v3679_v51 = vsel %vm3673_vm8, %v3662_v3, %v5972_v56  ;;  %v3687_v40 = vsel %vm3673_vm8, %v3670_v39, %v5973_v43 }
 0xcd6   : > { %5098 = vmatmul.mubr.f32.gmra.mrb[100].mxu0 %v3679_v51  ;;  %5110 = vmatmul.mubr.f32.gmra.mrb[84].mxu1 %v3687_v40  ;;  %v5986_v22 = vpop.permute.xlu1 %5985 }
 0xcd7   : > { %v5988_v30 = vunpack.i.h.bf16 %v5986_v22  ;;  %v5987_v47 = vunpack.i.l.bf16 %v5986_v22  ;;  %5100 = vmatprep.mubr.f32.mxu0 %v3680_v61  ;;  %5112 = vmatprep.mubr.f32.mxu1 %v3688_v29 }
 0xcd9   : > { %v3681_v18 = vsel %vm3673_vm8, %v3664_v15, %v5987_v47  ;;  %v3689_v0 = vsel %vm3673_vm8, %v3672_v6, %v5988_v30 }
 0xcda   : > { %5101 = vmatmul.mubr.f32.gmra.mrb[102].mxu0 %v3681_v18  ;;  %5113 = vmatmul.mubr.f32.gmra.mrb[86].mxu1 %v3689_v0 }
 0xcdb   : > { %6344 = shalt.err (!%p6341_p2)
}
 0xcdc   : > { %s6345_s16 = scalar_lea.hbm %s8520_s7, 8192  ;;  %s6349_s12 = scalar_lea.hbm %s8634_s6, 16384 }
 0xcdd   : > { %p6346_p13 = scmp.ne.s32.totalorder %s8520_s7, %s6345_s16  ;;  %p6350_p4 = scmp.lt.u32.totalorder %s8520_s7, %s8634_s6 }
 0xcde   : > { %p6351_p7 = scmp.lt.u32.totalorder %s6349_s12, %s6345_s16  ;;  %p6353_p11 = scmp.lt.u32.totalorder %s6345_s16, %s8520_s7 }
 0xcdf   : > { %p6347_p6 = pnand %p6346_p13, %p8905_p0 }
 0xce0   : > { %p6352_p8 = por %p6351_p7, %p6350_p4 }
 0xce1   : > { %p6348_p10 = pneg %p6347_p6 }
 0xce2   : > { %p6354_p1 = por %p6353_p11, %p6352_p8 }
 0xce4   : > { %p6355_p3 = pnand %p6354_p1, %p6348_p10 }
 0xce6   : > { %6358 = shalt.err (!%p6355_p3)
}
 0xce7   : > { %s6447_s27 = smov 128   ;;  %s6448_s29 = smov 8   ;;  %v4223_v34 = vld [vmem:[%s8632_s4] ss:$0 sm:$0xff] }
 0xce8   : > { %5558 = dma.vmem_to_hbm [thread:$0]  (%p8905_p0), %s8522_s13, 8192, %s8520_s7, %s3880_s20, %s6447_s27, %s6447_s27, %s6448_s29  }
 0xce9   : > { %s8556_s16 = scalar_lea.vmem [#allocation8], %s4042_s14  ;;  %s4233_s14 = sshll.u32 %s6506_s25, 11 }
 0xcea   : > { %s3893_s13 = sshll.u32 %s8556_s16, 4  ;;  %s8575_s19 = scalar_lea.hbm %s8633_s5, %s4233_s14  ;;  %s8577_s13 = int_to_ptr.vmem [resolvable:$true] %s3893_s13 }
 0xceb   : > { %s3875_s25 = scalar_lea.sflag [#allocation4], %s6663_s9  ;;  %s6359_s30 = scalar_lea.vmem %s8577_s13, 2048 }
 0xcec   : > { %p6360_p5 = scmp.ne.s32.totalorder %s8577_s13, %s6359_s30  ;;  %s6449_s12 = smov [#allocation8]  }
 0xced   : > { %s6363_s10 = sshll.u32 %s6449_s12, 4  ;;  %s6364_s10 = int_to_ptr.vmem [resolvable:$false] %s6363_s10 }
 0xcee   : > { %p6361_p9 = pnand %p6360_p5, %p8905_p0  ;;  %s6365_s15 = scalar_lea.vmem %s6364_s10, 4096 }
 0xcef   : > { %p6366_p2 = scmp.lt.s32.totalorder %s8577_s13, %s6364_s10  ;;  %p6367_p13 = scmp.lt.s32.totalorder %s6365_s15, %s6359_s30 }
 0xcf0   : > { %p6362_p12 = pneg %p6361_p9 }
 0xcf1   : > { %p6368_p6 = por %p6367_p13, %p6366_p2 }
 0xcf3   : > { %p6369_p10 = pnand %p6368_p6, %p6362_p12 }
 0xd9e   : > { %v5093_v25 = vpop.f32.mrb[96].mxu0  ;;  %v5105_v41 = vpop.f32.mrb[80].mxu1 }
 0xd9f   : > { %v3785_v31 = vadd.f32 %v5093_v25, %v4223_v34  ;;  %v3825_v35 = vadd.f32 %v5105_v41, %v4223_v34  ;;  %v3779_v28 = vpop.f32.mrb[97].mxu0  ;;  %v3819_v52 = vpop.f32.mrb[81].mxu1 }
 0xda0   : > { %v3780_v16 = vadd.f32 %v4223_v34, %v3779_v28  ;;  %v3820_v50 = vadd.f32 %v4223_v34, %v3819_v52 }
 0xda1   : > { %3859 = vst [vmem:[%s8556_s16 + $0x8] sm:$0xff] %v3785_v31  ;;  %3867 = vst [vmem:[%s8556_s16 + $0x48] sm:$0xff] %v3825_v35 }
 0xda2   : > { %3858 = vst [vmem:[%s8556_s16] sm:$0xff] %v3780_v16  ;;  %3866 = vst [vmem:[%s8556_s16 + $0x40] sm:$0xff] %v3820_v50 }
 0xda5   : > { %v5096_v58 = vpop.f32.mrb[98].mxu0  ;;  %v5108_v21 = vpop.f32.mrb[82].mxu1 }
 0xda6   : > { %v3795_v38 = vadd.f32 %v5096_v58, %v4223_v34  ;;  %v3835_v42 = vadd.f32 %v5108_v21, %v4223_v34  ;;  %v3789_v55 = vpop.f32.mrb[99].mxu0  ;;  %v3829_v49 = vpop.f32.mrb[83].mxu1 }
 0xda7   : > { %v3790_v3 = vadd.f32 %v4223_v34, %v3789_v55  ;;  %v3830_v39 = vadd.f32 %v4223_v34, %v3829_v49 }
 0xda8   : > { %3861 = vst [vmem:[%s8556_s16 + $0x18] sm:$0xff] %v3795_v38  ;;  %3869 = vst [vmem:[%s8556_s16 + $0x58] sm:$0xff] %v3835_v42 }
 0xda9   : > { %3860 = vst [vmem:[%s8556_s16 + $0x10] sm:$0xff] %v3790_v3  ;;  %3868 = vst [vmem:[%s8556_s16 + $0x50] sm:$0xff] %v3830_v39  ;;  %v5099_v11 = vpop.f32.mrb[100].mxu0  ;;  %v5111_v62 = vpop.f32.mrb[84].mxu1 }
 0xdaa   : > { %v3805_v19 = vadd.f32 %v5099_v11, %v4223_v34  ;;  %v3845_v1 = vadd.f32 %v5111_v62, %v4223_v34  ;;  %v3799_v10 = vpop.f32.mrb[101].mxu0  ;;  %v3839_v4 = vpop.f32.mrb[85].mxu1 }
 0xdab   : > { %v3800_v27 = vadd.f32 %v4223_v34, %v3799_v10  ;;  %v3840_v23 = vadd.f32 %v4223_v34, %v3839_v4 }
 0xdac   : > { %3863 = vst [vmem:[%s8556_s16 + $0x28] sm:$0xff] %v3805_v19  ;;  %3871 = vst [vmem:[%s8556_s16 + $0x68] sm:$0xff] %v3845_v1 }
 0xdad   : > { %3862 = vst [vmem:[%s8556_s16 + $0x20] sm:$0xff] %v3800_v27  ;;  %3870 = vst [vmem:[%s8556_s16 + $0x60] sm:$0xff] %v3840_v23  ;;  %v5102_v32 = vpop.f32.mrb[102].mxu0  ;;  %v5114_v24 = vpop.f32.mrb[86].mxu1 }
 0xdae   : > { %v3815_v7 = vadd.f32 %v5102_v32, %v4223_v34  ;;  %v3855_v54 = vadd.f32 %v5114_v24, %v4223_v34  ;;  %v3809_v57 = vpop.f32.mrb[103].mxu0  ;;  %v3849_v2 = vpop.f32.mrb[87].mxu1 }
 0xdaf   : > { %v3810_v5 = vadd.f32 %v4223_v34, %v3809_v57  ;;  %v3850_v13 = vadd.f32 %v4223_v34, %v3849_v2 }
 0xdb0   : > { %3865 = vst [vmem:[%s8556_s16 + $0x38] sm:$0xff] %v3815_v7  ;;  %3873 = vst [vmem:[%s8556_s16 + $0x78] sm:$0xff] %v3855_v54 }
 0xdb1   : > { %3864 = vst [vmem:[%s8556_s16 + $0x30] sm:$0xff] %v3810_v5  ;;  %3872 = vst [vmem:[%s8556_s16 + $0x70] sm:$0xff] %v3850_v13 }
 0xdb2   : > { %6372 = shalt.err (!%p6369_p10)
}
 0xdb3   : > { %s6373_s17 = scalar_lea.hbm %s8575_s19, 2048  ;;  %s6377_s14 = scalar_lea.hbm %s8633_s5, 4096 }
 0xdb4   : > { %p6374_p4 = scmp.ne.s32.totalorder %s8575_s19, %s6373_s17  ;;  %p6378_p11 = scmp.lt.u32.totalorder %s8575_s19, %s8633_s5 }
 0xdb5   : > { %p6379_p1 = scmp.lt.u32.totalorder %s6377_s14, %s6373_s17  ;;  %p6381_p5 = scmp.lt.u32.totalorder %s6373_s17, %s8575_s19 }
 0xdb6   : > { %p6375_p7 = pnand %p6374_p4, %p8905_p0 }
 0xdb7   : > { %p6380_p3 = por %p6379_p1, %p6378_p11 }
 0xdb8   : > { %p6376_p8 = pneg %p6375_p7 }
 0xdb9   : > { %p6382_p9 = por %p6381_p5, %p6380_p3 }
 0xdbb   : > { %p6383_p12 = pnand %p6382_p9, %p6376_p8 }
 0xdbd   : > { %6386 = shalt.err (!%p6383_p12)
}
 0xdbe   : > { %5557 = dma.vmem_to_hbm [thread:$0]  (%p8905_p0), %s8577_s13, 2048, %s8575_s19, %s3875_s25, %s6447_s27, %s6447_s27, %s6448_s29  }
 0xdbf PF: > { %s3924_s30 = sand.u32 1, %s6421_s21   ;;  %p8906_p2 = scmp.ne.s32.totalorder %s8716_s28, 0 }
 0xdc0   : > { %p8907_p13 = scmp.ge.s32.totalorder %s6433_s24, 2  ;;  %s3925_s12 = scalar_lea.sflag [#allocation4], %s3924_s30 }
 0xdc2   : > { %p5573_p6 = pnand %p8907_p13, %p8906_p2 }
 0xdc4   : > { %6412 = dma.done.wait (!%p5573_p6), %s3925_s12, 2048  }
 0xdc5   : > { %6414 = vsyncadd (!%p5573_p6), %s3925_s12, 4294965248  ;;  %s3934_s8 = scalar_lea.sflag [#allocation10], %s3924_s30 }
 0xdc6   : > { %6416 = dma.done.wait (!%p5573_p6), %s3934_s8, 8192  }
 0xdc7   : > { %6418 = vsyncadd (!%p5573_p6), %s3934_s8, 4294959104  ;;  %p24_p0 = scmp.ge.s32.totalorder %s6598_s26, 4   ;;  %s8908_s21 = smov %s6425_s22 }
 0xdc8   : > { %s8909_s22 = smov %s6429_s23  ;;  %s8910_s23 = smov %s6607_s11 }
 0xdc9   : > { %s8911_s24 = smov %s6598_s26  ;;  %26 = sbr.rel (!%p24_p0) target bundleno = 8 (0x8), region = 113 }
 0xdd0   :  { %3939 = vsyncpa [#allocation3], 1 }
 0xdd1   :  { %3941 = vsyncpa [#allocation3 + $0x1], 1 }
 0xdd2   :  { %3942 = vsyncpa [#allocation6], 1 }
 0xdd3   :  { %3943 = vsyncpa [#allocation4], 1 }
 0xdd4   :  { %3945 = vsyncpa [#allocation4 + $0x1], 1 }
 0xdd5   :  { %3946 = vsyncpa [#allocation10], 1 }
 0xdd6   :  { %3948 = vsyncpa [#allocation10 + $0x1], 1 }

</bundles_post_ra>
